<compile_context>
chip_gen: v6e
topology: v6e:2x2x1
jax: 0.10.0
libtpu: 0.0.40
codegen_flags: <defaults>
</compile_context>

<pallas_src>
import functools

import jax
import jax.numpy as jnp
from jax.experimental import pallas as pl
from jax.experimental.pallas import tpu as pltpu


def _gcn_kernel(a_ref, h0_ref, p_ref, w_ref, b_ref,
                fw1_ref, fb1_ref, fw2_ref, fb2_ref,
                out_ref, h_buf, hw_buf, acc_ref, *, a_resident, tm):
    l = pl.program_id(0)                 # layer index   (slow / outer axis)
    i = pl.program_id(1)                 # row-tile index (fast / inner axis)
    n_layers = pl.num_programs(0)
    n_tiles = pl.num_programs(1)

    # Once per layer: hoist the small (F,F) weight matmul out of the tile loop.
    # Layer 0 reads the embedded features; later layers read the previous
    # layer's activations from the VMEM H scratch.
    @pl.when(i == 0)
    def _():
        @pl.when(l == 0)
        def _():
            acc_ref[...] = jnp.zeros_like(acc_ref)
            hw_buf[...] = jnp.dot(
                h0_ref[...], w_ref[...],
                preferred_element_type=jnp.float32).astype(hw_buf.dtype)

        @pl.when(l > 0)
        def _():
            hw_buf[...] = jnp.dot(
                h_buf[...], w_ref[...],
                preferred_element_type=jnp.float32).astype(hw_buf.dtype)

    row = pl.multiple_of(i * tm, tm)
    if a_resident and tm != a_ref.shape[0]:
        a_tile = a_ref[pl.ds(row, tm), :]     # slice rows of the resident A
    else:
        a_tile = a_ref[...]                   # streamed (tm, N) tile / full A

    # GraphConv (norm='both') with BN folded:  ReLU(A_hat[tile] @ (H @ W') + b')
    h_new = jnp.maximum(
        jnp.dot(a_tile, hw_buf[...], preferred_element_type=jnp.float32)
        + b_ref[...], 0.0)                                        # (TM, F) f32
    h_buf[pl.ds(row, tm), :] = h_new.astype(h_buf.dtype)

    # dgl.mean_nodes: accumulate this tile's contribution on the last layer.
    @pl.when(l == n_layers - 1)
    def _():
        acc_ref[...] += jnp.dot(p_ref[...], h_new,
                                preferred_element_type=jnp.float32)

    # FC head (fc1 -> ReLU -> [dropout=identity in eval] -> fc2), once, on the
    # final grid step.  fc2 is 128-lane padded in glue -> lane-dense store.
    @pl.when((l == n_layers - 1) & (i == n_tiles - 1))
    def _():
        z = jnp.maximum(
            jnp.dot(acc_ref[...], fw1_ref[...],
                    preferred_element_type=jnp.float32) + fb1_ref[...], 0.0)
        out_ref[...] = (jnp.dot(z, fw2_ref[...],
                                preferred_element_type=jnp.float32)
                        + fb2_ref[...])


def _rup(x, m):
    return ((int(x) + m - 1) // m) * m


def _padded_bytes(shape, dtype):
    """VMEM bytes of a block after Mosaic lane/sublane padding."""
    dt = jnp.dtype(dtype)
    packing = max(1, 4 // dt.itemsize)           # sublane packing of sub-32-bit
    dims = [int(d) for d in shape]
    dims[-1] = _rup(dims[-1], 128)
    if len(dims) >= 2:
        dims[-2] = _rup(dims[-2], 8 * packing)
    total = 1
    for d in dims:
        total *= d
    return total * dt.itemsize


def gcn_forward(h0, a_hat, pool, params, *, num_classes, tile_rows=512,
                a_resident=None):
    """Fused 3x(GraphConv+foldedBN+ReLU) -> mean_nodes -> fc1 -> fc2.

    h0:    (N, F)  bf16 embedded node features
    a_hat: (N, N)  bf16 DGL-normalized dense adjacency (A_hat[dst, src])
    pool:  (G, N)  f32  per-graph mean-pooling weights (1/|V_g| on membership)
    params = (w_stack (L,F,F) bf16, b_stack (L,1,F) f32, fw1, fb1,
              fw2_padded (F//2,128), fb2_padded (1,128))
    a_resident: None = auto (resident iff it fits VMEM), or force True/False.
    """
    w_stack, b_stack, fw1, fb1, fw2p, fb2p = params
    n, f = h0.shape
    g = pool.shape[0]
    n_layers = w_stack.shape[0]
    out_pad = fw2p.shape[1]
    assert a_hat.shape == (n, n) and pool.shape == (g, n)

    # ---- generation-aware VMEM ceiling (128 MiB v5e/v6e, 64 MiB v7x) -------
    try:
        vmem_cap = int(pltpu.get_tpu_info().vmem_capacity_bytes)
    except Exception:
        vmem_cap = 64 << 20                      # conservative fallback
    ceiling = int(vmem_cap * 0.85)               # ~109 MiB v5e/v6e, ~54 MiB v7x

    def block_bytes(resident, tm):
        # Inputs/outputs are double-buffered by the auto-pipeliner (x2).
        # TODO(synk): pl.Buffered(1) on the constant-index A/h0/pool specs
        # would drop that factor for them; omitted for lowering portability.
        blocks = [
            ((n, n) if resident else (tm, n), a_hat.dtype),
            ((n, f), h0.dtype),
            ((g, tm), pool.dtype),
            ((f, f), w_stack.dtype),
            ((1, f), b_stack.dtype),
            (fw1.shape, fw1.dtype), (fb1.shape, fb1.dtype),
            (fw2p.shape, fw2p.dtype), (fb2p.shape, fb2p.dtype),
            ((g, out_pad), jnp.float32),                         # output block
        ]
        io_bytes = sum(2 * _padded_bytes(s, d) for s, d in blocks)
        scratch = (2 * _padded_bytes((n, f), jnp.bfloat16)       # H + HW scratch
                   + _padded_bytes((g, f), jnp.float32))         # pooled accum
        return io_bytes + scratch

    # ---- row-tile candidates (biggest first): 128-aligned divisors or N ----
    cands = []
    if n <= tile_rows:
        cands.append(n)
    c = (min(tile_rows, n) // 128) * 128
    while c >= 128:
        if n % c == 0 and c not in cands:
            cands.append(c)
        c -= 128
    if not cands:
        cands.append(n)
    cands = sorted(set(cands), reverse=True)

    if a_resident is None:
        a_res = block_bytes(True, cands[-1]) <= ceiling
    else:
        a_res = bool(a_resident)
    tm = next((c for c in cands if block_bytes(a_res, c) <= ceiling), cands[-1])
    assert n % tm == 0
    n_tiles = n // tm
    grid = (n_layers, n_tiles)

    need = block_bytes(a_res, tm)
    vmem_limit = int(min(ceiling, max(2 * need, 32 << 20)))

    # ---- advisory cost estimate (consistent with the chosen A path) --------
    flops = (2 * n_layers * n * f * f                # H @ W   (hoisted per layer)
             + 2 * n_layers * n * n * f              # A_hat @ HW
             + 2 * g * n * f                         # mean pooling
             + 2 * g * f * fw1.shape[1]              # fc1
             + 2 * g * fw1.shape[1] * out_pad)       # fc2 (padded)
    param_bytes = sum(int(p.size) * p.dtype.itemsize for p in params)
    a_bytes = n * n * a_hat.dtype.itemsize * (1 if a_res else n_layers)
    bytes_accessed = (a_bytes
                      + int(h0.size) * h0.dtype.itemsize
                      + int(pool.size) * pool.dtype.itemsize     # streamed ~once
                      + param_bytes + g * out_pad * 4)

    if a_res:
        # A_hat fully VMEM-resident: fetched once, rows sliced in-kernel.
        a_spec = pl.BlockSpec((n, n), lambda l, i: (0, 0))
    else:
        # Large-N fallback: stream destination-row tiles (re-read per layer).
        # TODO(synk): int8 (v5e/v6e) / fp8 (v7x) A_hat would halve this DMA.
        a_spec = pl.BlockSpec((tm, n), lambda l, i: (i, 0))

    last = n_layers - 1
    # pool is only consumed on the last layer; freeze its block index before
    # that so it is DMA'd ~once instead of once per layer.
    pool_spec = pl.BlockSpec((g, tm),
                             lambda l, i: (0, jnp.where(l == last, i, 0)))

    kernel = functools.partial(_gcn_kernel, a_resident=a_res, tm=tm)

    out = pl.pallas_call(
        kernel,
        out_shape=jax.ShapeDtypeStruct((g, out_pad), jnp.float32),
        grid_spec=pltpu.PrefetchScalarGridSpec(
            num_scalar_prefetch=0,
            grid=grid,
            in_specs=[
                a_spec,
                pl.BlockSpec((n, f), lambda l, i: (0, 0)),           # h0 (resident)
                pool_spec,
                pl.BlockSpec((None, f, f), lambda l, i: (l, 0, 0)),  # layer-l W (bf16)
                pl.BlockSpec((None, 1, f), lambda l, i: (l, 0, 0)),  # layer-l bias
                pl.BlockSpec(fw1.shape, lambda l, i: (0, 0)),
                pl.BlockSpec(fb1.shape, lambda l, i: (0, 0)),
                pl.BlockSpec(fw2p.shape, lambda l, i: (0, 0)),
                pl.BlockSpec(fb2p.shape, lambda l, i: (0, 0)),
            ],
            out_specs=pl.BlockSpec((g, out_pad), lambda l, i: (0, 0)),
            scratch_shapes=[
                pltpu.VMEM((n, f), jnp.bfloat16),    # H  : current layer output
                pltpu.VMEM((n, f), jnp.bfloat16),    # HW : hoisted H @ W_l
                pltpu.VMEM((g, f), jnp.float32),     # pooled accumulator
            ],
        ),
        compiler_params=pltpu.CompilerParams(
            # Both axes carry dependencies through core-local VMEM scratch
            # (HW/H across tiles, H across layers), so neither may be
            # "parallel".  TODO(synk): on v7x (2 TCs) with a non-resident A,
            # split into one pallas_call per layer with the tile axis
            # "parallel" (H round-trips via HBM); with resident A the single
            # fused call (1x A HBM read) wins on single-TC parts.
            dimension_semantics=("arbitrary", "arbitrary"),
            vmem_limit_bytes=vmem_limit,
        ),
        cost_estimate=pl.CostEstimate(flops=int(flops), transcendentals=0,
                                      bytes_accessed=int(bytes_accessed)),
    )(a_hat, h0, pool, w_stack, b_stack, fw1, fb1, fw2p, fb2p)
    return out[:, :num_classes]


# ---------------------------------------------------------------------------
# glue: parameter construction (deterministic) and pure-JAX reference
# ---------------------------------------------------------------------------

def _linear_init(key, fan_in, fan_out):
    bound = (6.0 / (fan_in + fan_out)) ** 0.5   # xavier-uniform (GraphConv default)
    return jax.random.uniform(key, (fan_in, fan_out), jnp.float32, -bound, bound)


def _bn_fold(keys, dim, eps=1e-5):
    kg, kb, km, kv = keys
    gamma = 1.0 + 0.1 * jax.random.normal(kg, (dim,), jnp.float32)
    beta = 0.1 * jax.random.normal(kb, (dim,), jnp.float32)
    running_mean = 0.1 * jax.random.normal(km, (dim,), jnp.float32)
    running_var = jax.random.uniform(kv, (dim,), jnp.float32, 0.5, 1.5)
    scale = gamma * jax.lax.rsqrt(running_var + eps)
    shift = beta - running_mean * scale
    return scale.reshape(1, dim), shift.reshape(1, dim)


def _reference(h0, a_hat, pool, w_stack, b_stack, fw1, fb1, fw2p, fb2p, nc):
    """Pure-JAX forward mirroring the kernel's numerics (bf16 A/H/W, f32 accum)."""
    hp = jax.lax.Precision.HIGHEST
    h = h0
    hf = None
    for l in range(w_stack.shape[0]):
        hw = jnp.dot(h, w_stack[l],
                     preferred_element_type=jnp.float32).astype(jnp.bfloat16)
        hf = jnp.maximum(
            jnp.dot(a_hat, hw, preferred_element_type=jnp.float32) + b_stack[l],
            0.0)
        h = hf.astype(jnp.bfloat16)
    hg = jnp.dot(pool, hf, preferred_element_type=jnp.float32, precision=hp)
    z = jnp.maximum(jnp.dot(hg, fw1, preferred_element_type=jnp.float32,
                            precision=hp) + fb1, 0.0)
    return (jnp.dot(z, fw2p, preferred_element_type=jnp.float32,
                    precision=hp) + fb2p)[:, :nc]


if __name__ == "__main__":
    # Small, module-consistent shapes (scaled-down dims; 2 graphs batched).
    vocab_size, embed_dim, hidden_dim, num_classes = 50, 32, 32, 2
    num_graphs, nodes_per_graph = 2, 384
    n_nodes = num_graphs * nodes_per_graph        # 768 -> 2 tiles of 384 / 6 of 128
    n_edges = 3072

    key = jax.random.PRNGKey(0)
    ks = jax.random.split(key, 26)

    # --- graph construction (glue) -----------------------------------------
    feat = jax.random.randint(ks[0], (n_nodes, 1), 0, vocab_size)  # g.ndata['feat']
    src = jax.random.randint(ks[1], (n_edges,), 0, n_nodes)
    dst = jax.random.randint(ks[2], (n_edges,), 0, n_nodes)
    # keep edges inside their own graph (mimics a batched DGL graph)
    dst = (dst % nodes_per_graph) + (src // nodes_per_graph) * nodes_per_graph

    A = jnp.zeros((n_nodes, n_nodes), jnp.float32).at[dst, src].add(1.0)  # A[d, s]
    out_deg = jnp.clip(jnp.sum(A, axis=0), 1.0, None)    # per source node
    in_deg = jnp.clip(jnp.sum(A, axis=1), 1.0, None)     # per destination node
    a_hat = ((in_deg ** -0.5)[:, None] * A * (out_deg ** -0.5)[None, :]
             ).astype(jnp.bfloat16)                      # bf16 halves A traffic

    graph_id = jnp.repeat(jnp.arange(num_graphs), nodes_per_graph)
    pool = (jnp.arange(num_graphs)[:, None] == graph_id[None, :]).astype(jnp.float32)
    pool = pool / jnp.sum(pool, axis=1, keepdims=True)   # dgl.mean_nodes weights

    # --- deterministic parameters (glue) ------------------------------------
    embed_w = 0.1 * jax.random.normal(ks[3], (vocab_size, embed_dim), jnp.float32)
    h0 = jnp.take(embed_w, feat[:, 0], axis=0).astype(jnp.bfloat16)  # Embedding gather

    w1 = _linear_init(ks[4], embed_dim, hidden_dim)
    b1 = 0.01 * jax.random.normal(ks[5], (1, hidden_dim), jnp.float32)
    w2 = _linear_init(ks[6], hidden_dim, hidden_dim)
    b2 = 0.01 * jax.random.normal(ks[7], (1, hidden_dim), jnp.float32)
    w3 = _linear_init(ks[8], hidden_dim, hidden_dim)
    b3 = 0.01 * jax.random.normal(ks[9], (1, hidden_dim), jnp.float32)

    s1, t1 = _bn_fold(ks[10:14], hidden_dim)
    s2, t2 = _bn_fold(ks[14:18], hidden_dim)
    s3, t3 = _bn_fold(ks[18:22], hidden_dim)

    # Fold eval-mode BN into GraphConv: W' = W*scale (bf16), b' = b*scale + shift.
    w_stack = jnp.stack([w1 * s1, w2 * s2, w3 * s3]).astype(jnp.bfloat16)
    b_stack = jnp.stack([b1 * s1 + t1, b2 * s2 + t2, b3 * s3 + t3])   # (3, 1, F) f32

    fw1 = _linear_init(ks[22], hidden_dim, hidden_dim // 2)
    fb1 = 0.01 * jax.random.normal(ks[23], (1, hidden_dim // 2), jnp.float32)
    fw2 = _linear_init(ks[24], hidden_dim // 2, num_classes)
    fb2 = 0.01 * jax.random.normal(ks[25], (1, num_classes), jnp.float32)

    # Lane-dense epilogue: zero-pad fc2 to 128 output lanes; wrapper slices back.
    out_pad = 128
    fw2p = jnp.zeros((hidden_dim // 2, out_pad), jnp.float32).at[:, :num_classes].set(fw2)
    fb2p = jnp.zeros((1, out_pad), jnp.float32).at[:, :num_classes].set(fb2)

    params = (w_stack, b_stack, fw1, fb1, fw2p, fb2p)

    # TODO(synk): training-mode stochastic dropout and batch-stat BN are not
    # implemented (eval-mode forward only: dropout=identity, BN folded).

    # Default path: auto-selected -> VMEM-resident A, large (384-row) tiles.
    logits = gcn_forward(h0, a_hat, pool, params, num_classes=num_classes)
    jax.block_until_ready(logits)
    assert logits.shape == (num_graphs, num_classes)

    # Fallback path: forced streaming with 128-row tiles (exercises the
    # large-N code path on the same small problem).
    logits_s = gcn_forward(h0, a_hat, pool, params, num_classes=num_classes,
                           tile_rows=128, a_resident=False)
    jax.block_until_ready(logits_s)

    ref = _reference(h0, a_hat, pool, w_stack, b_stack, fw1, fb1, fw2p, fb2p,
                     num_classes)
    assert bool(jnp.allclose(logits, ref, atol=2e-3, rtol=2e-3)), (logits, ref)
    assert bool(jnp.allclose(logits_s, ref, atol=2e-3, rtol=2e-3)), (logits_s, ref)

    print("KERNEL_OK")
</pallas_src>

<mosaic_0001>
module attributes {stable_mosaic.version = 11 : i64} {
  func.func @_gcn_kernel(%arg0: i32, %arg1: i32, %arg2: memref<768x768xbf16, #tpu.memory_space<vmem>>, %arg3: memref<768x32xbf16, #tpu.memory_space<vmem>>, %arg4: memref<2x384xf32, #tpu.memory_space<vmem>>, %arg5: memref<1x32x32xbf16, #tpu.memory_space<vmem>>, %arg6: memref<1x1x32xf32, #tpu.memory_space<vmem>>, %arg7: memref<32x16xf32, #tpu.memory_space<vmem>>, %arg8: memref<1x16xf32, #tpu.memory_space<vmem>>, %arg9: memref<16x128xf32, #tpu.memory_space<vmem>>, %arg10: memref<1x128xf32, #tpu.memory_space<vmem>>, %arg11: memref<2x128xf32, #tpu.memory_space<vmem>>, %arg12: memref<768x32xbf16, #tpu.memory_space<vmem>>, %arg13: memref<768x32xbf16, #tpu.memory_space<vmem>>, %arg14: memref<2x32xf32, #tpu.memory_space<vmem>>) attributes {dimension_semantics = [#tpu.dimension_semantics<arbitrary>, #tpu.dimension_semantics<arbitrary>], iteration_bounds = array<i64: 3, 2>, scalar_prefetch = 0 : i64, scratch_operands = 3 : i64, tpu.core_type = #tpu.core_type<tc>, window_params = [{pipeline_mode = #tpu.pipeline_mode<synchronous>, transform_indices = @transform_0, window_bounds = array<i64: 768, 768>}, {pipeline_mode = #tpu.pipeline_mode<synchronous>, transform_indices = @transform_1, window_bounds = array<i64: 768, 32>}, {transform_indices = @transform_2, window_bounds = array<i64: 2, 384>}, {transform_indices = @transform_3, window_bounds = array<i64: 1, 32, 32>}, {transform_indices = @transform_4, window_bounds = array<i64: 1, 1, 32>}, {pipeline_mode = #tpu.pipeline_mode<synchronous>, transform_indices = @transform_5, window_bounds = array<i64: 32, 16>}, {pipeline_mode = #tpu.pipeline_mode<synchronous>, transform_indices = @transform_6, window_bounds = array<i64: 1, 16>}, {pipeline_mode = #tpu.pipeline_mode<synchronous>, transform_indices = @transform_7, window_bounds = array<i64: 16, 128>}, {pipeline_mode = #tpu.pipeline_mode<synchronous>, transform_indices = @transform_8, window_bounds = array<i64: 1, 128>}, {pipeline_mode = #tpu.pipeline_mode<synchronous>, transform_indices = @transform_9, window_bounds = array<i64: 2, 128>}]} {
    %c0_i32 = arith.constant 0 : i32
    %0 = arith.cmpi eq, %arg1, %c0_i32 : i32
    %1 = arith.extui %0 : i1 to i32
    %c0_i32_0 = arith.constant 0 : i32
    %2 = arith.cmpi ne, %1, %c0_i32_0 : i32
    scf.if %2 {
      %c0_i32_11 = arith.constant 0 : i32
      %26 = arith.cmpi eq, %arg0, %c0_i32_11 : i32
      %27 = arith.extui %26 : i1 to i32
      %c0_i32_12 = arith.constant 0 : i32
      %28 = arith.cmpi ne, %27, %c0_i32_12 : i32
      scf.if %28 {
        %cst_15 = arith.constant 0.000000e+00 : f32
        %32 = vector.broadcast %cst_15 : f32 to vector<2x32xf32>
        %c0_16 = arith.constant 0 : index
        %c0_17 = arith.constant 0 : index
        %33 = vector.load %arg14[%c0_16, %c0_17] : memref<2x32xf32, #tpu.memory_space<vmem>>, vector<2x32xf32>
        tpu.vector_store %arg14[%c0_16, %c0_17], %32 {strides = array<i32>} : memref<2x32xf32, #tpu.memory_space<vmem>>, vector<2x32xf32>,
        %c0_18 = arith.constant 0 : index
        %c0_19 = arith.constant 0 : index
        %34 = vector.load %arg3[%c0_18, %c0_19] : memref<768x32xbf16, #tpu.memory_space<vmem>>, vector<768x32xbf16>
        %c0_20 = arith.constant 0 : index
        %c0_21 = arith.constant 0 : index
        %c0_22 = arith.constant 0 : index
        %35 = vector.load %arg5[%c0_20, %c0_21, %c0_22] : memref<1x32x32xbf16, #tpu.memory_space<vmem>>, vector<1x32x32xbf16>
        %36 = vector.shape_cast %35 : vector<1x32x32xbf16> to vector<32x32xbf16>
        %cst_23 = arith.constant dense<0.000000e+00> : vector<768x32xf32>
        %37 = tpu.matmul %34, %36, %cst_23 {dimension_numbers = #tpu.dot_dimension_numbers<[1], [0], [0], [1], [0, 0, 1, 1], [], []>} : vector<768x32xbf16>, vector<32x32xbf16>, vector<768x32xf32> -> vector<768x32xf32>
        %38 = arith.truncf %37 : vector<768x32xf32> to vector<768x32xbf16>
        %c0_24 = arith.constant 0 : index
        %c0_25 = arith.constant 0 : index
        %39 = vector.load %arg13[%c0_24, %c0_25] : memref<768x32xbf16, #tpu.memory_space<vmem>>, vector<768x32xbf16>
        tpu.vector_store %arg13[%c0_24, %c0_25], %38 {strides = array<i32>} : memref<768x32xbf16, #tpu.memory_space<vmem>>, vector<768x32xbf16>,
      } else {
      }
      %c0_i32_13 = arith.constant 0 : i32
      %29 = arith.cmpi sgt, %arg0, %c0_i32_13 : i32
      %30 = arith.extui %29 : i1 to i32
      %c0_i32_14 = arith.constant 0 : i32
      %31 = arith.cmpi ne, %30, %c0_i32_14 : i32
      scf.if %31 {
        %c0_15 = arith.constant 0 : index
        %c0_16 = arith.constant 0 : index
        %32 = vector.load %arg12[%c0_15, %c0_16] : memref<768x32xbf16, #tpu.memory_space<vmem>>, vector<768x32xbf16>
        %c0_17 = arith.constant 0 : index
        %c0_18 = arith.constant 0 : index
        %c0_19 = arith.constant 0 : index
        %33 = vector.load %arg5[%c0_17, %c0_18, %c0_19] : memref<1x32x32xbf16, #tpu.memory_space<vmem>>, vector<1x32x32xbf16>
        %34 = vector.shape_cast %33 : vector<1x32x32xbf16> to vector<32x32xbf16>
        %cst_20 = arith.constant dense<0.000000e+00> : vector<768x32xf32>
        %35 = tpu.matmul %32, %34, %cst_20 {dimension_numbers = #tpu.dot_dimension_numbers<[1], [0], [0], [1], [0, 0, 1, 1], [], []>} : vector<768x32xbf16>, vector<32x32xbf16>, vector<768x32xf32> -> vector<768x32xf32>
        %36 = arith.truncf %35 : vector<768x32xf32> to vector<768x32xbf16>
        %c0_21 = arith.constant 0 : index
        %c0_22 = arith.constant 0 : index
        %37 = vector.load %arg13[%c0_21, %c0_22] : memref<768x32xbf16, #tpu.memory_space<vmem>>, vector<768x32xbf16>
        tpu.vector_store %arg13[%c0_21, %c0_22], %36 {strides = array<i32>} : memref<768x32xbf16, #tpu.memory_space<vmem>>, vector<768x32xbf16>,
      } else {
      }
    } else {
    }
    %c384_i32 = arith.constant 384 : i32
    %3 = arith.muli %arg1, %c384_i32 : i32
    %4 = tpu.assume_multiple %3, 384 : i32
    %5 = arith.index_cast %4 : i32 to index
    %c0 = arith.constant 0 : index
    %6 = vector.load %arg2[%5, %c0] : memref<768x768xbf16, #tpu.memory_space<vmem>>, vector<384x768xbf16>
    %c0_1 = arith.constant 0 : index
    %c0_2 = arith.constant 0 : index
    %7 = vector.load %arg13[%c0_1, %c0_2] : memref<768x32xbf16, #tpu.memory_space<vmem>>, vector<768x32xbf16>
    %cst = arith.constant dense<0.000000e+00> : vector<384x32xf32>
    %8 = tpu.matmul %6, %7, %cst {dimension_numbers = #tpu.dot_dimension_numbers<[1], [0], [0], [1], [0, 0, 1, 1], [], []>} : vector<384x768xbf16>, vector<768x32xbf16>, vector<384x32xf32> -> vector<384x32xf32>
    %c0_3 = arith.constant 0 : index
    %c0_4 = arith.constant 0 : index
    %c0_5 = arith.constant 0 : index
    %9 = vector.load %arg6[%c0_3, %c0_4, %c0_5] : memref<1x1x32xf32, #tpu.memory_space<vmem>>, vector<1x1x32xf32>
    %10 = vector.shape_cast %9 : vector<1x1x32xf32> to vector<1x32xf32>
    %11 = vector.broadcast %10 : vector<1x32xf32> to vector<384x32xf32>
    %12 = arith.addf %8, %11 : vector<384x32xf32>
    %cst_6 = arith.constant 0.000000e+00 : f32
    %13 = vector.broadcast %cst_6 : f32 to vector<384x32xf32>
    %14 = arith.maximumf %12, %13 : vector<384x32xf32>
    %15 = arith.truncf %14 : vector<384x32xf32> to vector<384x32xbf16>
    %16 = arith.index_cast %4 : i32 to index
    %c0_7 = arith.constant 0 : index
    %17 = vector.load %arg12[%16, %c0_7] : memref<768x32xbf16, #tpu.memory_space<vmem>>, vector<384x32xbf16>
    tpu.vector_store %arg12[%16, %c0_7], %15 {strides = array<i32>} : memref<768x32xbf16, #tpu.memory_space<vmem>>, vector<384x32xbf16>,
    %c2_i32 = arith.constant 2 : i32
    %18 = arith.cmpi eq, %arg0, %c2_i32 : i32
    %19 = arith.extui %18 : i1 to i32
    %c0_i32_8 = arith.constant 0 : i32
    %20 = arith.cmpi ne, %19, %c0_i32_8 : i32
    scf.if %20 {
      %c0_11 = arith.constant 0 : index
      %c0_12 = arith.constant 0 : index
      %26 = vector.load %arg14[%c0_11, %c0_12] : memref<2x32xf32, #tpu.memory_space<vmem>>, vector<2x32xf32>
      %c0_13 = arith.constant 0 : index
      %c0_14 = arith.constant 0 : index
      %27 = vector.load %arg4[%c0_13, %c0_14] : memref<2x384xf32, #tpu.memory_space<vmem>>, vector<2x384xf32>
      %cst_15 = arith.constant dense<0.000000e+00> : vector<2x32xf32>
      %28 = tpu.matmul %27, %14, %cst_15 {dimension_numbers = #tpu.dot_dimension_numbers<[1], [0], [0], [1], [0, 0, 1, 1], [], []>} : vector<2x384xf32>, vector<384x32xf32>, vector<2x32xf32> -> vector<2x32xf32>
      %29 = arith.addf %26, %28 : vector<2x32xf32>
      %c0_16 = arith.constant 0 : index
      %c0_17 = arith.constant 0 : index
      %30 = vector.load %arg14[%c0_16, %c0_17] : memref<2x32xf32, #tpu.memory_space<vmem>>, vector<2x32xf32>
      tpu.vector_store %arg14[%c0_16, %c0_17], %29 {strides = array<i32>} : memref<2x32xf32, #tpu.memory_space<vmem>>, vector<2x32xf32>,
    } else {
    }
    %c2_i32_9 = arith.constant 2 : i32
    %21 = arith.cmpi eq, %arg0, %c2_i32_9 : i32
    %c1_i32 = arith.constant 1 : i32
    %22 = arith.cmpi eq, %arg1, %c1_i32 : i32
    %23 = arith.andi %21, %22 : i1
    %24 = arith.extui %23 : i1 to i32
    %c0_i32_10 = arith.constant 0 : i32
    %25 = arith.cmpi ne, %24, %c0_i32_10 : i32
    scf.if %25 {
      %c0_11 = arith.constant 0 : index
      %c0_12 = arith.constant 0 : index
      %26 = vector.load %arg14[%c0_11, %c0_12] : memref<2x32xf32, #tpu.memory_space<vmem>>, vector<2x32xf32>
      %c0_13 = arith.constant 0 : index
      %c0_14 = arith.constant 0 : index
      %27 = vector.load %arg7[%c0_13, %c0_14] : memref<32x16xf32, #tpu.memory_space<vmem>>, vector<32x16xf32>
      %cst_15 = arith.constant dense<0.000000e+00> : vector<2x16xf32>
      %28 = tpu.matmul %26, %27, %cst_15 {dimension_numbers = #tpu.dot_dimension_numbers<[1], [0], [0], [1], [0, 0, 1, 1], [], []>} : vector<2x32xf32>, vector<32x16xf32>, vector<2x16xf32> -> vector<2x16xf32>
      %c0_16 = arith.constant 0 : index
      %c0_17 = arith.constant 0 : index
      %29 = vector.load %arg8[%c0_16, %c0_17] : memref<1x16xf32, #tpu.memory_space<vmem>>, vector<1x16xf32>
      %30 = vector.broadcast %29 : vector<1x16xf32> to vector<2x16xf32>
      %31 = arith.addf %28, %30 : vector<2x16xf32>
      %cst_18 = arith.constant 0.000000e+00 : f32
      %32 = vector.broadcast %cst_18 : f32 to vector<2x16xf32>
      %33 = arith.maximumf %31, %32 : vector<2x16xf32>
      %c0_19 = arith.constant 0 : index
      %c0_20 = arith.constant 0 : index
      %34 = vector.load %arg9[%c0_19, %c0_20] : memref<16x128xf32, #tpu.memory_space<vmem>>, vector<16x128xf32>
      %cst_21 = arith.constant dense<0.000000e+00> : vector<2x128xf32>
      %35 = tpu.matmul %33, %34, %cst_21 {dimension_numbers = #tpu.dot_dimension_numbers<[1], [0], [0], [1], [0, 0, 1, 1], [], []>} : vector<2x16xf32>, vector<16x128xf32>, vector<2x128xf32> -> vector<2x128xf32>
      %c0_22 = arith.constant 0 : index
      %c0_23 = arith.constant 0 : index
      %36 = vector.load %arg10[%c0_22, %c0_23] : memref<1x128xf32, #tpu.memory_space<vmem>>, vector<1x128xf32>
      %37 = vector.broadcast %36 : vector<1x128xf32> to vector<2x128xf32>
      %38 = arith.addf %35, %37 : vector<2x128xf32>
      %c0_24 = arith.constant 0 : index
      %c0_25 = arith.constant 0 : index
      %39 = vector.load %arg11[%c0_24, %c0_25] : memref<2x128xf32, #tpu.memory_space<vmem>>, vector<2x128xf32>
      tpu.vector_store %arg11[%c0_24, %c0_25], %38 {strides = array<i32>} : memref<2x128xf32, #tpu.memory_space<vmem>>, vector<2x128xf32>,
    } else {
    }
    return
  }
  func.func @transform_0(%arg0: i32, %arg1: i32) -> (i32, i32) {
    %c0_i32 = arith.constant 0 : i32
    %c0_i32_0 = arith.constant 0 : i32
    %c0_i32_1 = arith.constant 0 : i32
    return %c0_i32, %c0_i32_0 : i32, i32
  }
  func.func @transform_1(%arg0: i32, %arg1: i32) -> (i32, i32) {
    %c0_i32 = arith.constant 0 : i32
    %c0_i32_0 = arith.constant 0 : i32
    %c0_i32_1 = arith.constant 0 : i32
    return %c0_i32, %c0_i32_0 : i32, i32
  }
  func.func @transform_2(%arg0: i32, %arg1: i32) -> (i32, i32) {
    %c2_i32 = arith.constant 2 : i32
    %0 = arith.cmpi eq, %arg0, %c2_i32 : i32
    %c0_i32 = arith.constant 0 : i32
    %1 = arith.select %0, %arg1, %c0_i32 : i32
    %c0_i32_0 = arith.constant 0 : i32
    %c0_i32_1 = arith.constant 0 : i32
    return %c0_i32_0, %1 : i32, i32
  }
  func.func @transform_3(%arg0: i32, %arg1: i32) -> (i32, i32, i32) {
    %c0_i32 = arith.constant 0 : i32
    %c0_i32_0 = arith.constant 0 : i32
    %c0_i32_1 = arith.constant 0 : i32
    return %arg0, %c0_i32, %c0_i32_0 : i32, i32, i32
  }
  func.func @transform_4(%arg0: i32, %arg1: i32) -> (i32, i32, i32) {
    %c0_i32 = arith.constant 0 : i32
    %c0_i32_0 = arith.constant 0 : i32
    %c0_i32_1 = arith.constant 0 : i32
    return %arg0, %c0_i32, %c0_i32_0 : i32, i32, i32
  }
  func.func @transform_5(%arg0: i32, %arg1: i32) -> (i32, i32) {
    %c0_i32 = arith.constant 0 : i32
    %c0_i32_0 = arith.constant 0 : i32
    %c0_i32_1 = arith.constant 0 : i32
    return %c0_i32, %c0_i32_0 : i32, i32
  }
  func.func @transform_6(%arg0: i32, %arg1: i32) -> (i32, i32) {
    %c0_i32 = arith.constant 0 : i32
    %c0_i32_0 = arith.constant 0 : i32
    %c0_i32_1 = arith.constant 0 : i32
    return %c0_i32, %c0_i32_0 : i32, i32
  }
  func.func @transform_7(%arg0: i32, %arg1: i32) -> (i32, i32) {
    %c0_i32 = arith.constant 0 : i32
    %c0_i32_0 = arith.constant 0 : i32
    %c0_i32_1 = arith.constant 0 : i32
    return %c0_i32, %c0_i32_0 : i32, i32
  }
  func.func @transform_8(%arg0: i32, %arg1: i32) -> (i32, i32) {
    %c0_i32 = arith.constant 0 : i32
    %c0_i32_0 = arith.constant 0 : i32
    %c0_i32_1 = arith.constant 0 : i32
    return %c0_i32, %c0_i32_0 : i32, i32
  }
  func.func @transform_9(%arg0: i32, %arg1: i32) -> (i32, i32) {
    %c0_i32 = arith.constant 0 : i32
    %c0_i32_0 = arith.constant 0 : i32
    %c0_i32_1 = arith.constant 0 : i32
    return %c0_i32, %c0_i32_0 : i32, i32
  }
}

</mosaic_0001>

<bundles_post_ra>
// kernel: tpu_custom_call.1
= control target key start
LH: loop header
LB: loop body
LE: loop exit
PB: predicated region body
PF: predicated region fallthrough
CT: control target
= control target key end

     0   :  { %s9791_s0 = inlined_call_operand.hbm [shape: bf16[768,768], index: 0, kind: input, shape index: {}]   ;;  %s9792_s1 = inlined_call_operand.vmem [shape: bf16[768,32], index: 1, kind: input, shape index: {}]   ;;  %s9793_s2 = inlined_call_operand.hbm [shape: f32[2,768], index: 2, kind: input, shape index: {}]   ;;  %s9794_s3 = inlined_call_operand.hbm [shape: bf16[3,32,32], index: 3, kind: input, shape index: {}]   ;;  %s9795_s4 = inlined_call_operand.hbm [shape: f32[3,1,32], index: 4, kind: input, shape index: {}]   ;;  %s9796_s5 = inlined_call_operand.vmem [shape: f32[32,16], index: 5, kind: input, shape index: {}]   ;;  %s9797_s6 = inlined_call_operand.hbm [shape: f32[1,16], index: 6, kind: input, shape index: {}]   ;;  %s9798_s7 = inlined_call_operand.hbm [shape: f32[16,128], index: 7, kind: input, shape index: {}]   ;;  %s9799_s8 = inlined_call_operand.hbm [shape: f32[1,128], index: 8, kind: input, shape index: {}]   ;;  %s9800_s9 = inlined_call_operand.hbm [shape: f32[2,128], index: 9, kind: output, shape index: {}]  }
   0x1   :  { %9814 = sst [smem:[#allocation31_spill]] %s9791_s0 }
   0x2   :  { %9815 = sst [smem:[#allocation32_spill]] %s9792_s1 }
   0x3   :  { %9816 = sst [smem:[#allocation33_spill]] %s9793_s2 }
   0x4   :  { %9817 = sst [smem:[#allocation34_spill]] %s9794_s3 }
   0x5   :  { %9818 = sst [smem:[#allocation35_spill]] %s9796_s5 }
   0x6   :  { %9819 = sst [smem:[#allocation36_spill]] %s9797_s6 }
   0x7   :  { %9820 = sst [smem:[#allocation37_spill]] %s9798_s7 }
   0x8   :  { %9821 = sst [smem:[#allocation38_spill]] %s9799_s8 }
   0x9   :  { %9822 = sst [smem:[#allocation39_spill]] %s9800_s9 }
   0xa   :  { %14 = vsyncpa [#allocation6], 0 }
   0xb   :  { %15 = vsyncpa [#allocation9], 0 }
   0xc   :  { %17 = vsyncpa [#allocation9 + $0x1], 0 }
   0xd   :  { %18 = vsyncpa [#allocation12], 0 }
   0xe   :  { %20 = vsyncpa [#allocation12 + $0x1], 0 }
   0xf   :  { %21 = vsyncpa [#allocation15], 0 }
  0x10   :  { %22 = vsyncpa [#allocation7], 0  ;;  %s8302_s30 = smov 0   ;;  %s8304_s10 = smov 0  }
  0x11   :  { %s8306_s11 = smov 0   ;;  %s8308_s12 = smov 0  }
  0x12   :  { %s8310_s13 = smov 0   ;;  %s8312_s14 = smov 0  }
  0x13   :  { %s8314_s15 = smov 0   ;;  %s8316_s16 = smov 0  }
  0x14   :  { %s8318_s17 = smov 0   ;;  %s8320_s18 = smov 0  }
  0x15   :  { %s8322_s19 = smov 0  }
  0x16 LB: > { %9823 = sst [smem:[#allocation25_spill]] %s8209_s14  ;;  %s8231_s20 = smov [#allocation13]   ;;  %s8229_s19 = sphi %s8322_s19, %s28_s19   ;;  %s8225_s18 = sphi %s8320_s18, %s9873_s18   ;;  %s8221_s17 = sphi %s8318_s17, %s9865_s17   ;;  %s8217_s16 = sphi %s8316_s16, %s9872_s16   ;;  %s8213_s15 = sphi %s8314_s15, %s9864_s15   ;;  %s8209_s14 = sphi %s8312_s14, %s9863_s14   ;;  %s8205_s13 = sphi %s8310_s13, %s9871_s13   ;;  %s8201_s12 = sphi %s8308_s12, %s9870_s12   ;;  %s8197_s11 = sphi %s8306_s11, %s9869_s11   ;;  %s8193_s10 = sphi %s8304_s10, %s9868_s10   ;;  %s8189_s30 = sphi %s8302_s30, %s9867_s30  }
  0x17   : > { %9824 = sst [smem:[#allocation26_spill]] %s8221_s17  ;;  %s306_s21 = sshll.u32 %s8231_s20, 4  ;;  %s307_s21 = int_to_ptr.vmem [resolvable:$true] %s306_s21 }
  0x18   : > { %s8358_s22 = sadd.s32 4294967295, %s8229_s19   ;;  %p6014_p0 = scmp.ge.s32.totalorder %s8229_s19, 1 }
  0x19   : > { %p9801_p1 = scmp.eq.s32.totalorder %s8358_s22, 0  ;;  %p274_p2 = scmp.lt.s32.totalorder %s8229_s19, 7 }
  0x1a   : > { %s8232_s24 = smov [#allocation14]   ;;  %s7914_s27 = scalar_lea.vmem %s307_s21, 16 }
  0x1b   : > { %p8363_p3 = pnand %p6014_p0, %p274_p2  ;;  %s316_s25 = sshll.u32 %s8232_s24, 4  ;;  %s317_s25 = int_to_ptr.vmem [resolvable:$true] %s316_s25 }
  0x1c   : > { %p7915_p7 = scmp.ne.s32.totalorder %s307_s21, %s7914_s27  ;;  %s7921_s28 = scalar_lea.vmem %s307_s21, 32 }
  0x1d   : > { %s9825_s23 = scalar_select %p8363_p3, 1, 0 }
  0x1e   : > { %p7398_p4 = pneg %p8363_p3  ;;  %p7922_p10 = scmp.lt.s32.totalorder %s307_s21, %s307_s21 }
  0x1f   : > { %p7923_p11 = scmp.lt.s32.totalorder %s7921_s28, %s7914_s27 }
  0x20   : > { %p8371_p5 = pnand %p7398_p4, %p9801_p1 }
  0x21   : > { %p7924_p12 = por %p7923_p11, %p7922_p10 }
  0x22   : > { %p7905_p6 = pneg %p8371_p5 }
  0x24   : > { %p7917_p8 = pnand %p7915_p7, %p7905_p6 }
  0x26   : > { %p7918_p9 = pneg %p7917_p8 }
  0x28   : > { %p7925_p13 = pnand %p7924_p12, %p7918_p9 }
  0x2a   : > { %7928 = shalt.err (!%p7925_p13)
}
  0x2b   : > { %s9827_s6 = sld [smem:[#allocation36_spill]]  ;;  %s7940_s24 = scalar_lea.vmem %s317_s25, 256 }
  0x2c   : > { %p7941_p0 = scmp.ne.s32.totalorder %s317_s25, %s7940_s24  ;;  %p7948_p7 = scmp.lt.s32.totalorder %s317_s25, %s317_s25 }
  0x2d   : > { %p7949_p8 = scmp.lt.s32.totalorder %s7940_s24, %s7940_s24 }
  0x2e   : > { %p7943_p2 = pnand %p7941_p0, %p7905_p6 }
  0x2f   : > { %p7950_p1 = por %p7949_p8, %p7948_p7 }
  0x30   : > { %p7944_p4 = pneg %p7943_p2 }
  0x31   : > { %7404 = dma.hbm_to_vmem [thread:$0]  (!%p8371_p5), %s9827_s6, 16, %s307_s21, [#allocation12]  }
  0x32   : > { %p7951_p3 = pnand %p7950_p1, %p7944_p4 }
  0x34   : > { %7954 = shalt.err (!%p7951_p3)
}
  0x35   : > { %s8233_s27 = smov 128   ;;  %s8234_s21 = smov 8  }
  0x36   : > { %s9828_s7 = sld [smem:[#allocation37_spill]]  ;;  %s37_s20 = sadd.s32 1, %s8221_s17 }
  0x37   : > { %s40_s24 = sadd.s32 1, %s8225_s18  ;;  %p38_p1 = scmp.ge.s32.totalorder %s37_s20, 2 }
  0x38   : > { %p86_p3 = scmp.eq.s32.totalorder %s8225_s18, 2  ;;  %s93_s6 = sadd.s32 1, %s8209_s14 }
  0x39   : > { %p100_p9 = scmp.ne.s32.totalorder %s8209_s14, %s8205_s13  ;;  %s9875_s20 = smov (%p38_p1, %s37_s20), 0 }
  0x3a   : > { %9829 = sst [smem:[#allocation27_spill]] %s9875_s20  ;;  %s9877_s24 = smov (!%p38_p1, %s40_s24), %s8225_s18 }
  0x3b   : > { %s87_s9 = scalar_select %p86_p3, %s8221_s17, 0 }
  0x3c   : > { %7407 = dma.hbm_to_vmem [thread:$0]  (!%p8371_p5), %s9828_s7, 256, %s317_s25, [#allocation15], %s8233_s27, %s8233_s27, %s8234_s21  }
  0x3d   : > { %p42_p10 = scmp.ge.s32.totalorder %s9877_s24, 3  ;;  %p101_p11 = scmp.eq.s32.totalorder %s8229_s19, 0 }
  0x3e   : > { %p106_p12 = scmp.ne.s32.totalorder %s8205_s13, %s8201_s12  ;;  %s119_s25 = sadd.s32 1, %s8197_s11 }
  0x3f   : > { %s9879_s24 = smov (%p42_p10, %s9877_s24), 0  ;;  %p8411_p13 = por %p101_p11, %p100_p9 }
  0x40   : > { %9830 = sst [smem:[#allocation28_spill]] %s9879_s24  ;;  %p9832_p0 = scmp.eq.s32.totalorder %s8358_s22, 0 }
  0x41   : > { %p88_p4 = scmp.eq.s32.totalorder %s9879_s24, 2  ;;  %s116_s12 = ssub.s32 %s8225_s18, %s9879_s24 }
  0x42   : > { %p8417_p2 = por %p9832_p0, %p106_p12  ;;  %p117_p7 = scmp.eq.s32.totalorder %s116_s12, 0 }
  0x43   : > { %p126_p8 = scmp.ne.s32.totalorder %s8197_s11, %s8193_s10  ;;  %p132_p9 = scmp.ne.s32.totalorder %s8193_s10, %s8189_s30 }
  0x44   : > { %s9833_s21 = scalar_select %p8417_p2, 1, 0 }
  0x45   : > { %s89_s28 = scalar_select %p88_p4, %s9875_s20, 0 }
  0x46   : > { %s8428_s29 = scalar_select %p117_p7, %s8197_s11, %s119_s25  }
  0x47   : > { %s90_s7 = ssub.s32 %s87_s9, %s89_s28  ;;  %p128_p1 = por %p126_p8, %p101_p11 }
  0x48   : > { %p91_p3 = scmp.eq.s32.totalorder %s90_s7, 0  ;;  %p7425_p10 = scmp.lt.s32.totalorder %s8229_s19, 6 }
  0x49   : > { %p9835_p12 = pmov %p9832_p0  ;;  %s343_s12 = sand.u32 1, %s8209_s14  }
  0x4a   : > { %s8437_s5 = scalar_select %p91_p3, %s8209_s14, %s93_s6  }
  0x4b   : > { %p8441_p0 = por %p132_p9, %p9835_p12  ;;  %s6674_s24 = smul.u32 96, %s87_s9 }
  0x4c   : > { %9834 = sst [smem:[#allocation29_spill]] %s8437_s5  ;;  %s7370_s20 = smul.u32 6, %s343_s12 }
  0x4d   : > { %s9836_s1 = scalar_select %p8441_p0, 1, 0 }
  0x4e   : > { %p8448_p4 = pnand %p7425_p10, %p8411_p13  ;;  %s9838_s2 = sld [smem:[#allocation33_spill]] }
  0x4f   : > { %p8455_p11 = pnand %p7425_p10, %p128_p1  ;;  %s345_s17 = scalar_lea.vmem [#allocation8], %s7370_s20 }
  0x50   : > { %s355_s5 = sshll.u32 %s345_s17, 4  ;;  %s9840_s14 = sand.u32 1, %s8229_s19   ;;  %s356_s5 = int_to_ptr.vmem [resolvable:$true] %s355_s5 }
  0x51   : > { %s9839_s6 = scalar_select %p8455_p11, 1, 0 }
  0x52   : > { %s8461_s9 = scalar_lea.sflag [#allocation9], %s9840_s14  ;;  %p7957_p13 = pneg %p8448_p4 }
  0x53   : > { %s7968_s27 = scalar_lea.vmem %s356_s5, 96  ;;  %s8235_s12 = smov [#allocation8]  }
  0x54   : > { %s353_s30 = scalar_lea.hbm %s9838_s2, %s6674_s24  ;;  %p7969_p7 = scmp.ne.s32.totalorder %s356_s5, %s7968_s27 }
  0x55   : > { %s7973_s28 = sshll.u32 %s8235_s12, 4  ;;  %s7974_s28 = int_to_ptr.vmem [resolvable:$false] %s7973_s28 }
  0x56   : > { %p7971_p8 = pnand %p7969_p7, %p7957_p13  ;;  %s7975_s24 = scalar_lea.vmem %s7974_s28, 192 }
  0x57   : > { %p7976_p1 = scmp.lt.s32.totalorder %s356_s5, %s7974_s28  ;;  %p7977_p9 = scmp.lt.s32.totalorder %s7975_s24, %s7968_s27 }
  0x58   : > { %p7972_p3 = pneg %p7971_p8 }
  0x59   : > { %p7978_p10 = por %p7977_p9, %p7976_p1 }
  0x5b   : > { %p7979_p12 = pnand %p7978_p10, %p7972_p3 }
  0x5d   : > { %7982 = shalt.err (!%p7979_p12)
}
  0x5e   : > { %7414 = dma.hbm_to_vmem [thread:$0]  (!%p8448_p4), %s353_s30, 96, %s356_s5, %s8461_s9  }
  0x5f   : > { %s8236_s14 = smov [#allocation5]  }
  0x60   : > { %s286_s17 = sshll.u32 %s8236_s14, 4  ;;  %s287_s17 = int_to_ptr.vmem [resolvable:$true] %s286_s17 }
  0x61   : > { %s7994_s20 = scalar_lea.vmem %s287_s17, 36864  ;;  %p8002_p0 = scmp.lt.s32.totalorder %s287_s17, %s287_s17 }
  0x62   : > { %p7995_p13 = scmp.ne.s32.totalorder %s287_s17, %s7994_s20  ;;  %p8003_p2 = scmp.lt.s32.totalorder %s7994_s20, %s7994_s20 }
  0x64   : > { %p7997_p7 = pnand %p7995_p13, %p7905_p6  ;;  %p8004_p11 = por %p8003_p2, %p8002_p0 }
  0x66   : > { %p7998_p8 = pneg %p7997_p7 }
  0x68   : > { %p8005_p1 = pnand %p8004_p11, %p7998_p8 }
  0x6a   : > { %8008 = shalt.err (!%p8005_p1)
}
  0x6b   : > { %s8237_s7 = smov 384   ;;  %s8238_s5 = smov 24  }
  0x6c   : > { %s9841_s0 = sld [smem:[#allocation31_spill]]  ;;  %s8239_s27 = smov [#allocation16]  }
  0x6d   : > { %s330_s12 = sshll.u32 %s8239_s27, 4  ;;  %s9812_s28 = sand.u32 1, %s8197_s11   ;;  %s331_s12 = int_to_ptr.vmem [resolvable:$true] %s330_s12 }
  0x6e   : > { %s6021_s24 = sshll.u32 %s9812_s28, 4  ;;  %s8020_s14 = scalar_lea.vmem %s331_s12, 16 }
  0x6f   : > { %p8021_p2 = scmp.ne.s32.totalorder %s331_s12, %s8020_s14  ;;  %s8027_s20 = scalar_lea.vmem %s331_s12, 32 }
  0x70   : > { %p8028_p11 = scmp.lt.s32.totalorder %s331_s12, %s331_s12  ;;  %p8029_p3 = scmp.lt.s32.totalorder %s8027_s20, %s8020_s14 }
  0x71   : > { %p8023_p0 = pnand %p8021_p2, %p7905_p6 }
  0x72   : > { %7401 = dma.hbm_to_vmem [thread:$0]  (!%p8371_p5), %s9841_s0, 36864, %s287_s17, [#allocation6], %s8237_s7, %s8237_s7, %s8238_s5  }
  0x73   : > { %p8024_p4 = pneg %p8023_p0  ;;  %p8030_p9 = por %p8029_p3, %p8028_p11 }
  0x75   : > { %p8031_p10 = pnand %p8030_p9, %p8024_p4 }
  0x77   : > { %8034 = shalt.err (!%p8031_p10)
}
  0x78   : > { %s9842_s8 = sld [smem:[#allocation38_spill]]  ;;  %s6675_s5 = sshll.u32 %s8225_s18, 8 }
  0x79   : > { %s9843_s3 = sld [smem:[#allocation34_spill]]  ;;  %s366_s28 = scalar_lea.vmem [#allocation10], %s6021_s24 }
  0x7a   : > { %s373_s0 = sshll.u32 %s366_s28, 4  ;;  %p9844_p6 = scmp.ne.s32.totalorder %s9839_s6, 0  ;;  %s374_s0 = int_to_ptr.vmem [resolvable:$true] %s373_s0 }
  0x7b   : > { %s8048_s14 = scalar_lea.vmem %s374_s0, 256  ;;  %s8240_s26 = smov [#allocation10]  }
  0x7c   : > { %p8037_p12 = pneg %p9844_p6  ;;  %p8049_p13 = scmp.ne.s32.totalorder %s374_s0, %s8048_s14 }
  0x7d   : > { %s8053_s20 = sshll.u32 %s8240_s26, 4  ;;  %s8054_s20 = int_to_ptr.vmem [resolvable:$false] %s8053_s20 }
  0x7e   : > { %7410 = dma.hbm_to_vmem [thread:$0]  (!%p8371_p5), %s9842_s8, 16, %s331_s12, [#allocation15]  }
  0x7f   : > { %s372_s27 = scalar_lea.hbm %s9843_s3, %s6675_s5  ;;  %p8051_p7 = pnand %p8049_p13, %p8037_p12 }
  0x80   : > { %s8055_s12 = scalar_lea.vmem %s8054_s20, 512  ;;  %p8056_p5 = scmp.lt.s32.totalorder %s374_s0, %s8054_s20 }
  0x81   : > { %p8052_p8 = pneg %p8051_p7  ;;  %p8057_p1 = scmp.lt.s32.totalorder %s8055_s12, %s8048_s14 }
  0x83   : > { %p8058_p2 = por %p8057_p1, %p8056_p5 }
  0x85   : > { %p8059_p0 = pnand %p8058_p2, %p8052_p8 }
  0x87   : > { %8062 = shalt.err (!%p8059_p0)
}
  0x88   : > { %s8241_s24 = smov 64   ;;  %s8242_s28 = smov 4  }
  0x89   : > { %7417 = dma.hbm_to_vmem [thread:$0]  (!%p9844_p6), %s372_s27, 256, %s374_s0, %s8461_s9, %s8241_s24, %s8241_s24, %s8242_s28  }
  0x8a   : > { %s6024_s17 = sshll.u32 %s8225_s18, 4  ;;  %s9845_s7 = sand.u32 1, %s8197_s11  }
  0x8b   : > { %s386_s5 = scalar_lea.vmem [#allocation11], %s9845_s7  ;;  %s391_s14 = scalar_lea.hbm %s9795_s4, %s6024_s17 }
  0x8c   : > { %s393_s25 = sshll.u32 %s386_s5, 4  ;;  %s9846_s20 = sand.u32 1, %s8229_s19   ;;  %s394_s25 = int_to_ptr.vmem [resolvable:$true] %s393_s25 }
  0x8d   : > { %s384_s12 = scalar_lea.sflag [#allocation12], %s9846_s20  ;;  %s8076_s2 = scalar_lea.vmem %s394_s25, 16 }
  0x8e   : > { %p8077_p4 = scmp.ne.s32.totalorder %s394_s25, %s8076_s2  ;;  %s8243_s3 = smov [#allocation11]  }
  0x8f   : > { %s8081_s8 = sshll.u32 %s8243_s3, 4  ;;  %s8082_s8 = int_to_ptr.vmem [resolvable:$false] %s8081_s8 }
  0x90   : > { %p8079_p11 = pnand %p8077_p4, %p8037_p12  ;;  %s8083_s0 = scalar_lea.vmem %s8082_s8, 32 }
  0x91   : > { %p8084_p9 = scmp.lt.s32.totalorder %s394_s25, %s8082_s8  ;;  %p8085_p10 = scmp.lt.s32.totalorder %s8083_s0, %s8076_s2 }
  0x92   : > { %p8080_p3 = pneg %p8079_p11 }
  0x93   : > { %p8086_p13 = por %p8085_p10, %p8084_p9 }
  0x95   : > { %p8087_p7 = pnand %p8086_p13, %p8080_p3 }
  0x97   : > { %8090 = shalt.err (!%p8087_p7)
}
  0x98   : > { %7420 = dma.hbm_to_vmem [thread:$0]  (!%p9844_p6), %s391_s14, 16, %s394_s25, %s384_s12  }
  0x99   : > { %p9847_p8 = scmp.ne.s32.totalorder %s9825_s23, 0 }
  0x9b   : > { %402 = sbr.rel (%p9847_p8) target bundleno = 2015 (0x7df), region = 56 }
  0xa0   : > { %p9848_p5 = scmp.eq.s32.totalorder %s8358_s22, 0 }
  0xa2   : > { %8160 = dma.done.wait (%p9848_p5), [#allocation6], 36864   ;;  %p9849_p12 = pmov %p9848_p5 }
  0xa3   : > { %s408_s3 = sand.u32 1, %s8358_s22   ;;  %s410_s2 = sand.u32 1, %s8205_s13  }
  0xa4   : > { %8162 = vsyncadd (%p9849_p12), [#allocation6], 4294930432  ;;  %s8520_s8 = smul.u32 6, %s410_s2  ;;  %s409_s9 = scalar_lea.sflag [#allocation9], %s408_s3 }
  0xa5   : > { %p9850_p6 = scmp.ne.s32.totalorder %s9833_s21, 0 }
  0xa6   : > { %s412_s6 = scalar_lea.vmem [#allocation8], %s8520_s8 }
  0xa7   : > { %8164 = dma.done.wait (%p9850_p6), %s409_s9, 96  }
  0xa8   : > { %8166 = vsyncadd (%p9850_p6), %s409_s9, 4294967200  ;;  %s419_s23 = sand.u32 1, %s8193_s10   ;;  %p9851_p1 = scmp.ne.s32.totalorder %s9836_s1, 0 }
  0xa9   : > { %s6027_s27 = sshll.u32 %s419_s23, 4 }
  0xaa   : > { %s8528_s24 = scalar_lea.vmem [#allocation10], %s6027_s27 }
  0xab   : > { %8168 = dma.done.wait (%p9851_p1), %s409_s9, 256  }
  0xac   : > { %8170 = vsyncadd (%p9851_p1), %s409_s9, 4294967040  ;;  %s427_s28 = scalar_lea.sflag [#allocation12], %s408_s3  ;;  %s8534_s17 = scalar_lea.vmem [#allocation11], %s419_s23 }
  0xad   : > { %8172 = dma.done.wait (%p9851_p1), %s427_s28, 16  }
  0xae   : > { %8174 = vsyncadd (%p9851_p1), %s427_s28, 4294967280  ;;  %p9852_p2 = pmov %p9848_p5 }
  0xb0   : > { %8176 = dma.done.wait (%p9852_p2), [#allocation12], 16   ;;  %p9853_p0 = pmov %p9852_p2 }
  0xb2   : > { %8178 = vsyncadd (%p9853_p0), [#allocation12], 4294967280  ;;  %p9854_p4 = pmov %p9853_p0 }
  0xb3   : > { %p9855_p11 = pmov %p9853_p0 }
  0xb4   : > { %8180 = dma.done.wait (%p9854_p4), [#allocation15], 272  }
  0xb5   : > { %8182 = vsyncadd (%p9855_p11), [#allocation15], 4294967024  ;;  %p6031_p3 = scmp.ne.s32.totalorder %s8213_s15, 0 }
  0xb6   : > { %p6032_p9 = scmp.ne.s32.totalorder (!%p6031_p3), %s8217_s16, 0 }
  0xb7   : > { %487 = sbr.rel (%p6031_p3) target bundleno = 798 (0x31e), region = 88 }
  0xbc   : > { %491 = sbr.rel (%p6032_p9) target bundleno = 492 (0x1ec), region = 92  ;;  %s9856_s7 = sld [smem:[#allocation32_spill]] (!%p6032_p9) }
  0xc1   : > { %vm492_vm0 = vcmask 254976   ;;  %v8244_v0 = vmov 0.0   ;;  %v7538_v1 = vld [vmem:[%s8528_s24 + $0x8] sm:$0xff]   ;;  %v7539_v2 = vld [vmem:[%s8528_s24] sm:$0xff]   ;;  %vm846_vm1 = vcmask 261120   ;;  %vm1792_vm2 = vcmask 257024  }
  0xc2   : > { %493 = vst.msk [vmem:[#allocation4] sm:$0x3] %vm492_vm0, %v8244_v0  ;;  %7077 = vmatprep.subr.bf16.mxu0 %v7538_v1  ;;  %7330 = vmatprep.subr.bf16.mxu1 %v7538_v1  ;;  %v7540_v3 = vld [vmem:[%s9856_s7] sm:$0xff]   ;;  %v7542_v5 = vld [vmem:[%s9856_s7 + $0x8] sm:$0xff]   ;;  %v7544_v7 = vld [vmem:[%s9856_s7 + $0x10] sm:$0xff]  }
  0xc3   : > { %7078 = vmatpush3.bf16.msra.mxu0 %v7538_v1  ;;  %7332 = vmatpush3.bf16.msra.mxu1 %v7538_v1  ;;  %v7541_v4 = vld [vmem:[%s9856_s7 + $0xc0] sm:$0xff]   ;;  %v7543_v6 = vld [vmem:[%s9856_s7 + $0xc8] sm:$0xff]   ;;  %v7545_v8 = vld [vmem:[%s9856_s7 + $0xd0] sm:$0xff]  }
  0xc4   : > { %7079 = vmatprep.subr.bf16.mxu0 %v7539_v2  ;;  %7331 = vmatprep.subr.bf16.mxu1 %v7539_v2  ;;  %v7546_v9 = vld [vmem:[%s9856_s7 + $0x18] sm:$0xff]   ;;  %v7548_v11 = vld [vmem:[%s9856_s7 + $0x20] sm:$0xff]   ;;  %v7550_v13 = vld [vmem:[%s9856_s7 + $0x28] sm:$0xff]  }
  0xc5   : > { %7081 = vmatprep.mubr.msk.bf16.mxu0 %vm846_vm1, %v7540_v3  ;;  %7129 = vmatprep.mubr.msk.bf16.mxu1 %vm846_vm1, %v7541_v4  ;;  %v7547_v10 = vld [vmem:[%s9856_s7 + $0xd8] sm:$0xff]   ;;  %v7549_v12 = vld [vmem:[%s9856_s7 + $0xe0] sm:$0xff]   ;;  %v7551_v14 = vld [vmem:[%s9856_s7 + $0xe8] sm:$0xff]  }
  0xc6   : > { %v7552_v15 = vld [vmem:[%s9856_s7 + $0x30] sm:$0xff]   ;;  %v7554_v17 = vld [vmem:[%s9856_s7 + $0x38] sm:$0xff]   ;;  %v7556_v19 = vld [vmem:[%s9856_s7 + $0x40] sm:$0xff]  }
  0xc7   : > { %7080 = vmatpush3.bf16.msra.mxu0 %v7539_v2  ;;  %7333 = vmatpush3.bf16.msra.mxu1 %v7539_v2  ;;  %v7553_v16 = vld [vmem:[%s9856_s7 + $0xf0] sm:$0xff]   ;;  %v7555_v18 = vld [vmem:[%s9856_s7 + $0xf8] sm:$0xff]   ;;  %v7557_v20 = vld [vmem:[%s9856_s7 + $0x100] sm:$0xff]  }
  0xc8   : > { %v7558_v21 = vld [vmem:[%s9856_s7 + $0x48] sm:$0xff]   ;;  %v7560_v23 = vld [vmem:[%s9856_s7 + $0x50] sm:$0xff]   ;;  %v7562_v25 = vld [vmem:[%s9856_s7 + $0x58] sm:$0xff]  }
  0xc9   : > { %v7559_v22 = vld [vmem:[%s9856_s7 + $0x108] sm:$0xff]   ;;  %v7561_v24 = vld [vmem:[%s9856_s7 + $0x110] sm:$0xff]   ;;  %v7563_v26 = vld [vmem:[%s9856_s7 + $0x118] sm:$0xff]  }
  0xca   : > { %7082 = vmatmul.mubr.msk.bf16.vlgmr.msra.gmra.mxu0 %vm846_vm1, %v7542_v5  ;;  %7130 = vmatmul.mubr.msk.bf16.vlgmr.msra.gmra.mxu1 %vm846_vm1, %v7543_v6  ;;  %v7564_v27 = vld [vmem:[%s9856_s7 + $0x60] sm:$0xff]   ;;  %v7566_v29 = vld [vmem:[%s9856_s7 + $0x68] sm:$0xff]   ;;  %v7568_v31 = vld [vmem:[%s9856_s7 + $0x70] sm:$0xff]  }
  0xcb   : > { %7085 = vmatprep.mubr.msk.bf16.mxu0 %vm846_vm1, %v7544_v7  ;;  %7133 = vmatprep.mubr.msk.bf16.mxu1 %vm846_vm1, %v7545_v8  ;;  %v7565_v28 = vld [vmem:[%s9856_s7 + $0x120] sm:$0xff]   ;;  %v7567_v30 = vld [vmem:[%s9856_s7 + $0x128] sm:$0xff]   ;;  %v7569_v32 = vld [vmem:[%s9856_s7 + $0x130] sm:$0xff]  }
  0xcc   : > { %v7570_v33 = vld [vmem:[%s9856_s7 + $0x78] sm:$0xff]   ;;  %v7572_v35 = vld [vmem:[%s9856_s7 + $0x80] sm:$0xff]   ;;  %v7574_v37 = vld [vmem:[%s9856_s7 + $0x88] sm:$0xff]  }
  0xcd   : > { %v7571_v34 = vld [vmem:[%s9856_s7 + $0x138] sm:$0xff]   ;;  %v7573_v36 = vld [vmem:[%s9856_s7 + $0x140] sm:$0xff]   ;;  %v7575_v38 = vld [vmem:[%s9856_s7 + $0x148] sm:$0xff]  }
  0xce   : > { %v7576_v39 = vld [vmem:[%s9856_s7 + $0x90] sm:$0xff]   ;;  %v7578_v41 = vld [vmem:[%s9856_s7 + $0x98] sm:$0xff]   ;;  %v7580_v43 = vld [vmem:[%s9856_s7 + $0xa0] sm:$0xff]  }
  0xcf   : > { %v7577_v40 = vld [vmem:[%s9856_s7 + $0x150] sm:$0xff]   ;;  %v7579_v42 = vld [vmem:[%s9856_s7 + $0x158] sm:$0xff]   ;;  %v7581_v44 = vld [vmem:[%s9856_s7 + $0x160] sm:$0xff]  }
  0xd0   : > { %v7582_v45 = vld [vmem:[%s9856_s7 + $0xa8] sm:$0xff]   ;;  %v7584_v47 = vld [vmem:[%s9856_s7 + $0xb0] sm:$0xff]   ;;  %v7586_v49 = vld [vmem:[%s9856_s7 + $0xb8] sm:$0xff]  }
  0xd1   : > { %v7583_v46 = vld [vmem:[%s9856_s7 + $0x168] sm:$0xff]   ;;  %v7585_v48 = vld [vmem:[%s9856_s7 + $0x170] sm:$0xff]   ;;  %v7587_v50 = vld [vmem:[%s9856_s7 + $0x178] sm:$0xff]  }
  0xd2   : > { %7086 = vmatmul.mubr.msk.bf16.gmra.mxu0 %vm846_vm1, %v7546_v9  ;;  %7134 = vmatmul.mubr.msk.bf16.gmra.mxu1 %vm846_vm1, %v7547_v10 }
  0xd3   : > { %7089 = vmatprep.mubr.msk.bf16.mxu0 %vm846_vm1, %v7548_v11  ;;  %7137 = vmatprep.mubr.msk.bf16.mxu1 %vm846_vm1, %v7549_v12 }
  0xda   : > { %7090 = vmatmul.mubr.msk.bf16.gmra.mxu0 %vm846_vm1, %v7550_v13  ;;  %7138 = vmatmul.mubr.msk.bf16.gmra.mxu1 %vm846_vm1, %v7551_v14 }
  0xdb   : > { %7093 = vmatprep.mubr.msk.bf16.mxu0 %vm846_vm1, %v7552_v15  ;;  %7141 = vmatprep.mubr.msk.bf16.mxu1 %vm846_vm1, %v7553_v16 }
  0xe2   : > { %7094 = vmatmul.mubr.msk.bf16.gmra.mxu0 %vm846_vm1, %v7554_v17  ;;  %7142 = vmatmul.mubr.msk.bf16.gmra.mxu1 %vm846_vm1, %v7555_v18 }
  0xe3   : > { %7097 = vmatprep.mubr.msk.bf16.mxu0 %vm846_vm1, %v7556_v19  ;;  %7145 = vmatprep.mubr.msk.bf16.mxu1 %vm846_vm1, %v7557_v20 }
  0xea   : > { %7098 = vmatmul.mubr.msk.bf16.gmra.mxu0 %vm846_vm1, %v7558_v21  ;;  %7146 = vmatmul.mubr.msk.bf16.gmra.mxu1 %vm846_vm1, %v7559_v22 }
  0xeb   : > { %7101 = vmatprep.mubr.msk.bf16.mxu0 %vm846_vm1, %v7560_v23  ;;  %7149 = vmatprep.mubr.msk.bf16.mxu1 %vm846_vm1, %v7561_v24 }
  0xf2   : > { %7102 = vmatmul.mubr.msk.bf16.gmra.mxu0 %vm846_vm1, %v7562_v25  ;;  %7150 = vmatmul.mubr.msk.bf16.gmra.mxu1 %vm846_vm1, %v7563_v26 }
  0xf3   : > { %7105 = vmatprep.mubr.msk.bf16.mxu0 %vm846_vm1, %v7564_v27  ;;  %7153 = vmatprep.mubr.msk.bf16.mxu1 %vm846_vm1, %v7565_v28 }
  0xfa   : > { %7106 = vmatmul.mubr.msk.bf16.gmra.mxu0 %vm846_vm1, %v7566_v29  ;;  %7154 = vmatmul.mubr.msk.bf16.gmra.mxu1 %vm846_vm1, %v7567_v30 }
  0xfb   : > { %7109 = vmatprep.mubr.msk.bf16.mxu0 %vm846_vm1, %v7568_v31  ;;  %7157 = vmatprep.mubr.msk.bf16.mxu1 %vm846_vm1, %v7569_v32 }
 0x102   : > { %7110 = vmatmul.mubr.msk.bf16.gmra.mxu0 %vm846_vm1, %v7570_v33  ;;  %7158 = vmatmul.mubr.msk.bf16.gmra.mxu1 %vm846_vm1, %v7571_v34 }
 0x103   : > { %7113 = vmatprep.mubr.msk.bf16.mxu0 %vm846_vm1, %v7572_v35  ;;  %7161 = vmatprep.mubr.msk.bf16.mxu1 %vm846_vm1, %v7573_v36 }
 0x10a   : > { %7114 = vmatmul.mubr.msk.bf16.gmra.mxu0 %vm846_vm1, %v7574_v37  ;;  %7162 = vmatmul.mubr.msk.bf16.gmra.mxu1 %vm846_vm1, %v7575_v38 }
 0x10b   : > { %7117 = vmatprep.mubr.msk.bf16.mxu0 %vm846_vm1, %v7576_v39  ;;  %7165 = vmatprep.mubr.msk.bf16.mxu1 %vm846_vm1, %v7577_v40 }
 0x112   : > { %7118 = vmatmul.mubr.msk.bf16.gmra.mxu0 %vm846_vm1, %v7578_v41  ;;  %7166 = vmatmul.mubr.msk.bf16.gmra.mxu1 %vm846_vm1, %v7579_v42 }
 0x113   : > { %7121 = vmatprep.mubr.msk.bf16.mxu0 %vm846_vm1, %v7580_v43  ;;  %7169 = vmatprep.mubr.msk.bf16.mxu1 %vm846_vm1, %v7581_v44 }
 0x11a   : > { %7122 = vmatmul.mubr.msk.bf16.gmra.mxu0 %vm846_vm1, %v7582_v45  ;;  %7170 = vmatmul.mubr.msk.bf16.gmra.mxu1 %vm846_vm1, %v7583_v46 }
 0x11b   : > { %7125 = vmatprep.mubr.msk.bf16.mxu0 %vm846_vm1, %v7584_v47  ;;  %7173 = vmatprep.mubr.msk.bf16.mxu1 %vm846_vm1, %v7585_v48 }
 0x122   : > { %7126 = vmatmul.mubr.msk.bf16.gmra.mxu0 %vm846_vm1, %v7586_v49  ;;  %7174 = vmatmul.mubr.msk.bf16.gmra.mxu1 %vm846_vm1, %v7587_v50 }
 0x18a   : > { %v7083_v51 = vpop.f32.mrf.mxu0  ;;  %v7131_v52 = vpop.f32.mrf.mxu1 }
 0x18b   : > { %v6678_v53 = vpack.c.bf16 %v7083_v51, %v7083_v51  ;;  %v6726_v54 = vpack.c.bf16 %v7131_v52, %v7131_v52 }
 0x18c   : > { %v1025_v55 = vpop.f32.mrf.mxu0  ;;  %v1217_v56 = vpop.f32.mrf.mxu1 }
 0x18d   : > { %1795 = vst.msk [vmem:[#allocation3 + $0x8] sm:$0xf] %vm1792_vm2, %v6678_v53  ;;  %1843 = vst.msk [vmem:[#allocation3 + $0xc8] sm:$0xf] %vm1792_vm2, %v6726_v54  ;;  %v6676_v57 = vpack.c.bf16 %v1025_v55, %v1025_v55  ;;  %v6724_v58 = vpack.c.bf16 %v1217_v56, %v1217_v56 }
 0x18e   : > { %v7084_v59 = vpop.f32.mrf.mxu0  ;;  %v7132_v60 = vpop.f32.mrf.mxu1 }
 0x18f   : > { %1793 = vst.msk [vmem:[#allocation3] sm:$0xf] %vm1792_vm2, %v6676_v57  ;;  %1841 = vst.msk [vmem:[#allocation3 + $0xc0] sm:$0xf] %vm1792_vm2, %v6724_v58  ;;  %v6679_v61 = vpack.c.bf16 %v7084_v59, %v7084_v59  ;;  %v6727_v62 = vpack.c.bf16 %v7132_v60, %v7132_v60 }
 0x190   : > { %v1028_v63 = vpop.f32.mrf.mxu0  ;;  %v1220_v0 = vpop.f32.mrf.mxu1 }
 0x191   : > { %1796 = vst.msk [vmem:[#allocation3 + $0xc] sm:$0xf] %vm1792_vm2, %v6679_v61  ;;  %1844 = vst.msk [vmem:[#allocation3 + $0xcc] sm:$0xf] %vm1792_vm2, %v6727_v62  ;;  %v6677_v1 = vpack.c.bf16 %v1028_v63, %v1028_v63  ;;  %v6725_v2 = vpack.c.bf16 %v1220_v0, %v1220_v0 }
 0x192   : > { %v7087_v3 = vpop.f32.mrf.mxu0  ;;  %v7135_v4 = vpop.f32.mrf.mxu1 }
 0x193   : > { %1794 = vst.msk [vmem:[#allocation3 + $0x4] sm:$0xf] %vm1792_vm2, %v6677_v1  ;;  %1842 = vst.msk [vmem:[#allocation3 + $0xc4] sm:$0xf] %vm1792_vm2, %v6725_v2  ;;  %v6682_v5 = vpack.c.bf16 %v7087_v3, %v7087_v3  ;;  %v6730_v6 = vpack.c.bf16 %v7135_v4, %v7135_v4 }
 0x194   : > { %v1041_v7 = vpop.f32.mrf.mxu0  ;;  %v1233_v8 = vpop.f32.mrf.mxu1 }
 0x195   : > { %1799 = vst.msk [vmem:[#allocation3 + $0x18] sm:$0xf] %vm1792_vm2, %v6682_v5  ;;  %1847 = vst.msk [vmem:[#allocation3 + $0xd8] sm:$0xf] %vm1792_vm2, %v6730_v6  ;;  %v6680_v9 = vpack.c.bf16 %v1041_v7, %v1041_v7  ;;  %v6728_v10 = vpack.c.bf16 %v1233_v8, %v1233_v8 }
 0x196   : > { %v7088_v11 = vpop.f32.mrf.mxu0  ;;  %v7136_v12 = vpop.f32.mrf.mxu1 }
 0x197   : > { %1797 = vst.msk [vmem:[#allocation3 + $0x10] sm:$0xf] %vm1792_vm2, %v6680_v9  ;;  %1845 = vst.msk [vmem:[#allocation3 + $0xd0] sm:$0xf] %vm1792_vm2, %v6728_v10  ;;  %v6683_v13 = vpack.c.bf16 %v7088_v11, %v7088_v11  ;;  %v6731_v14 = vpack.c.bf16 %v7136_v12, %v7136_v12 }
 0x198   : > { %v1044_v15 = vpop.f32.mrf.mxu0  ;;  %v1236_v16 = vpop.f32.mrf.mxu1 }
 0x199   : > { %1800 = vst.msk [vmem:[#allocation3 + $0x1c] sm:$0xf] %vm1792_vm2, %v6683_v13  ;;  %1848 = vst.msk [vmem:[#allocation3 + $0xdc] sm:$0xf] %vm1792_vm2, %v6731_v14  ;;  %v6681_v17 = vpack.c.bf16 %v1044_v15, %v1044_v15  ;;  %v6729_v18 = vpack.c.bf16 %v1236_v16, %v1236_v16 }
 0x19a   : > { %v7091_v19 = vpop.f32.mrf.mxu0  ;;  %v7139_v20 = vpop.f32.mrf.mxu1 }
 0x19b   : > { %1798 = vst.msk [vmem:[#allocation3 + $0x14] sm:$0xf] %vm1792_vm2, %v6681_v17  ;;  %1846 = vst.msk [vmem:[#allocation3 + $0xd4] sm:$0xf] %vm1792_vm2, %v6729_v18  ;;  %v6686_v21 = vpack.c.bf16 %v7091_v19, %v7091_v19  ;;  %v6734_v22 = vpack.c.bf16 %v7139_v20, %v7139_v20 }
 0x19c   : > { %v1057_v23 = vpop.f32.mrf.mxu0  ;;  %v1249_v24 = vpop.f32.mrf.mxu1 }
 0x19d   : > { %1803 = vst.msk [vmem:[#allocation3 + $0x28] sm:$0xf] %vm1792_vm2, %v6686_v21  ;;  %1851 = vst.msk [vmem:[#allocation3 + $0xe8] sm:$0xf] %vm1792_vm2, %v6734_v22  ;;  %v6684_v25 = vpack.c.bf16 %v1057_v23, %v1057_v23  ;;  %v6732_v26 = vpack.c.bf16 %v1249_v24, %v1249_v24 }
 0x19e   : > { %v7092_v27 = vpop.f32.mrf.mxu0  ;;  %v7140_v28 = vpop.f32.mrf.mxu1 }
 0x19f   : > { %1801 = vst.msk [vmem:[#allocation3 + $0x20] sm:$0xf] %vm1792_vm2, %v6684_v25  ;;  %1849 = vst.msk [vmem:[#allocation3 + $0xe0] sm:$0xf] %vm1792_vm2, %v6732_v26  ;;  %v6687_v29 = vpack.c.bf16 %v7092_v27, %v7092_v27  ;;  %v6735_v30 = vpack.c.bf16 %v7140_v28, %v7140_v28 }
 0x1a0   : > { %v1060_v31 = vpop.f32.mrf.mxu0  ;;  %v1252_v32 = vpop.f32.mrf.mxu1 }
 0x1a1   : > { %1804 = vst.msk [vmem:[#allocation3 + $0x2c] sm:$0xf] %vm1792_vm2, %v6687_v29  ;;  %1852 = vst.msk [vmem:[#allocation3 + $0xec] sm:$0xf] %vm1792_vm2, %v6735_v30  ;;  %v6685_v33 = vpack.c.bf16 %v1060_v31, %v1060_v31  ;;  %v6733_v34 = vpack.c.bf16 %v1252_v32, %v1252_v32 }
 0x1a2   : > { %v7095_v35 = vpop.f32.mrf.mxu0  ;;  %v7143_v36 = vpop.f32.mrf.mxu1 }
 0x1a3   : > { %1802 = vst.msk [vmem:[#allocation3 + $0x24] sm:$0xf] %vm1792_vm2, %v6685_v33  ;;  %1850 = vst.msk [vmem:[#allocation3 + $0xe4] sm:$0xf] %vm1792_vm2, %v6733_v34  ;;  %v6690_v37 = vpack.c.bf16 %v7095_v35, %v7095_v35  ;;  %v6738_v38 = vpack.c.bf16 %v7143_v36, %v7143_v36 }
 0x1a4   : > { %v1073_v39 = vpop.f32.mrf.mxu0  ;;  %v1265_v40 = vpop.f32.mrf.mxu1 }
 0x1a5   : > { %1807 = vst.msk [vmem:[#allocation3 + $0x38] sm:$0xf] %vm1792_vm2, %v6690_v37  ;;  %1855 = vst.msk [vmem:[#allocation3 + $0xf8] sm:$0xf] %vm1792_vm2, %v6738_v38  ;;  %v6688_v41 = vpack.c.bf16 %v1073_v39, %v1073_v39  ;;  %v6736_v42 = vpack.c.bf16 %v1265_v40, %v1265_v40 }
 0x1a6   : > { %v7096_v43 = vpop.f32.mrf.mxu0  ;;  %v7144_v44 = vpop.f32.mrf.mxu1 }
 0x1a7   : > { %1805 = vst.msk [vmem:[#allocation3 + $0x30] sm:$0xf] %vm1792_vm2, %v6688_v41  ;;  %1853 = vst.msk [vmem:[#allocation3 + $0xf0] sm:$0xf] %vm1792_vm2, %v6736_v42  ;;  %v6691_v45 = vpack.c.bf16 %v7096_v43, %v7096_v43  ;;  %v6739_v46 = vpack.c.bf16 %v7144_v44, %v7144_v44 }
 0x1a8   : > { %v1076_v47 = vpop.f32.mrf.mxu0  ;;  %v1268_v48 = vpop.f32.mrf.mxu1 }
 0x1a9   : > { %1808 = vst.msk [vmem:[#allocation3 + $0x3c] sm:$0xf] %vm1792_vm2, %v6691_v45  ;;  %1856 = vst.msk [vmem:[#allocation3 + $0xfc] sm:$0xf] %vm1792_vm2, %v6739_v46  ;;  %v6689_v49 = vpack.c.bf16 %v1076_v47, %v1076_v47  ;;  %v6737_v50 = vpack.c.bf16 %v1268_v48, %v1268_v48 }
 0x1aa   : > { %v7099_v51 = vpop.f32.mrf.mxu0  ;;  %v7147_v52 = vpop.f32.mrf.mxu1 }
 0x1ab   : > { %1806 = vst.msk [vmem:[#allocation3 + $0x34] sm:$0xf] %vm1792_vm2, %v6689_v49  ;;  %1854 = vst.msk [vmem:[#allocation3 + $0xf4] sm:$0xf] %vm1792_vm2, %v6737_v50  ;;  %v6694_v53 = vpack.c.bf16 %v7099_v51, %v7099_v51  ;;  %v6742_v54 = vpack.c.bf16 %v7147_v52, %v7147_v52 }
 0x1ac   : > { %v1089_v55 = vpop.f32.mrf.mxu0  ;;  %v1281_v56 = vpop.f32.mrf.mxu1 }
 0x1ad   : > { %1811 = vst.msk [vmem:[#allocation3 + $0x48] sm:$0xf] %vm1792_vm2, %v6694_v53  ;;  %1859 = vst.msk [vmem:[#allocation3 + $0x108] sm:$0xf] %vm1792_vm2, %v6742_v54  ;;  %v6692_v57 = vpack.c.bf16 %v1089_v55, %v1089_v55  ;;  %v6740_v58 = vpack.c.bf16 %v1281_v56, %v1281_v56 }
 0x1ae   : > { %v7100_v59 = vpop.f32.mrf.mxu0  ;;  %v7148_v60 = vpop.f32.mrf.mxu1 }
 0x1af   : > { %1809 = vst.msk [vmem:[#allocation3 + $0x40] sm:$0xf] %vm1792_vm2, %v6692_v57  ;;  %1857 = vst.msk [vmem:[#allocation3 + $0x100] sm:$0xf] %vm1792_vm2, %v6740_v58  ;;  %v6695_v61 = vpack.c.bf16 %v7100_v59, %v7100_v59  ;;  %v6743_v62 = vpack.c.bf16 %v7148_v60, %v7148_v60 }
 0x1b0   : > { %v1092_v63 = vpop.f32.mrf.mxu0  ;;  %v1284_v0 = vpop.f32.mrf.mxu1 }
 0x1b1   : > { %1812 = vst.msk [vmem:[#allocation3 + $0x4c] sm:$0xf] %vm1792_vm2, %v6695_v61  ;;  %1860 = vst.msk [vmem:[#allocation3 + $0x10c] sm:$0xf] %vm1792_vm2, %v6743_v62  ;;  %v6693_v1 = vpack.c.bf16 %v1092_v63, %v1092_v63  ;;  %v6741_v2 = vpack.c.bf16 %v1284_v0, %v1284_v0 }
 0x1b2   : > { %v7103_v3 = vpop.f32.mrf.mxu0  ;;  %v7151_v4 = vpop.f32.mrf.mxu1 }
 0x1b3   : > { %1810 = vst.msk [vmem:[#allocation3 + $0x44] sm:$0xf] %vm1792_vm2, %v6693_v1  ;;  %1858 = vst.msk [vmem:[#allocation3 + $0x104] sm:$0xf] %vm1792_vm2, %v6741_v2  ;;  %v6698_v5 = vpack.c.bf16 %v7103_v3, %v7103_v3  ;;  %v6746_v6 = vpack.c.bf16 %v7151_v4, %v7151_v4 }
 0x1b4   : > { %v1105_v7 = vpop.f32.mrf.mxu0  ;;  %v1297_v8 = vpop.f32.mrf.mxu1 }
 0x1b5   : > { %1815 = vst.msk [vmem:[#allocation3 + $0x58] sm:$0xf] %vm1792_vm2, %v6698_v5  ;;  %1863 = vst.msk [vmem:[#allocation3 + $0x118] sm:$0xf] %vm1792_vm2, %v6746_v6  ;;  %v6696_v9 = vpack.c.bf16 %v1105_v7, %v1105_v7  ;;  %v6744_v10 = vpack.c.bf16 %v1297_v8, %v1297_v8 }
 0x1b6   : > { %v7104_v11 = vpop.f32.mrf.mxu0  ;;  %v7152_v12 = vpop.f32.mrf.mxu1 }
 0x1b7   : > { %1813 = vst.msk [vmem:[#allocation3 + $0x50] sm:$0xf] %vm1792_vm2, %v6696_v9  ;;  %1861 = vst.msk [vmem:[#allocation3 + $0x110] sm:$0xf] %vm1792_vm2, %v6744_v10  ;;  %v6699_v13 = vpack.c.bf16 %v7104_v11, %v7104_v11  ;;  %v6747_v14 = vpack.c.bf16 %v7152_v12, %v7152_v12 }
 0x1b8   : > { %v1108_v15 = vpop.f32.mrf.mxu0  ;;  %v1300_v16 = vpop.f32.mrf.mxu1 }
 0x1b9   : > { %1816 = vst.msk [vmem:[#allocation3 + $0x5c] sm:$0xf] %vm1792_vm2, %v6699_v13  ;;  %1864 = vst.msk [vmem:[#allocation3 + $0x11c] sm:$0xf] %vm1792_vm2, %v6747_v14  ;;  %v6697_v17 = vpack.c.bf16 %v1108_v15, %v1108_v15  ;;  %v6745_v18 = vpack.c.bf16 %v1300_v16, %v1300_v16 }
 0x1ba   : > { %v7107_v19 = vpop.f32.mrf.mxu0  ;;  %v7155_v20 = vpop.f32.mrf.mxu1 }
 0x1bb   : > { %1814 = vst.msk [vmem:[#allocation3 + $0x54] sm:$0xf] %vm1792_vm2, %v6697_v17  ;;  %1862 = vst.msk [vmem:[#allocation3 + $0x114] sm:$0xf] %vm1792_vm2, %v6745_v18  ;;  %v6702_v21 = vpack.c.bf16 %v7107_v19, %v7107_v19  ;;  %v6750_v22 = vpack.c.bf16 %v7155_v20, %v7155_v20 }
 0x1bc   : > { %v1121_v23 = vpop.f32.mrf.mxu0  ;;  %v1313_v24 = vpop.f32.mrf.mxu1 }
 0x1bd   : > { %1819 = vst.msk [vmem:[#allocation3 + $0x68] sm:$0xf] %vm1792_vm2, %v6702_v21  ;;  %1867 = vst.msk [vmem:[#allocation3 + $0x128] sm:$0xf] %vm1792_vm2, %v6750_v22  ;;  %v6700_v25 = vpack.c.bf16 %v1121_v23, %v1121_v23  ;;  %v6748_v26 = vpack.c.bf16 %v1313_v24, %v1313_v24 }
 0x1be   : > { %v7108_v27 = vpop.f32.mrf.mxu0  ;;  %v7156_v28 = vpop.f32.mrf.mxu1 }
 0x1bf   : > { %1817 = vst.msk [vmem:[#allocation3 + $0x60] sm:$0xf] %vm1792_vm2, %v6700_v25  ;;  %1865 = vst.msk [vmem:[#allocation3 + $0x120] sm:$0xf] %vm1792_vm2, %v6748_v26  ;;  %v6703_v29 = vpack.c.bf16 %v7108_v27, %v7108_v27  ;;  %v6751_v30 = vpack.c.bf16 %v7156_v28, %v7156_v28 }
 0x1c0   : > { %v1124_v31 = vpop.f32.mrf.mxu0  ;;  %v1316_v32 = vpop.f32.mrf.mxu1 }
 0x1c1   : > { %1820 = vst.msk [vmem:[#allocation3 + $0x6c] sm:$0xf] %vm1792_vm2, %v6703_v29  ;;  %1868 = vst.msk [vmem:[#allocation3 + $0x12c] sm:$0xf] %vm1792_vm2, %v6751_v30  ;;  %v6701_v33 = vpack.c.bf16 %v1124_v31, %v1124_v31  ;;  %v6749_v34 = vpack.c.bf16 %v1316_v32, %v1316_v32 }
 0x1c2   : > { %v7111_v35 = vpop.f32.mrf.mxu0  ;;  %v7159_v36 = vpop.f32.mrf.mxu1 }
 0x1c3   : > { %1818 = vst.msk [vmem:[#allocation3 + $0x64] sm:$0xf] %vm1792_vm2, %v6701_v33  ;;  %1866 = vst.msk [vmem:[#allocation3 + $0x124] sm:$0xf] %vm1792_vm2, %v6749_v34  ;;  %v6706_v37 = vpack.c.bf16 %v7111_v35, %v7111_v35  ;;  %v6754_v38 = vpack.c.bf16 %v7159_v36, %v7159_v36 }
 0x1c4   : > { %v1137_v39 = vpop.f32.mrf.mxu0  ;;  %v1329_v40 = vpop.f32.mrf.mxu1 }
 0x1c5   : > { %1823 = vst.msk [vmem:[#allocation3 + $0x78] sm:$0xf] %vm1792_vm2, %v6706_v37  ;;  %1871 = vst.msk [vmem:[#allocation3 + $0x138] sm:$0xf] %vm1792_vm2, %v6754_v38  ;;  %v6704_v41 = vpack.c.bf16 %v1137_v39, %v1137_v39  ;;  %v6752_v42 = vpack.c.bf16 %v1329_v40, %v1329_v40 }
 0x1c6   : > { %v7112_v43 = vpop.f32.mrf.mxu0  ;;  %v7160_v44 = vpop.f32.mrf.mxu1 }
 0x1c7   : > { %1821 = vst.msk [vmem:[#allocation3 + $0x70] sm:$0xf] %vm1792_vm2, %v6704_v41  ;;  %1869 = vst.msk [vmem:[#allocation3 + $0x130] sm:$0xf] %vm1792_vm2, %v6752_v42  ;;  %v6707_v45 = vpack.c.bf16 %v7112_v43, %v7112_v43  ;;  %v6755_v46 = vpack.c.bf16 %v7160_v44, %v7160_v44 }
 0x1c8   : > { %v1140_v47 = vpop.f32.mrf.mxu0  ;;  %v1332_v48 = vpop.f32.mrf.mxu1 }
 0x1c9   : > { %1824 = vst.msk [vmem:[#allocation3 + $0x7c] sm:$0xf] %vm1792_vm2, %v6707_v45  ;;  %1872 = vst.msk [vmem:[#allocation3 + $0x13c] sm:$0xf] %vm1792_vm2, %v6755_v46  ;;  %v6705_v49 = vpack.c.bf16 %v1140_v47, %v1140_v47  ;;  %v6753_v50 = vpack.c.bf16 %v1332_v48, %v1332_v48 }
 0x1ca   : > { %v7115_v51 = vpop.f32.mrf.mxu0  ;;  %v7163_v52 = vpop.f32.mrf.mxu1 }
 0x1cb   : > { %1822 = vst.msk [vmem:[#allocation3 + $0x74] sm:$0xf] %vm1792_vm2, %v6705_v49  ;;  %1870 = vst.msk [vmem:[#allocation3 + $0x134] sm:$0xf] %vm1792_vm2, %v6753_v50  ;;  %v6710_v53 = vpack.c.bf16 %v7115_v51, %v7115_v51  ;;  %v6758_v54 = vpack.c.bf16 %v7163_v52, %v7163_v52 }
 0x1cc   : > { %v1153_v55 = vpop.f32.mrf.mxu0  ;;  %v1345_v56 = vpop.f32.mrf.mxu1 }
 0x1cd   : > { %1827 = vst.msk [vmem:[#allocation3 + $0x88] sm:$0xf] %vm1792_vm2, %v6710_v53  ;;  %1875 = vst.msk [vmem:[#allocation3 + $0x148] sm:$0xf] %vm1792_vm2, %v6758_v54  ;;  %v6708_v57 = vpack.c.bf16 %v1153_v55, %v1153_v55  ;;  %v6756_v58 = vpack.c.bf16 %v1345_v56, %v1345_v56 }
 0x1ce   : > { %v7116_v59 = vpop.f32.mrf.mxu0  ;;  %v7164_v60 = vpop.f32.mrf.mxu1 }
 0x1cf   : > { %1825 = vst.msk [vmem:[#allocation3 + $0x80] sm:$0xf] %vm1792_vm2, %v6708_v57  ;;  %1873 = vst.msk [vmem:[#allocation3 + $0x140] sm:$0xf] %vm1792_vm2, %v6756_v58  ;;  %v6711_v61 = vpack.c.bf16 %v7116_v59, %v7116_v59  ;;  %v6759_v62 = vpack.c.bf16 %v7164_v60, %v7164_v60 }
 0x1d0   : > { %v1156_v63 = vpop.f32.mrf.mxu0  ;;  %v1348_v0 = vpop.f32.mrf.mxu1 }
 0x1d1   : > { %1828 = vst.msk [vmem:[#allocation3 + $0x8c] sm:$0xf] %vm1792_vm2, %v6711_v61  ;;  %1876 = vst.msk [vmem:[#allocation3 + $0x14c] sm:$0xf] %vm1792_vm2, %v6759_v62  ;;  %v6709_v1 = vpack.c.bf16 %v1156_v63, %v1156_v63  ;;  %v6757_v2 = vpack.c.bf16 %v1348_v0, %v1348_v0 }
 0x1d2   : > { %v7119_v3 = vpop.f32.mrf.mxu0  ;;  %v7167_v4 = vpop.f32.mrf.mxu1 }
 0x1d3   : > { %1826 = vst.msk [vmem:[#allocation3 + $0x84] sm:$0xf] %vm1792_vm2, %v6709_v1  ;;  %1874 = vst.msk [vmem:[#allocation3 + $0x144] sm:$0xf] %vm1792_vm2, %v6757_v2  ;;  %v6714_v5 = vpack.c.bf16 %v7119_v3, %v7119_v3  ;;  %v6762_v6 = vpack.c.bf16 %v7167_v4, %v7167_v4 }
 0x1d4   : > { %v1169_v7 = vpop.f32.mrf.mxu0  ;;  %v1361_v8 = vpop.f32.mrf.mxu1 }
 0x1d5   : > { %1831 = vst.msk [vmem:[#allocation3 + $0x98] sm:$0xf] %vm1792_vm2, %v6714_v5  ;;  %1879 = vst.msk [vmem:[#allocation3 + $0x158] sm:$0xf] %vm1792_vm2, %v6762_v6  ;;  %v6712_v9 = vpack.c.bf16 %v1169_v7, %v1169_v7  ;;  %v6760_v10 = vpack.c.bf16 %v1361_v8, %v1361_v8 }
 0x1d6   : > { %v7120_v11 = vpop.f32.mrf.mxu0  ;;  %v7168_v12 = vpop.f32.mrf.mxu1 }
 0x1d7   : > { %1829 = vst.msk [vmem:[#allocation3 + $0x90] sm:$0xf] %vm1792_vm2, %v6712_v9  ;;  %1877 = vst.msk [vmem:[#allocation3 + $0x150] sm:$0xf] %vm1792_vm2, %v6760_v10  ;;  %v6715_v13 = vpack.c.bf16 %v7120_v11, %v7120_v11  ;;  %v6763_v14 = vpack.c.bf16 %v7168_v12, %v7168_v12 }
 0x1d8   : > { %v1172_v15 = vpop.f32.mrf.mxu0  ;;  %v1364_v16 = vpop.f32.mrf.mxu1 }
 0x1d9   : > { %1832 = vst.msk [vmem:[#allocation3 + $0x9c] sm:$0xf] %vm1792_vm2, %v6715_v13  ;;  %1880 = vst.msk [vmem:[#allocation3 + $0x15c] sm:$0xf] %vm1792_vm2, %v6763_v14  ;;  %v6713_v17 = vpack.c.bf16 %v1172_v15, %v1172_v15  ;;  %v6761_v18 = vpack.c.bf16 %v1364_v16, %v1364_v16 }
 0x1da   : > { %v7123_v19 = vpop.f32.mrf.mxu0  ;;  %v7171_v20 = vpop.f32.mrf.mxu1 }
 0x1db   : > { %1830 = vst.msk [vmem:[#allocation3 + $0x94] sm:$0xf] %vm1792_vm2, %v6713_v17  ;;  %1878 = vst.msk [vmem:[#allocation3 + $0x154] sm:$0xf] %vm1792_vm2, %v6761_v18  ;;  %v6718_v21 = vpack.c.bf16 %v7123_v19, %v7123_v19  ;;  %v6766_v22 = vpack.c.bf16 %v7171_v20, %v7171_v20 }
 0x1dc   : > { %v1185_v23 = vpop.f32.mrf.mxu0  ;;  %v1377_v24 = vpop.f32.mrf.mxu1 }
 0x1dd   : > { %1835 = vst.msk [vmem:[#allocation3 + $0xa8] sm:$0xf] %vm1792_vm2, %v6718_v21  ;;  %1883 = vst.msk [vmem:[#allocation3 + $0x168] sm:$0xf] %vm1792_vm2, %v6766_v22  ;;  %v6716_v25 = vpack.c.bf16 %v1185_v23, %v1185_v23  ;;  %v6764_v26 = vpack.c.bf16 %v1377_v24, %v1377_v24 }
 0x1de   : > { %v7124_v27 = vpop.f32.mrf.mxu0  ;;  %v7172_v28 = vpop.f32.mrf.mxu1 }
 0x1df   : > { %1833 = vst.msk [vmem:[#allocation3 + $0xa0] sm:$0xf] %vm1792_vm2, %v6716_v25  ;;  %1881 = vst.msk [vmem:[#allocation3 + $0x160] sm:$0xf] %vm1792_vm2, %v6764_v26  ;;  %v6719_v29 = vpack.c.bf16 %v7124_v27, %v7124_v27  ;;  %v6767_v30 = vpack.c.bf16 %v7172_v28, %v7172_v28 }
 0x1e0   : > { %v1188_v31 = vpop.f32.mrf.mxu0  ;;  %v1380_v32 = vpop.f32.mrf.mxu1 }
 0x1e1   : > { %1836 = vst.msk [vmem:[#allocation3 + $0xac] sm:$0xf] %vm1792_vm2, %v6719_v29  ;;  %1884 = vst.msk [vmem:[#allocation3 + $0x16c] sm:$0xf] %vm1792_vm2, %v6767_v30  ;;  %v6717_v33 = vpack.c.bf16 %v1188_v31, %v1188_v31  ;;  %v6765_v34 = vpack.c.bf16 %v1380_v32, %v1380_v32 }
 0x1e2   : > { %v7127_v35 = vpop.f32.mrf.mxu0  ;;  %v7175_v36 = vpop.f32.mrf.mxu1 }
 0x1e3   : > { %1834 = vst.msk [vmem:[#allocation3 + $0xa4] sm:$0xf] %vm1792_vm2, %v6717_v33  ;;  %1882 = vst.msk [vmem:[#allocation3 + $0x164] sm:$0xf] %vm1792_vm2, %v6765_v34  ;;  %v6722_v37 = vpack.c.bf16 %v7127_v35, %v7127_v35  ;;  %v6770_v38 = vpack.c.bf16 %v7175_v36, %v7175_v36 }
 0x1e4   : > { %v1201_v39 = vpop.f32.mrf.mxu0  ;;  %v1393_v40 = vpop.f32.mrf.mxu1 }
 0x1e5   : > { %1839 = vst.msk [vmem:[#allocation3 + $0xb8] sm:$0xf] %vm1792_vm2, %v6722_v37  ;;  %1887 = vst.msk [vmem:[#allocation3 + $0x178] sm:$0xf] %vm1792_vm2, %v6770_v38  ;;  %v6720_v41 = vpack.c.bf16 %v1201_v39, %v1201_v39  ;;  %v6768_v42 = vpack.c.bf16 %v1393_v40, %v1393_v40 }
 0x1e6   : > { %v7128_v43 = vpop.f32.mrf.mxu0  ;;  %v7176_v44 = vpop.f32.mrf.mxu1 }
 0x1e7   : > { %1837 = vst.msk [vmem:[#allocation3 + $0xb0] sm:$0xf] %vm1792_vm2, %v6720_v41  ;;  %1885 = vst.msk [vmem:[#allocation3 + $0x170] sm:$0xf] %vm1792_vm2, %v6768_v42  ;;  %v6723_v45 = vpack.c.bf16 %v7128_v43, %v7128_v43  ;;  %v6771_v46 = vpack.c.bf16 %v7176_v44, %v7176_v44 }
 0x1e8   : > { %v1204_v47 = vpop.f32.mrf.mxu0  ;;  %v1396_v48 = vpop.f32.mrf.mxu1 }
 0x1e9   : > { %1840 = vst.msk [vmem:[#allocation3 + $0xbc] sm:$0xf] %vm1792_vm2, %v6723_v45  ;;  %1888 = vst.msk [vmem:[#allocation3 + $0x17c] sm:$0xf] %vm1792_vm2, %v6771_v46  ;;  %v6721_v49 = vpack.c.bf16 %v1204_v47, %v1204_v47  ;;  %v6769_v50 = vpack.c.bf16 %v1396_v48, %v1396_v48 }
 0x1eb   : > { %1838 = vst.msk [vmem:[#allocation3 + $0xb4] sm:$0xf] %vm1792_vm2, %v6721_v49  ;;  %1886 = vst.msk [vmem:[#allocation3 + $0x174] sm:$0xf] %vm1792_vm2, %v6769_v50 }
 0x1ec PF: > { %p6227_p10 = scmp.le.s32.totalorder %s8217_s16, 0 }
 0x1ee   : > { %1892 = sbr.rel (%p6227_p10) target bundleno = 798 (0x31e), region = 96 }
 0x1f3   : > { %v7588_v51 = vld [vmem:[%s8528_s24 + $0x8] sm:$0xff]   ;;  %v7589_v52 = vld [vmem:[%s8528_s24] sm:$0xff]   ;;  %vm2245_vm3 = vcmask 261120   ;;  %vm3191_vm4 = vcmask 257024  }
 0x1f4   : > { %7177 = vmatprep.subr.bf16.mxu0 %v7588_v51  ;;  %7334 = vmatprep.subr.bf16.mxu1 %v7588_v51  ;;  %v7590_v53 = vld [vmem:[#allocation2] sm:$0xff]   ;;  %v7592_v55 = vld [vmem:[#allocation2 + $0x8] sm:$0xff]   ;;  %v7594_v57 = vld [vmem:[#allocation2 + $0x10] sm:$0xff]  }
 0x1f5   : > { %7178 = vmatpush3.bf16.msra.mxu0 %v7588_v51  ;;  %7336 = vmatpush3.bf16.msra.mxu1 %v7588_v51  ;;  %v7591_v54 = vld [vmem:[#allocation2 + $0xc0] sm:$0xff]   ;;  %v7593_v56 = vld [vmem:[#allocation2 + $0xc8] sm:$0xff]   ;;  %v7595_v58 = vld [vmem:[#allocation2 + $0xd0] sm:$0xff]  }
 0x1f6   : > { %7179 = vmatprep.subr.bf16.mxu0 %v7589_v52  ;;  %7335 = vmatprep.subr.bf16.mxu1 %v7589_v52  ;;  %v7596_v59 = vld [vmem:[#allocation2 + $0x18] sm:$0xff]   ;;  %v7598_v61 = vld [vmem:[#allocation2 + $0x20] sm:$0xff]   ;;  %v7600_v63 = vld [vmem:[#allocation2 + $0x28] sm:$0xff]  }
 0x1f7   : > { %7181 = vmatprep.mubr.msk.bf16.mxu0 %vm2245_vm3, %v7590_v53  ;;  %7229 = vmatprep.mubr.msk.bf16.mxu1 %vm2245_vm3, %v7591_v54  ;;  %v7597_v60 = vld [vmem:[#allocation2 + $0xd8] sm:$0xff]   ;;  %v7599_v62 = vld [vmem:[#allocation2 + $0xe0] sm:$0xff]   ;;  %v7601_v0 = vld [vmem:[#allocation2 + $0xe8] sm:$0xff]  }
 0x1f8   : > { %v7602_v1 = vld [vmem:[#allocation2 + $0x30] sm:$0xff]   ;;  %v7604_v3 = vld [vmem:[#allocation2 + $0x38] sm:$0xff]   ;;  %v7606_v5 = vld [vmem:[#allocation2 + $0x40] sm:$0xff]  }
 0x1f9   : > { %7180 = vmatpush3.bf16.msra.mxu0 %v7589_v52  ;;  %7337 = vmatpush3.bf16.msra.mxu1 %v7589_v52  ;;  %v7603_v2 = vld [vmem:[#allocation2 + $0xf0] sm:$0xff]   ;;  %v7605_v4 = vld [vmem:[#allocation2 + $0xf8] sm:$0xff]   ;;  %v7607_v6 = vld [vmem:[#allocation2 + $0x100] sm:$0xff]  }
 0x1fa   : > { %v7608_v7 = vld [vmem:[#allocation2 + $0x48] sm:$0xff]   ;;  %v7610_v9 = vld [vmem:[#allocation2 + $0x50] sm:$0xff]   ;;  %v7612_v11 = vld [vmem:[#allocation2 + $0x58] sm:$0xff]  }
 0x1fb   : > { %v7609_v8 = vld [vmem:[#allocation2 + $0x108] sm:$0xff]   ;;  %v7611_v10 = vld [vmem:[#allocation2 + $0x110] sm:$0xff]   ;;  %v7613_v12 = vld [vmem:[#allocation2 + $0x118] sm:$0xff]  }
 0x1fc   : > { %7182 = vmatmul.mubr.msk.bf16.vlgmr.msra.gmra.mxu0 %vm2245_vm3, %v7592_v55  ;;  %7230 = vmatmul.mubr.msk.bf16.vlgmr.msra.gmra.mxu1 %vm2245_vm3, %v7593_v56  ;;  %v7614_v13 = vld [vmem:[#allocation2 + $0x60] sm:$0xff]   ;;  %v7616_v15 = vld [vmem:[#allocation2 + $0x68] sm:$0xff]   ;;  %v7618_v17 = vld [vmem:[#allocation2 + $0x70] sm:$0xff]  }
 0x1fd   : > { %7185 = vmatprep.mubr.msk.bf16.mxu0 %vm2245_vm3, %v7594_v57  ;;  %7233 = vmatprep.mubr.msk.bf16.mxu1 %vm2245_vm3, %v7595_v58  ;;  %v7615_v14 = vld [vmem:[#allocation2 + $0x120] sm:$0xff]   ;;  %v7617_v16 = vld [vmem:[#allocation2 + $0x128] sm:$0xff]   ;;  %v7619_v18 = vld [vmem:[#allocation2 + $0x130] sm:$0xff]  }
 0x1fe   : > { %v7620_v19 = vld [vmem:[#allocation2 + $0x78] sm:$0xff]   ;;  %v7622_v21 = vld [vmem:[#allocation2 + $0x80] sm:$0xff]   ;;  %v7624_v23 = vld [vmem:[#allocation2 + $0x88] sm:$0xff]  }
 0x1ff   : > { %v7621_v20 = vld [vmem:[#allocation2 + $0x138] sm:$0xff]   ;;  %v7623_v22 = vld [vmem:[#allocation2 + $0x140] sm:$0xff]   ;;  %v7625_v24 = vld [vmem:[#allocation2 + $0x148] sm:$0xff]  }
 0x200   : > { %v7626_v25 = vld [vmem:[#allocation2 + $0x90] sm:$0xff]   ;;  %v7628_v27 = vld [vmem:[#allocation2 + $0x98] sm:$0xff]   ;;  %v7630_v29 = vld [vmem:[#allocation2 + $0xa0] sm:$0xff]  }
 0x201   : > { %v7627_v26 = vld [vmem:[#allocation2 + $0x150] sm:$0xff]   ;;  %v7629_v28 = vld [vmem:[#allocation2 + $0x158] sm:$0xff]   ;;  %v7631_v30 = vld [vmem:[#allocation2 + $0x160] sm:$0xff]  }
 0x202   : > { %v7632_v31 = vld [vmem:[#allocation2 + $0xa8] sm:$0xff]   ;;  %v7634_v33 = vld [vmem:[#allocation2 + $0xb0] sm:$0xff]   ;;  %v7636_v35 = vld [vmem:[#allocation2 + $0xb8] sm:$0xff]  }
 0x203   : > { %v7633_v32 = vld [vmem:[#allocation2 + $0x168] sm:$0xff]   ;;  %v7635_v34 = vld [vmem:[#allocation2 + $0x170] sm:$0xff]   ;;  %v7637_v36 = vld [vmem:[#allocation2 + $0x178] sm:$0xff]  }
 0x204   : > { %7186 = vmatmul.mubr.msk.bf16.gmra.mxu0 %vm2245_vm3, %v7596_v59  ;;  %7234 = vmatmul.mubr.msk.bf16.gmra.mxu1 %vm2245_vm3, %v7597_v60 }
 0x205   : > { %7189 = vmatprep.mubr.msk.bf16.mxu0 %vm2245_vm3, %v7598_v61  ;;  %7237 = vmatprep.mubr.msk.bf16.mxu1 %vm2245_vm3, %v7599_v62 }
 0x20c   : > { %7190 = vmatmul.mubr.msk.bf16.gmra.mxu0 %vm2245_vm3, %v7600_v63  ;;  %7238 = vmatmul.mubr.msk.bf16.gmra.mxu1 %vm2245_vm3, %v7601_v0 }
 0x20d   : > { %7193 = vmatprep.mubr.msk.bf16.mxu0 %vm2245_vm3, %v7602_v1  ;;  %7241 = vmatprep.mubr.msk.bf16.mxu1 %vm2245_vm3, %v7603_v2 }
 0x214   : > { %7194 = vmatmul.mubr.msk.bf16.gmra.mxu0 %vm2245_vm3, %v7604_v3  ;;  %7242 = vmatmul.mubr.msk.bf16.gmra.mxu1 %vm2245_vm3, %v7605_v4 }
 0x215   : > { %7197 = vmatprep.mubr.msk.bf16.mxu0 %vm2245_vm3, %v7606_v5  ;;  %7245 = vmatprep.mubr.msk.bf16.mxu1 %vm2245_vm3, %v7607_v6 }
 0x21c   : > { %7198 = vmatmul.mubr.msk.bf16.gmra.mxu0 %vm2245_vm3, %v7608_v7  ;;  %7246 = vmatmul.mubr.msk.bf16.gmra.mxu1 %vm2245_vm3, %v7609_v8 }
 0x21d   : > { %7201 = vmatprep.mubr.msk.bf16.mxu0 %vm2245_vm3, %v7610_v9  ;;  %7249 = vmatprep.mubr.msk.bf16.mxu1 %vm2245_vm3, %v7611_v10 }
 0x224   : > { %7202 = vmatmul.mubr.msk.bf16.gmra.mxu0 %vm2245_vm3, %v7612_v11  ;;  %7250 = vmatmul.mubr.msk.bf16.gmra.mxu1 %vm2245_vm3, %v7613_v12 }
 0x225   : > { %7205 = vmatprep.mubr.msk.bf16.mxu0 %vm2245_vm3, %v7614_v13  ;;  %7253 = vmatprep.mubr.msk.bf16.mxu1 %vm2245_vm3, %v7615_v14 }
 0x22c   : > { %7206 = vmatmul.mubr.msk.bf16.gmra.mxu0 %vm2245_vm3, %v7616_v15  ;;  %7254 = vmatmul.mubr.msk.bf16.gmra.mxu1 %vm2245_vm3, %v7617_v16 }
 0x22d   : > { %7209 = vmatprep.mubr.msk.bf16.mxu0 %vm2245_vm3, %v7618_v17  ;;  %7257 = vmatprep.mubr.msk.bf16.mxu1 %vm2245_vm3, %v7619_v18 }
 0x234   : > { %7210 = vmatmul.mubr.msk.bf16.gmra.mxu0 %vm2245_vm3, %v7620_v19  ;;  %7258 = vmatmul.mubr.msk.bf16.gmra.mxu1 %vm2245_vm3, %v7621_v20 }
 0x235   : > { %7213 = vmatprep.mubr.msk.bf16.mxu0 %vm2245_vm3, %v7622_v21  ;;  %7261 = vmatprep.mubr.msk.bf16.mxu1 %vm2245_vm3, %v7623_v22 }
 0x23c   : > { %7214 = vmatmul.mubr.msk.bf16.gmra.mxu0 %vm2245_vm3, %v7624_v23  ;;  %7262 = vmatmul.mubr.msk.bf16.gmra.mxu1 %vm2245_vm3, %v7625_v24 }
 0x23d   : > { %7217 = vmatprep.mubr.msk.bf16.mxu0 %vm2245_vm3, %v7626_v25  ;;  %7265 = vmatprep.mubr.msk.bf16.mxu1 %vm2245_vm3, %v7627_v26 }
 0x244   : > { %7218 = vmatmul.mubr.msk.bf16.gmra.mxu0 %vm2245_vm3, %v7628_v27  ;;  %7266 = vmatmul.mubr.msk.bf16.gmra.mxu1 %vm2245_vm3, %v7629_v28 }
 0x245   : > { %7221 = vmatprep.mubr.msk.bf16.mxu0 %vm2245_vm3, %v7630_v29  ;;  %7269 = vmatprep.mubr.msk.bf16.mxu1 %vm2245_vm3, %v7631_v30 }
 0x24c   : > { %7222 = vmatmul.mubr.msk.bf16.gmra.mxu0 %vm2245_vm3, %v7632_v31  ;;  %7270 = vmatmul.mubr.msk.bf16.gmra.mxu1 %vm2245_vm3, %v7633_v32 }
 0x24d   : > { %7225 = vmatprep.mubr.msk.bf16.mxu0 %vm2245_vm3, %v7634_v33  ;;  %7273 = vmatprep.mubr.msk.bf16.mxu1 %vm2245_vm3, %v7635_v34 }
 0x254   : > { %7226 = vmatmul.mubr.msk.bf16.gmra.mxu0 %vm2245_vm3, %v7636_v35  ;;  %7274 = vmatmul.mubr.msk.bf16.gmra.mxu1 %vm2245_vm3, %v7637_v36 }
 0x2bc   : > { %v7183_v37 = vpop.f32.mrf.mxu0  ;;  %v7231_v38 = vpop.f32.mrf.mxu1 }
 0x2bd   : > { %v6774_v39 = vpack.c.bf16 %v7183_v37, %v7183_v37  ;;  %v6822_v40 = vpack.c.bf16 %v7231_v38, %v7231_v38 }
 0x2be   : > { %v2424_v41 = vpop.f32.mrf.mxu0  ;;  %v2616_v42 = vpop.f32.mrf.mxu1 }
 0x2bf   : > { %3194 = vst.msk [vmem:[#allocation3 + $0x8] sm:$0xf] %vm3191_vm4, %v6774_v39  ;;  %3242 = vst.msk [vmem:[#allocation3 + $0xc8] sm:$0xf] %vm3191_vm4, %v6822_v40  ;;  %v6772_v43 = vpack.c.bf16 %v2424_v41, %v2424_v41  ;;  %v6820_v44 = vpack.c.bf16 %v2616_v42, %v2616_v42 }
 0x2c0   : > { %v7184_v45 = vpop.f32.mrf.mxu0  ;;  %v7232_v46 = vpop.f32.mrf.mxu1 }
 0x2c1   : > { %3192 = vst.msk [vmem:[#allocation3] sm:$0xf] %vm3191_vm4, %v6772_v43  ;;  %3240 = vst.msk [vmem:[#allocation3 + $0xc0] sm:$0xf] %vm3191_vm4, %v6820_v44  ;;  %v6775_v47 = vpack.c.bf16 %v7184_v45, %v7184_v45  ;;  %v6823_v48 = vpack.c.bf16 %v7232_v46, %v7232_v46 }
 0x2c2   : > { %v2427_v49 = vpop.f32.mrf.mxu0  ;;  %v2619_v50 = vpop.f32.mrf.mxu1 }
 0x2c3   : > { %3195 = vst.msk [vmem:[#allocation3 + $0xc] sm:$0xf] %vm3191_vm4, %v6775_v47  ;;  %3243 = vst.msk [vmem:[#allocation3 + $0xcc] sm:$0xf] %vm3191_vm4, %v6823_v48  ;;  %v6773_v51 = vpack.c.bf16 %v2427_v49, %v2427_v49  ;;  %v6821_v52 = vpack.c.bf16 %v2619_v50, %v2619_v50 }
 0x2c4   : > { %v7187_v53 = vpop.f32.mrf.mxu0  ;;  %v7235_v54 = vpop.f32.mrf.mxu1 }
 0x2c5   : > { %3193 = vst.msk [vmem:[#allocation3 + $0x4] sm:$0xf] %vm3191_vm4, %v6773_v51  ;;  %3241 = vst.msk [vmem:[#allocation3 + $0xc4] sm:$0xf] %vm3191_vm4, %v6821_v52  ;;  %v6778_v55 = vpack.c.bf16 %v7187_v53, %v7187_v53  ;;  %v6826_v56 = vpack.c.bf16 %v7235_v54, %v7235_v54 }
 0x2c6   : > { %v2440_v57 = vpop.f32.mrf.mxu0  ;;  %v2632_v58 = vpop.f32.mrf.mxu1 }
 0x2c7   : > { %3198 = vst.msk [vmem:[#allocation3 + $0x18] sm:$0xf] %vm3191_vm4, %v6778_v55  ;;  %3246 = vst.msk [vmem:[#allocation3 + $0xd8] sm:$0xf] %vm3191_vm4, %v6826_v56  ;;  %v6776_v59 = vpack.c.bf16 %v2440_v57, %v2440_v57  ;;  %v6824_v60 = vpack.c.bf16 %v2632_v58, %v2632_v58 }
 0x2c8   : > { %v7188_v61 = vpop.f32.mrf.mxu0  ;;  %v7236_v62 = vpop.f32.mrf.mxu1 }
 0x2c9   : > { %3196 = vst.msk [vmem:[#allocation3 + $0x10] sm:$0xf] %vm3191_vm4, %v6776_v59  ;;  %3244 = vst.msk [vmem:[#allocation3 + $0xd0] sm:$0xf] %vm3191_vm4, %v6824_v60  ;;  %v6779_v63 = vpack.c.bf16 %v7188_v61, %v7188_v61  ;;  %v6827_v0 = vpack.c.bf16 %v7236_v62, %v7236_v62 }
 0x2ca   : > { %v2443_v1 = vpop.f32.mrf.mxu0  ;;  %v2635_v2 = vpop.f32.mrf.mxu1 }
 0x2cb   : > { %3199 = vst.msk [vmem:[#allocation3 + $0x1c] sm:$0xf] %vm3191_vm4, %v6779_v63  ;;  %3247 = vst.msk [vmem:[#allocation3 + $0xdc] sm:$0xf] %vm3191_vm4, %v6827_v0  ;;  %v6777_v3 = vpack.c.bf16 %v2443_v1, %v2443_v1  ;;  %v6825_v4 = vpack.c.bf16 %v2635_v2, %v2635_v2 }
 0x2cc   : > { %v7191_v5 = vpop.f32.mrf.mxu0  ;;  %v7239_v6 = vpop.f32.mrf.mxu1 }
 0x2cd   : > { %3197 = vst.msk [vmem:[#allocation3 + $0x14] sm:$0xf] %vm3191_vm4, %v6777_v3  ;;  %3245 = vst.msk [vmem:[#allocation3 + $0xd4] sm:$0xf] %vm3191_vm4, %v6825_v4  ;;  %v6782_v7 = vpack.c.bf16 %v7191_v5, %v7191_v5  ;;  %v6830_v8 = vpack.c.bf16 %v7239_v6, %v7239_v6 }
 0x2ce   : > { %v2456_v9 = vpop.f32.mrf.mxu0  ;;  %v2648_v10 = vpop.f32.mrf.mxu1 }
 0x2cf   : > { %3202 = vst.msk [vmem:[#allocation3 + $0x28] sm:$0xf] %vm3191_vm4, %v6782_v7  ;;  %3250 = vst.msk [vmem:[#allocation3 + $0xe8] sm:$0xf] %vm3191_vm4, %v6830_v8  ;;  %v6780_v11 = vpack.c.bf16 %v2456_v9, %v2456_v9  ;;  %v6828_v12 = vpack.c.bf16 %v2648_v10, %v2648_v10 }
 0x2d0   : > { %v7192_v13 = vpop.f32.mrf.mxu0  ;;  %v7240_v14 = vpop.f32.mrf.mxu1 }
 0x2d1   : > { %3200 = vst.msk [vmem:[#allocation3 + $0x20] sm:$0xf] %vm3191_vm4, %v6780_v11  ;;  %3248 = vst.msk [vmem:[#allocation3 + $0xe0] sm:$0xf] %vm3191_vm4, %v6828_v12  ;;  %v6783_v15 = vpack.c.bf16 %v7192_v13, %v7192_v13  ;;  %v6831_v16 = vpack.c.bf16 %v7240_v14, %v7240_v14 }
 0x2d2   : > { %v2459_v17 = vpop.f32.mrf.mxu0  ;;  %v2651_v18 = vpop.f32.mrf.mxu1 }
 0x2d3   : > { %3203 = vst.msk [vmem:[#allocation3 + $0x2c] sm:$0xf] %vm3191_vm4, %v6783_v15  ;;  %3251 = vst.msk [vmem:[#allocation3 + $0xec] sm:$0xf] %vm3191_vm4, %v6831_v16  ;;  %v6781_v19 = vpack.c.bf16 %v2459_v17, %v2459_v17  ;;  %v6829_v20 = vpack.c.bf16 %v2651_v18, %v2651_v18 }
 0x2d4   : > { %v7195_v21 = vpop.f32.mrf.mxu0  ;;  %v7243_v22 = vpop.f32.mrf.mxu1 }
 0x2d5   : > { %3201 = vst.msk [vmem:[#allocation3 + $0x24] sm:$0xf] %vm3191_vm4, %v6781_v19  ;;  %3249 = vst.msk [vmem:[#allocation3 + $0xe4] sm:$0xf] %vm3191_vm4, %v6829_v20  ;;  %v6786_v23 = vpack.c.bf16 %v7195_v21, %v7195_v21  ;;  %v6834_v24 = vpack.c.bf16 %v7243_v22, %v7243_v22 }
 0x2d6   : > { %v2472_v25 = vpop.f32.mrf.mxu0  ;;  %v2664_v26 = vpop.f32.mrf.mxu1 }
 0x2d7   : > { %3206 = vst.msk [vmem:[#allocation3 + $0x38] sm:$0xf] %vm3191_vm4, %v6786_v23  ;;  %3254 = vst.msk [vmem:[#allocation3 + $0xf8] sm:$0xf] %vm3191_vm4, %v6834_v24  ;;  %v6784_v27 = vpack.c.bf16 %v2472_v25, %v2472_v25  ;;  %v6832_v28 = vpack.c.bf16 %v2664_v26, %v2664_v26 }
 0x2d8   : > { %v7196_v29 = vpop.f32.mrf.mxu0  ;;  %v7244_v30 = vpop.f32.mrf.mxu1 }
 0x2d9   : > { %3204 = vst.msk [vmem:[#allocation3 + $0x30] sm:$0xf] %vm3191_vm4, %v6784_v27  ;;  %3252 = vst.msk [vmem:[#allocation3 + $0xf0] sm:$0xf] %vm3191_vm4, %v6832_v28  ;;  %v6787_v31 = vpack.c.bf16 %v7196_v29, %v7196_v29  ;;  %v6835_v32 = vpack.c.bf16 %v7244_v30, %v7244_v30 }
 0x2da   : > { %v2475_v33 = vpop.f32.mrf.mxu0  ;;  %v2667_v34 = vpop.f32.mrf.mxu1 }
 0x2db   : > { %3207 = vst.msk [vmem:[#allocation3 + $0x3c] sm:$0xf] %vm3191_vm4, %v6787_v31  ;;  %3255 = vst.msk [vmem:[#allocation3 + $0xfc] sm:$0xf] %vm3191_vm4, %v6835_v32  ;;  %v6785_v35 = vpack.c.bf16 %v2475_v33, %v2475_v33  ;;  %v6833_v36 = vpack.c.bf16 %v2667_v34, %v2667_v34 }
 0x2dc   : > { %v7199_v37 = vpop.f32.mrf.mxu0  ;;  %v7247_v38 = vpop.f32.mrf.mxu1 }
 0x2dd   : > { %3205 = vst.msk [vmem:[#allocation3 + $0x34] sm:$0xf] %vm3191_vm4, %v6785_v35  ;;  %3253 = vst.msk [vmem:[#allocation3 + $0xf4] sm:$0xf] %vm3191_vm4, %v6833_v36  ;;  %v6790_v39 = vpack.c.bf16 %v7199_v37, %v7199_v37  ;;  %v6838_v40 = vpack.c.bf16 %v7247_v38, %v7247_v38 }
 0x2de   : > { %v2488_v41 = vpop.f32.mrf.mxu0  ;;  %v2680_v42 = vpop.f32.mrf.mxu1 }
 0x2df   : > { %3210 = vst.msk [vmem:[#allocation3 + $0x48] sm:$0xf] %vm3191_vm4, %v6790_v39  ;;  %3258 = vst.msk [vmem:[#allocation3 + $0x108] sm:$0xf] %vm3191_vm4, %v6838_v40  ;;  %v6788_v43 = vpack.c.bf16 %v2488_v41, %v2488_v41  ;;  %v6836_v44 = vpack.c.bf16 %v2680_v42, %v2680_v42 }
 0x2e0   : > { %v7200_v45 = vpop.f32.mrf.mxu0  ;;  %v7248_v46 = vpop.f32.mrf.mxu1 }
 0x2e1   : > { %3208 = vst.msk [vmem:[#allocation3 + $0x40] sm:$0xf] %vm3191_vm4, %v6788_v43  ;;  %3256 = vst.msk [vmem:[#allocation3 + $0x100] sm:$0xf] %vm3191_vm4, %v6836_v44  ;;  %v6791_v47 = vpack.c.bf16 %v7200_v45, %v7200_v45  ;;  %v6839_v48 = vpack.c.bf16 %v7248_v46, %v7248_v46 }
 0x2e2   : > { %v2491_v49 = vpop.f32.mrf.mxu0  ;;  %v2683_v50 = vpop.f32.mrf.mxu1 }
 0x2e3   : > { %3211 = vst.msk [vmem:[#allocation3 + $0x4c] sm:$0xf] %vm3191_vm4, %v6791_v47  ;;  %3259 = vst.msk [vmem:[#allocation3 + $0x10c] sm:$0xf] %vm3191_vm4, %v6839_v48  ;;  %v6789_v51 = vpack.c.bf16 %v2491_v49, %v2491_v49  ;;  %v6837_v52 = vpack.c.bf16 %v2683_v50, %v2683_v50 }
 0x2e4   : > { %v7203_v53 = vpop.f32.mrf.mxu0  ;;  %v7251_v54 = vpop.f32.mrf.mxu1 }
 0x2e5   : > { %3209 = vst.msk [vmem:[#allocation3 + $0x44] sm:$0xf] %vm3191_vm4, %v6789_v51  ;;  %3257 = vst.msk [vmem:[#allocation3 + $0x104] sm:$0xf] %vm3191_vm4, %v6837_v52  ;;  %v6794_v55 = vpack.c.bf16 %v7203_v53, %v7203_v53  ;;  %v6842_v56 = vpack.c.bf16 %v7251_v54, %v7251_v54 }
 0x2e6   : > { %v2504_v57 = vpop.f32.mrf.mxu0  ;;  %v2696_v58 = vpop.f32.mrf.mxu1 }
 0x2e7   : > { %3214 = vst.msk [vmem:[#allocation3 + $0x58] sm:$0xf] %vm3191_vm4, %v6794_v55  ;;  %3262 = vst.msk [vmem:[#allocation3 + $0x118] sm:$0xf] %vm3191_vm4, %v6842_v56  ;;  %v6792_v59 = vpack.c.bf16 %v2504_v57, %v2504_v57  ;;  %v6840_v60 = vpack.c.bf16 %v2696_v58, %v2696_v58 }
 0x2e8   : > { %v7204_v61 = vpop.f32.mrf.mxu0  ;;  %v7252_v62 = vpop.f32.mrf.mxu1 }
 0x2e9   : > { %3212 = vst.msk [vmem:[#allocation3 + $0x50] sm:$0xf] %vm3191_vm4, %v6792_v59  ;;  %3260 = vst.msk [vmem:[#allocation3 + $0x110] sm:$0xf] %vm3191_vm4, %v6840_v60  ;;  %v6795_v63 = vpack.c.bf16 %v7204_v61, %v7204_v61  ;;  %v6843_v0 = vpack.c.bf16 %v7252_v62, %v7252_v62 }
 0x2ea   : > { %v2507_v1 = vpop.f32.mrf.mxu0  ;;  %v2699_v2 = vpop.f32.mrf.mxu1 }
 0x2eb   : > { %3215 = vst.msk [vmem:[#allocation3 + $0x5c] sm:$0xf] %vm3191_vm4, %v6795_v63  ;;  %3263 = vst.msk [vmem:[#allocation3 + $0x11c] sm:$0xf] %vm3191_vm4, %v6843_v0  ;;  %v6793_v3 = vpack.c.bf16 %v2507_v1, %v2507_v1  ;;  %v6841_v4 = vpack.c.bf16 %v2699_v2, %v2699_v2 }
 0x2ec   : > { %v7207_v5 = vpop.f32.mrf.mxu0  ;;  %v7255_v6 = vpop.f32.mrf.mxu1 }
 0x2ed   : > { %3213 = vst.msk [vmem:[#allocation3 + $0x54] sm:$0xf] %vm3191_vm4, %v6793_v3  ;;  %3261 = vst.msk [vmem:[#allocation3 + $0x114] sm:$0xf] %vm3191_vm4, %v6841_v4  ;;  %v6798_v7 = vpack.c.bf16 %v7207_v5, %v7207_v5  ;;  %v6846_v8 = vpack.c.bf16 %v7255_v6, %v7255_v6 }
 0x2ee   : > { %v2520_v9 = vpop.f32.mrf.mxu0  ;;  %v2712_v10 = vpop.f32.mrf.mxu1 }
 0x2ef   : > { %3218 = vst.msk [vmem:[#allocation3 + $0x68] sm:$0xf] %vm3191_vm4, %v6798_v7  ;;  %3266 = vst.msk [vmem:[#allocation3 + $0x128] sm:$0xf] %vm3191_vm4, %v6846_v8  ;;  %v6796_v11 = vpack.c.bf16 %v2520_v9, %v2520_v9  ;;  %v6844_v12 = vpack.c.bf16 %v2712_v10, %v2712_v10 }
 0x2f0   : > { %v7208_v13 = vpop.f32.mrf.mxu0  ;;  %v7256_v14 = vpop.f32.mrf.mxu1 }
 0x2f1   : > { %3216 = vst.msk [vmem:[#allocation3 + $0x60] sm:$0xf] %vm3191_vm4, %v6796_v11  ;;  %3264 = vst.msk [vmem:[#allocation3 + $0x120] sm:$0xf] %vm3191_vm4, %v6844_v12  ;;  %v6799_v15 = vpack.c.bf16 %v7208_v13, %v7208_v13  ;;  %v6847_v16 = vpack.c.bf16 %v7256_v14, %v7256_v14 }
 0x2f2   : > { %v2523_v17 = vpop.f32.mrf.mxu0  ;;  %v2715_v18 = vpop.f32.mrf.mxu1 }
 0x2f3   : > { %3219 = vst.msk [vmem:[#allocation3 + $0x6c] sm:$0xf] %vm3191_vm4, %v6799_v15  ;;  %3267 = vst.msk [vmem:[#allocation3 + $0x12c] sm:$0xf] %vm3191_vm4, %v6847_v16  ;;  %v6797_v19 = vpack.c.bf16 %v2523_v17, %v2523_v17  ;;  %v6845_v20 = vpack.c.bf16 %v2715_v18, %v2715_v18 }
 0x2f4   : > { %v7211_v21 = vpop.f32.mrf.mxu0  ;;  %v7259_v22 = vpop.f32.mrf.mxu1 }
 0x2f5   : > { %3217 = vst.msk [vmem:[#allocation3 + $0x64] sm:$0xf] %vm3191_vm4, %v6797_v19  ;;  %3265 = vst.msk [vmem:[#allocation3 + $0x124] sm:$0xf] %vm3191_vm4, %v6845_v20  ;;  %v6802_v23 = vpack.c.bf16 %v7211_v21, %v7211_v21  ;;  %v6850_v24 = vpack.c.bf16 %v7259_v22, %v7259_v22 }
 0x2f6   : > { %v2536_v25 = vpop.f32.mrf.mxu0  ;;  %v2728_v26 = vpop.f32.mrf.mxu1 }
 0x2f7   : > { %3222 = vst.msk [vmem:[#allocation3 + $0x78] sm:$0xf] %vm3191_vm4, %v6802_v23  ;;  %3270 = vst.msk [vmem:[#allocation3 + $0x138] sm:$0xf] %vm3191_vm4, %v6850_v24  ;;  %v6800_v27 = vpack.c.bf16 %v2536_v25, %v2536_v25  ;;  %v6848_v28 = vpack.c.bf16 %v2728_v26, %v2728_v26 }
 0x2f8   : > { %v7212_v29 = vpop.f32.mrf.mxu0  ;;  %v7260_v30 = vpop.f32.mrf.mxu1 }
 0x2f9   : > { %3220 = vst.msk [vmem:[#allocation3 + $0x70] sm:$0xf] %vm3191_vm4, %v6800_v27  ;;  %3268 = vst.msk [vmem:[#allocation3 + $0x130] sm:$0xf] %vm3191_vm4, %v6848_v28  ;;  %v6803_v31 = vpack.c.bf16 %v7212_v29, %v7212_v29  ;;  %v6851_v32 = vpack.c.bf16 %v7260_v30, %v7260_v30 }
 0x2fa   : > { %v2539_v33 = vpop.f32.mrf.mxu0  ;;  %v2731_v34 = vpop.f32.mrf.mxu1 }
 0x2fb   : > { %3223 = vst.msk [vmem:[#allocation3 + $0x7c] sm:$0xf] %vm3191_vm4, %v6803_v31  ;;  %3271 = vst.msk [vmem:[#allocation3 + $0x13c] sm:$0xf] %vm3191_vm4, %v6851_v32  ;;  %v6801_v35 = vpack.c.bf16 %v2539_v33, %v2539_v33  ;;  %v6849_v36 = vpack.c.bf16 %v2731_v34, %v2731_v34 }
 0x2fc   : > { %v7215_v37 = vpop.f32.mrf.mxu0  ;;  %v7263_v38 = vpop.f32.mrf.mxu1 }
 0x2fd   : > { %3221 = vst.msk [vmem:[#allocation3 + $0x74] sm:$0xf] %vm3191_vm4, %v6801_v35  ;;  %3269 = vst.msk [vmem:[#allocation3 + $0x134] sm:$0xf] %vm3191_vm4, %v6849_v36  ;;  %v6806_v39 = vpack.c.bf16 %v7215_v37, %v7215_v37  ;;  %v6854_v40 = vpack.c.bf16 %v7263_v38, %v7263_v38 }
 0x2fe   : > { %v2552_v41 = vpop.f32.mrf.mxu0  ;;  %v2744_v42 = vpop.f32.mrf.mxu1 }
 0x2ff   : > { %3226 = vst.msk [vmem:[#allocation3 + $0x88] sm:$0xf] %vm3191_vm4, %v6806_v39  ;;  %3274 = vst.msk [vmem:[#allocation3 + $0x148] sm:$0xf] %vm3191_vm4, %v6854_v40  ;;  %v6804_v43 = vpack.c.bf16 %v2552_v41, %v2552_v41  ;;  %v6852_v44 = vpack.c.bf16 %v2744_v42, %v2744_v42 }
 0x300   : > { %v7216_v45 = vpop.f32.mrf.mxu0  ;;  %v7264_v46 = vpop.f32.mrf.mxu1 }
 0x301   : > { %3224 = vst.msk [vmem:[#allocation3 + $0x80] sm:$0xf] %vm3191_vm4, %v6804_v43  ;;  %3272 = vst.msk [vmem:[#allocation3 + $0x140] sm:$0xf] %vm3191_vm4, %v6852_v44  ;;  %v6807_v47 = vpack.c.bf16 %v7216_v45, %v7216_v45  ;;  %v6855_v48 = vpack.c.bf16 %v7264_v46, %v7264_v46 }
 0x302   : > { %v2555_v49 = vpop.f32.mrf.mxu0  ;;  %v2747_v50 = vpop.f32.mrf.mxu1 }
 0x303   : > { %3227 = vst.msk [vmem:[#allocation3 + $0x8c] sm:$0xf] %vm3191_vm4, %v6807_v47  ;;  %3275 = vst.msk [vmem:[#allocation3 + $0x14c] sm:$0xf] %vm3191_vm4, %v6855_v48  ;;  %v6805_v51 = vpack.c.bf16 %v2555_v49, %v2555_v49  ;;  %v6853_v52 = vpack.c.bf16 %v2747_v50, %v2747_v50 }
 0x304   : > { %v7219_v53 = vpop.f32.mrf.mxu0  ;;  %v7267_v54 = vpop.f32.mrf.mxu1 }
 0x305   : > { %3225 = vst.msk [vmem:[#allocation3 + $0x84] sm:$0xf] %vm3191_vm4, %v6805_v51  ;;  %3273 = vst.msk [vmem:[#allocation3 + $0x144] sm:$0xf] %vm3191_vm4, %v6853_v52  ;;  %v6810_v55 = vpack.c.bf16 %v7219_v53, %v7219_v53  ;;  %v6858_v56 = vpack.c.bf16 %v7267_v54, %v7267_v54 }
 0x306   : > { %v2568_v57 = vpop.f32.mrf.mxu0  ;;  %v2760_v58 = vpop.f32.mrf.mxu1 }
 0x307   : > { %3230 = vst.msk [vmem:[#allocation3 + $0x98] sm:$0xf] %vm3191_vm4, %v6810_v55  ;;  %3278 = vst.msk [vmem:[#allocation3 + $0x158] sm:$0xf] %vm3191_vm4, %v6858_v56  ;;  %v6808_v59 = vpack.c.bf16 %v2568_v57, %v2568_v57  ;;  %v6856_v60 = vpack.c.bf16 %v2760_v58, %v2760_v58 }
 0x308   : > { %v7220_v61 = vpop.f32.mrf.mxu0  ;;  %v7268_v62 = vpop.f32.mrf.mxu1 }
 0x309   : > { %3228 = vst.msk [vmem:[#allocation3 + $0x90] sm:$0xf] %vm3191_vm4, %v6808_v59  ;;  %3276 = vst.msk [vmem:[#allocation3 + $0x150] sm:$0xf] %vm3191_vm4, %v6856_v60  ;;  %v6811_v63 = vpack.c.bf16 %v7220_v61, %v7220_v61  ;;  %v6859_v0 = vpack.c.bf16 %v7268_v62, %v7268_v62 }
 0x30a   : > { %v2571_v1 = vpop.f32.mrf.mxu0  ;;  %v2763_v2 = vpop.f32.mrf.mxu1 }
 0x30b   : > { %3231 = vst.msk [vmem:[#allocation3 + $0x9c] sm:$0xf] %vm3191_vm4, %v6811_v63  ;;  %3279 = vst.msk [vmem:[#allocation3 + $0x15c] sm:$0xf] %vm3191_vm4, %v6859_v0  ;;  %v6809_v3 = vpack.c.bf16 %v2571_v1, %v2571_v1  ;;  %v6857_v4 = vpack.c.bf16 %v2763_v2, %v2763_v2 }
 0x30c   : > { %v7223_v5 = vpop.f32.mrf.mxu0  ;;  %v7271_v6 = vpop.f32.mrf.mxu1 }
 0x30d   : > { %3229 = vst.msk [vmem:[#allocation3 + $0x94] sm:$0xf] %vm3191_vm4, %v6809_v3  ;;  %3277 = vst.msk [vmem:[#allocation3 + $0x154] sm:$0xf] %vm3191_vm4, %v6857_v4  ;;  %v6814_v7 = vpack.c.bf16 %v7223_v5, %v7223_v5  ;;  %v6862_v8 = vpack.c.bf16 %v7271_v6, %v7271_v6 }
 0x30e   : > { %v2584_v9 = vpop.f32.mrf.mxu0  ;;  %v2776_v10 = vpop.f32.mrf.mxu1 }
 0x30f   : > { %3234 = vst.msk [vmem:[#allocation3 + $0xa8] sm:$0xf] %vm3191_vm4, %v6814_v7  ;;  %3282 = vst.msk [vmem:[#allocation3 + $0x168] sm:$0xf] %vm3191_vm4, %v6862_v8  ;;  %v6812_v11 = vpack.c.bf16 %v2584_v9, %v2584_v9  ;;  %v6860_v12 = vpack.c.bf16 %v2776_v10, %v2776_v10 }
 0x310   : > { %v7224_v13 = vpop.f32.mrf.mxu0  ;;  %v7272_v14 = vpop.f32.mrf.mxu1 }
 0x311   : > { %3232 = vst.msk [vmem:[#allocation3 + $0xa0] sm:$0xf] %vm3191_vm4, %v6812_v11  ;;  %3280 = vst.msk [vmem:[#allocation3 + $0x160] sm:$0xf] %vm3191_vm4, %v6860_v12  ;;  %v6815_v15 = vpack.c.bf16 %v7224_v13, %v7224_v13  ;;  %v6863_v16 = vpack.c.bf16 %v7272_v14, %v7272_v14 }
 0x312   : > { %v2587_v17 = vpop.f32.mrf.mxu0  ;;  %v2779_v18 = vpop.f32.mrf.mxu1 }
 0x313   : > { %3235 = vst.msk [vmem:[#allocation3 + $0xac] sm:$0xf] %vm3191_vm4, %v6815_v15  ;;  %3283 = vst.msk [vmem:[#allocation3 + $0x16c] sm:$0xf] %vm3191_vm4, %v6863_v16  ;;  %v6813_v19 = vpack.c.bf16 %v2587_v17, %v2587_v17  ;;  %v6861_v20 = vpack.c.bf16 %v2779_v18, %v2779_v18 }
 0x314   : > { %v7227_v21 = vpop.f32.mrf.mxu0  ;;  %v7275_v22 = vpop.f32.mrf.mxu1 }
 0x315   : > { %3233 = vst.msk [vmem:[#allocation3 + $0xa4] sm:$0xf] %vm3191_vm4, %v6813_v19  ;;  %3281 = vst.msk [vmem:[#allocation3 + $0x164] sm:$0xf] %vm3191_vm4, %v6861_v20  ;;  %v6818_v23 = vpack.c.bf16 %v7227_v21, %v7227_v21  ;;  %v6866_v24 = vpack.c.bf16 %v7275_v22, %v7275_v22 }
 0x316   : > { %v2600_v25 = vpop.f32.mrf.mxu0  ;;  %v2792_v26 = vpop.f32.mrf.mxu1 }
 0x317   : > { %3238 = vst.msk [vmem:[#allocation3 + $0xb8] sm:$0xf] %vm3191_vm4, %v6818_v23  ;;  %3286 = vst.msk [vmem:[#allocation3 + $0x178] sm:$0xf] %vm3191_vm4, %v6866_v24  ;;  %v6816_v27 = vpack.c.bf16 %v2600_v25, %v2600_v25  ;;  %v6864_v28 = vpack.c.bf16 %v2792_v26, %v2792_v26 }
 0x318   : > { %v7228_v29 = vpop.f32.mrf.mxu0  ;;  %v7276_v30 = vpop.f32.mrf.mxu1 }
 0x319   : > { %3236 = vst.msk [vmem:[#allocation3 + $0xb0] sm:$0xf] %vm3191_vm4, %v6816_v27  ;;  %3284 = vst.msk [vmem:[#allocation3 + $0x170] sm:$0xf] %vm3191_vm4, %v6864_v28  ;;  %v6819_v31 = vpack.c.bf16 %v7228_v29, %v7228_v29  ;;  %v6867_v32 = vpack.c.bf16 %v7276_v30, %v7276_v30 }
 0x31a   : > { %v2603_v33 = vpop.f32.mrf.mxu0  ;;  %v2795_v34 = vpop.f32.mrf.mxu1 }
 0x31b   : > { %3239 = vst.msk [vmem:[#allocation3 + $0xbc] sm:$0xf] %vm3191_vm4, %v6819_v31  ;;  %3287 = vst.msk [vmem:[#allocation3 + $0x17c] sm:$0xf] %vm3191_vm4, %v6867_v32  ;;  %v6817_v35 = vpack.c.bf16 %v2603_v33, %v2603_v33  ;;  %v6865_v36 = vpack.c.bf16 %v2795_v34, %v2795_v34 }
 0x31d   : > { %3237 = vst.msk [vmem:[#allocation3 + $0xb4] sm:$0xf] %vm3191_vm4, %v6817_v35  ;;  %3285 = vst.msk [vmem:[#allocation3 + $0x174] sm:$0xf] %vm3191_vm4, %v6865_v36 }
 0x31e PF: > { %v7638_v37 = vld [vmem:[#allocation3 + $0x38] sm:$0xff]   ;;  %v8245_v38 = vmov 0   ;;  %v7639_v39 = vld [vmem:[#allocation3 + $0x30] sm:$0xff]   ;;  %s3288_s24 = smul.u32 384, %s8213_s15  ;;  %v7640_v40 = vld [vmem:[#allocation3 + $0x28] sm:$0xff]   ;;  %vm5466_vm5 = vcmask 257024  }
 0x31f   : > { %4549 = vmatprep.subr.bf16.mxu0 %v8245_v38  ;;  %7338 = vmatprep.subr.bf16.mxu1 %v8245_v38  ;;  %v7641_v41 = vld [vmem:[#allocation3 + $0x20] sm:$0xff]   ;;  %v7642_v42 = vld [vmem:[#allocation3 + $0x18] sm:$0xff]   ;;  %v7643_v44 = vld [vmem:[#allocation3 + $0x10] sm:$0xff]   ;;  %p5515_p13 = scmp.eq.s32.totalorder %s8217_s16, 2  ;;  %p6665_p7 = scmp.ne.s32.totalorder %s8217_s16, 2 }
 0x320   : > { %4550 = vmatpush1.bf16.msra.mxu0 %v7638_v37  ;;  %7354 = vmatpush1.bf16.msra.mxu1 %v7638_v37  ;;  %s8994_s1 = sshra.s32 %s3288_s24, 3  ;;  %v7644_v46 = vld [vmem:[#allocation3 + $0x8] sm:$0xff]   ;;  %v7645_v47 = vld [vmem:[#allocation3] sm:$0xff]   ;;  %v7646_v48 = vld [vmem:[#allocation3 + $0x78] sm:$0xff]  }
 0x321   : > { %4551 = vmatprep.subr.bf16.mxu0 %v8245_v38  ;;  %7339 = vmatprep.subr.bf16.mxu1 %v8245_v38  ;;  %s6868_s21 = smul.u32 24, %s8994_s1  ;;  %v7647_v49 = vld [vmem:[#allocation3 + $0x70] sm:$0xff]   ;;  %v7648_v50 = vld [vmem:[#allocation3 + $0x68] sm:$0xff]   ;;  %v7649_v51 = vld [vmem:[#allocation3 + $0x60] sm:$0xff]   ;;  %s6664_s25 = sshll.u32 %s8994_s1, 2 }
 0x322   : > { %v7650_v52 = vld [vmem:[#allocation3 + $0x58] sm:$0xff]   ;;  %v7651_v53 = vld [vmem:[#allocation3 + $0x50] sm:$0xff]   ;;  %v7652_v54 = vld [vmem:[#allocation3 + $0x48] sm:$0xff]  }
 0x323   : > { %s9001_s5 = scalar_lea.vmem [#allocation5], %s6868_s21  ;;  %v7653_v55 = vld [vmem:[#allocation3 + $0x40] sm:$0xff]   ;;  %v7660_v58 = vld [vmem:[#allocation3 + $0xb8] sm:$0xff]   ;;  %v7669_v63 = vld [vmem:[#allocation3 + $0x130] sm:$0xff]  }
 0x324   : > { %4552 = vmatpush1.bf16.msra.mxu0 %v7639_v39  ;;  %7355 = vmatpush1.bf16.msra.mxu1 %v7639_v39  ;;  %v7656_v43 = vld [vmem:[%s9001_s5 + $0x4] ss:$24 sps:$4 sm:$0xff]   ;;  %v7654_v56 = vld [vmem:[%s9001_s5] ss:$24 sps:$4 sm:$0xff]   ;;  %v7662_v60 = vld [vmem:[%s9001_s5 + $0x34] ss:$24 sps:$4 sm:$0xff]  }
 0x325   : > { %4553 = vmatprep.subr.bf16.mxu0 %v8245_v38  ;;  %7340 = vmatprep.subr.bf16.mxu1 %v8245_v38  ;;  %v7659_v45 = vld [vmem:[%s9001_s5 + $0x244] ss:$24 sps:$4 sm:$0xff]   ;;  %v7657_v57 = vld [vmem:[%s9001_s5 + $0x240] ss:$24 sps:$4 sm:$0xff]   ;;  %v7664_v61 = vld [vmem:[%s9001_s5 + $0x274] ss:$24 sps:$4 sm:$0xff]  }
 0x326   : > { %4581 = vmatprep.mubr.bf16.mxu0 %v7656_v43  ;;  %4677 = vmatprep.mubr.bf16.mxu1 %v7659_v45  ;;  %v7661_v59 = vld [vmem:[#allocation3 + $0x138] sm:$0xff]   ;;  %v7666_v62 = vld [vmem:[#allocation3 + $0xb0] sm:$0xff]   ;;  %v7670_v2 = vld [vmem:[#allocation3 + $0xa8] sm:$0xff]  }
 0x327   : > { %v7667_v0 = vld [vmem:[%s9001_s5 + $0x30] ss:$24 sps:$4 sm:$0xff]   ;;  %v7671_v3 = vld [vmem:[%s9001_s5 + $0x64] ss:$24 sps:$4 sm:$0xff]   ;;  %v7676_v8 = vld [vmem:[%s9001_s5 + $0x60] ss:$24 sps:$4 sm:$0xff]  }
 0x328   : > { %4554 = vmatpush1.bf16.msra.mxu0 %v7640_v40  ;;  %7356 = vmatpush1.bf16.msra.mxu1 %v7640_v40  ;;  %v7668_v1 = vld [vmem:[%s9001_s5 + $0x270] ss:$24 sps:$4 sm:$0xff]   ;;  %v7673_v4 = vld [vmem:[%s9001_s5 + $0x2a4] ss:$24 sps:$4 sm:$0xff]   ;;  %v7677_v9 = vld [vmem:[%s9001_s5 + $0x2a0] ss:$24 sps:$4 sm:$0xff]  }
 0x329   : > { %4555 = vmatprep.subr.bf16.mxu0 %v8245_v38  ;;  %7341 = vmatprep.subr.bf16.mxu1 %v8245_v38  ;;  %v7675_v5 = vld [vmem:[#allocation3 + $0x128] sm:$0xff]   ;;  %v7678_v6 = vld [vmem:[#allocation3 + $0xa0] sm:$0xff]   ;;  %v7686_v12 = vld [vmem:[#allocation3 + $0x98] sm:$0xff]  }
 0x32a   : > { %v7679_v7 = vld [vmem:[#allocation3 + $0x120] sm:$0xff]   ;;  %v7680_v10 = vld [vmem:[%s9001_s5 + $0x94] ss:$24 sps:$4 sm:$0xff]   ;;  %v7687_v13 = vld [vmem:[#allocation3 + $0x118] sm:$0xff]  }
 0x32b   : > { %v7682_v11 = vld [vmem:[%s9001_s5 + $0x2d4] ss:$24 sps:$4 sm:$0xff]   ;;  %v7684_v16 = vld [vmem:[%s9001_s5 + $0x90] ss:$24 sps:$4 sm:$0xff]   ;;  %v7688_v18 = vld [vmem:[%s9001_s5 + $0xc4] ss:$24 sps:$4 sm:$0xff]  }
 0x32c   : > { %4556 = vmatpush1.bf16.msra.mxu0 %v7641_v41  ;;  %7357 = vmatpush1.bf16.msra.mxu1 %v7641_v41  ;;  %v7692_v14 = vld [vmem:[#allocation3 + $0x90] sm:$0xff]   ;;  %v7690_v19 = vld [vmem:[%s9001_s5 + $0x304] ss:$24 sps:$4 sm:$0xff]   ;;  %v7696_v20 = vld [vmem:[#allocation3 + $0x88] sm:$0xff]  }
 0x32d   : > { %4557 = vmatprep.subr.bf16.mxu0 %v8245_v38  ;;  %7342 = vmatprep.subr.bf16.mxu1 %v8245_v38  ;;  %v7695_v15 = vld [vmem:[#allocation3 + $0x110] sm:$0xff]   ;;  %v7701_v21 = vld [vmem:[#allocation3 + $0x108] sm:$0xff]   ;;  %v7704_v22 = vld [vmem:[#allocation3 + $0x80] sm:$0xff]  }
 0x32e   : > { %v7685_v17 = vld [vmem:[%s9001_s5 + $0x2d0] ss:$24 sps:$4 sm:$0xff]   ;;  %v7705_v23 = vld [vmem:[#allocation3 + $0x100] sm:$0xff]   ;;  %v7697_v26 = vld [vmem:[%s9001_s5 + $0xf4] ss:$24 sps:$4 sm:$0xff]  }
 0x32f   : > { %v7693_v24 = vld [vmem:[%s9001_s5 + $0xc0] ss:$24 sps:$4 sm:$0xff]   ;;  %v7699_v27 = vld [vmem:[%s9001_s5 + $0x334] ss:$24 sps:$4 sm:$0xff]   ;;  %v7702_v32 = vld [vmem:[%s9001_s5 + $0xf0] ss:$24 sps:$4 sm:$0xff]  }
 0x330   : > { %4558 = vmatpush1.bf16.msra.mxu0 %v7642_v42  ;;  %7358 = vmatpush1.bf16.msra.mxu1 %v7642_v42  ;;  %v7694_v25 = vld [vmem:[%s9001_s5 + $0x300] ss:$24 sps:$4 sm:$0xff]   ;;  %v7718_v30 = vld [vmem:[#allocation3 + $0xf0] sm:$0xff]   ;;  %v7706_v34 = vld [vmem:[%s9001_s5 + $0x124] ss:$24 sps:$4 sm:$0xff]  }
 0x331   : > { %4559 = vmatprep.subr.bf16.mxu0 %v8245_v38  ;;  %7343 = vmatprep.subr.bf16.mxu1 %v8245_v38  ;;  %v7712_v28 = vld [vmem:[#allocation3 + $0xf8] sm:$0xff]   ;;  %v7721_v31 = vld [vmem:[#allocation3 + $0x170] sm:$0xff]   ;;  %v7722_v36 = vld [vmem:[#allocation3 + $0xe8] sm:$0xff]  }
 0x332   : > { %v7713_v29 = vld [vmem:[#allocation3 + $0x178] sm:$0xff]   ;;  %v7703_v33 = vld [vmem:[%s9001_s5 + $0x330] ss:$24 sps:$4 sm:$0xff]   ;;  %v7730_v39 = vld [vmem:[#allocation3 + $0xe0] sm:$0xff]  }
 0x333   : > { %v7708_v35 = vld [vmem:[%s9001_s5 + $0x364] ss:$24 sps:$4 sm:$0xff]   ;;  %v7727_v37 = vld [vmem:[#allocation3 + $0x168] sm:$0xff]   ;;  %v7710_v40 = vld [vmem:[%s9001_s5 + $0x120] ss:$24 sps:$4 sm:$0xff]  }
 0x334   : > { %4560 = vmatpush1.bf16.msra.mxu0 %v7643_v44  ;;  %7359 = vmatpush1.bf16.msra.mxu1 %v7643_v44  ;;  %v7711_v41 = vld [vmem:[%s9001_s5 + $0x360] ss:$24 sps:$4 sm:$0xff]   ;;  %v7714_v43 = vld [vmem:[%s9001_s5 + $0x154] ss:$24 sps:$4 sm:$0xff]  }
 0x335   : > { %4561 = vmatprep.subr.bf16.mxu0 %v8245_v38  ;;  %7344 = vmatprep.subr.bf16.mxu1 %v8245_v38  ;;  %v7731_v42 = vld [vmem:[#allocation3 + $0x160] sm:$0xff]   ;;  %v7716_v44 = vld [vmem:[%s9001_s5 + $0x394] ss:$24 sps:$4 sm:$0xff]   ;;  %v7738_v45 = vld [vmem:[#allocation3 + $0xd8] sm:$0xff]  }
 0x338   : > { %4562 = vmatpush1.bf16.msra.mxu0 %v7644_v46  ;;  %7360 = vmatpush1.bf16.msra.mxu1 %v7644_v46  ;;  %v7739_v46 = vld [vmem:[#allocation3 + $0x158] sm:$0xff]  }
 0x339   : > { %4563 = vmatprep.subr.bf16.mxu0 %v8245_v38  ;;  %7345 = vmatprep.subr.bf16.mxu1 %v8245_v38 }
 0x33c   : > { %4564 = vmatpush1.bf16.msra.mxu0 %v7645_v47  ;;  %7361 = vmatpush1.bf16.msra.mxu1 %v7645_v47  ;;  %v7744_v47 = vld [vmem:[#allocation3 + $0xd0] sm:$0xff]  }
 0x33d   : > { %4565 = vmatprep.subr.bf16.mxu0 %v8245_v38  ;;  %7346 = vmatprep.subr.bf16.mxu1 %v8245_v38 }
 0x340   : > { %4566 = vmatpush2.bf16.msra.mxu0 %v7646_v48  ;;  %7362 = vmatpush2.bf16.msra.mxu1 %v7646_v48  ;;  %v7747_v48 = vld [vmem:[#allocation3 + $0x150] sm:$0xff]  }
 0x341   : > { %4567 = vmatprep.subr.bf16.mxu0 %v8245_v38  ;;  %7347 = vmatprep.subr.bf16.mxu1 %v8245_v38 }
 0x344   : > { %4568 = vmatpush2.bf16.msra.mxu0 %v7647_v49  ;;  %7363 = vmatpush2.bf16.msra.mxu1 %v7647_v49  ;;  %v7719_v49 = vld [vmem:[%s9001_s5 + $0x150] ss:$24 sps:$4 sm:$0xff]  }
 0x345   : > { %4569 = vmatprep.subr.bf16.mxu0 %v8245_v38  ;;  %7348 = vmatprep.subr.bf16.mxu1 %v8245_v38 }
 0x348   : > { %4570 = vmatpush2.bf16.msra.mxu0 %v7648_v50  ;;  %7364 = vmatpush2.bf16.msra.mxu1 %v7648_v50  ;;  %v7720_v50 = vld [vmem:[%s9001_s5 + $0x390] ss:$24 sps:$4 sm:$0xff]  }
 0x349   : > { %4571 = vmatprep.subr.bf16.mxu0 %v8245_v38  ;;  %7349 = vmatprep.subr.bf16.mxu1 %v8245_v38 }
 0x34c   : > { %4572 = vmatpush2.bf16.msra.mxu0 %v7649_v51  ;;  %7365 = vmatpush2.bf16.msra.mxu1 %v7649_v51  ;;  %v7723_v51 = vld [vmem:[%s9001_s5 + $0x184] ss:$24 sps:$4 sm:$0xff]  }
 0x34d   : > { %4573 = vmatprep.subr.bf16.mxu0 %v8245_v38  ;;  %7350 = vmatprep.subr.bf16.mxu1 %v8245_v38 }
 0x350   : > { %4574 = vmatpush2.bf16.msra.mxu0 %v7650_v52  ;;  %7366 = vmatpush2.bf16.msra.mxu1 %v7650_v52  ;;  %v7725_v52 = vld [vmem:[%s9001_s5 + $0x3c4] ss:$24 sps:$4 sm:$0xff]  }
 0x351   : > { %4575 = vmatprep.subr.bf16.mxu0 %v8245_v38  ;;  %7351 = vmatprep.subr.bf16.mxu1 %v8245_v38 }
 0x354   : > { %4576 = vmatpush2.bf16.msra.mxu0 %v7651_v53  ;;  %7367 = vmatpush2.bf16.msra.mxu1 %v7651_v53  ;;  %v7748_v53 = vld [vmem:[#allocation3 + $0xc8] sm:$0xff]  }
 0x355   : > { %4577 = vmatprep.subr.bf16.mxu0 %v8245_v38  ;;  %7352 = vmatprep.subr.bf16.mxu1 %v8245_v38 }
 0x358   : > { %4578 = vmatpush2.bf16.msra.mxu0 %v7652_v54  ;;  %7368 = vmatpush2.bf16.msra.mxu1 %v7652_v54  ;;  %v7753_v54 = vld [vmem:[#allocation3 + $0x148] sm:$0xff]  }
 0x359   : > { %4579 = vmatprep.subr.bf16.mxu0 %v8245_v38  ;;  %7353 = vmatprep.subr.bf16.mxu1 %v8245_v38 }
 0x35c   : > { %4580 = vmatpush2.bf16.msra.mxu0 %v7653_v55  ;;  %7369 = vmatpush2.bf16.msra.mxu1 %v7653_v55  ;;  %v7756_v55 = vld [vmem:[#allocation3 + $0xc0] sm:$0xff]  }
 0x35d   : > { %4774 = vmatprep.subr.bf16.mxu1 %v8245_v38  ;;  %4999 = vmatprep.subr.bf16.mxu0 %v8245_v38 }
 0x35f   : > { %4582 = vmatmul.mubr.bf16.vlgmr.msra.gmra.mxu0 %v7654_v56  ;;  %4678 = vmatmul.mubr.bf16.vlgmr.msra.gmra.mxu1 %v7657_v57  ;;  %v7757_v56 = vld [vmem:[#allocation3 + $0x140] sm:$0xff]  }
 0x360   : > { %4775 = vmatpush1.bf16.msra.mxu1 %v7660_v58  ;;  %5000 = vmatpush1.bf16.msra.mxu0 %v7661_v59  ;;  %v7728_v57 = vld [vmem:[%s9001_s5 + $0x180] ss:$24 sps:$4 sm:$0xff]   ;;  %v7732_v59 = vld [vmem:[%s9001_s5 + $0x1b4] ss:$24 sps:$4 sm:$0xff]  }
 0x361   : > { %4776 = vmatprep.subr.bf16.mxu1 %v8245_v38  ;;  %4589 = vmatprep.mubr.bf16.mxu0 %v7662_v60  ;;  %v7729_v58 = vld [vmem:[%s9001_s5 + $0x3c0] ss:$24 sps:$4 sm:$0xff]   ;;  %v7734_v60 = vld [vmem:[%s9001_s5 + $0x3f4] ss:$24 sps:$4 sm:$0xff]  }
 0x362   : > { %4685 = vmatprep.mubr.bf16.mxu1 %v7664_v61  ;;  %5001 = vmatprep.subr.bf16.mxu0 %v8245_v38  ;;  %v7736_v61 = vld [vmem:[%s9001_s5 + $0x1b0] ss:$24 sps:$4 sm:$0xff]  }
 0x364   : > { %4777 = vmatpush1.bf16.msra.mxu1 %v7666_v62  ;;  %5002 = vmatpush1.bf16.msra.mxu0 %v7669_v63  ;;  %v7737_v62 = vld [vmem:[%s9001_s5 + $0x3f0] ss:$24 sps:$4 sm:$0xff]   ;;  %v7740_v63 = vld [vmem:[%s9001_s5 + $0x1e4] ss:$24 sps:$4 sm:$0xff]  }
 0x365   : > { %4778 = vmatprep.subr.bf16.mxu1 %v8245_v38  ;;  %5003 = vmatprep.subr.bf16.mxu0 %v8245_v38 }
 0x367   : > { %4590 = vmatmul.mubr.bf16.gmra.mxu0 %v7667_v0  ;;  %4686 = vmatmul.mubr.bf16.gmra.mxu1 %v7668_v1  ;;  %v7742_v0 = vld [vmem:[%s9001_s5 + $0x424] ss:$24 sps:$4 sm:$0xff]   ;;  %v7746_v1 = vld [vmem:[%s9001_s5 + $0x420] ss:$24 sps:$4 sm:$0xff]  }
 0x368   : > { %4779 = vmatpush1.bf16.msra.mxu1 %v7670_v2  ;;  %4597 = vmatprep.mubr.bf16.mxu0 %v7671_v3  ;;  %v7749_v2 = vld [vmem:[%s9001_s5 + $0x214] ss:$24 sps:$4 sm:$0xff]  }
 0x369   : > { %4693 = vmatprep.mubr.bf16.mxu1 %v7673_v4  ;;  %5004 = vmatpush1.bf16.msra.mxu0 %v7675_v5  ;;  %v7751_v3 = vld [vmem:[%s9001_s5 + $0x454] ss:$24 sps:$4 sm:$0xff]   ;;  %v7754_v4 = vld [vmem:[%s9001_s5 + $0x210] ss:$24 sps:$4 sm:$0xff]  }
 0x36a   : > { %4780 = vmatprep.subr.bf16.mxu1 %v8245_v38  ;;  %5005 = vmatprep.subr.bf16.mxu0 %v8245_v38  ;;  %v7755_v5 = vld [vmem:[%s9001_s5 + $0x450] ss:$24 sps:$4 sm:$0xff]  }
 0x36c   : > { %4781 = vmatpush1.bf16.msra.mxu1 %v7678_v6  ;;  %v7760_v6 = vld [vmem:[%s9001_s5 + $0xc] ss:$24 sps:$4 sm:$0xff]  }
 0x36d   : > { %5006 = vmatpush1.bf16.msra.mxu0 %v7679_v7  ;;  %4782 = vmatprep.subr.bf16.mxu1 %v8245_v38  ;;  %v7763_v7 = vld [vmem:[%s9001_s5 + $0x14] ss:$24 sps:$4 sm:$0xff]  }
 0x36e   : > { %5007 = vmatprep.subr.bf16.mxu0 %v8245_v38 }
 0x36f   : > { %4598 = vmatmul.mubr.bf16.gmra.mxu0 %v7676_v8  ;;  %4694 = vmatmul.mubr.bf16.gmra.mxu1 %v7677_v9  ;;  %v7758_v8 = vld [vmem:[%s9001_s5 + $0x8] ss:$24 sps:$4 sm:$0xff]  }
 0x370   : > { %4605 = vmatprep.mubr.bf16.mxu0 %v7680_v10  ;;  %4701 = vmatprep.mubr.bf16.mxu1 %v7682_v11  ;;  %v7761_v9 = vld [vmem:[%s9001_s5 + $0x10] ss:$24 sps:$4 sm:$0xff]   ;;  %v7764_v10 = vld [vmem:[%s9001_s5 + $0x3c] ss:$24 sps:$4 sm:$0xff]  }
 0x371   : > { %4783 = vmatpush1.bf16.msra.mxu1 %v7686_v12  ;;  %5008 = vmatpush1.bf16.msra.mxu0 %v7687_v13  ;;  %v7766_v11 = vld [vmem:[%s9001_s5 + $0x44] ss:$24 sps:$4 sm:$0xff]   ;;  %v7768_v12 = vld [vmem:[%s9001_s5 + $0x38] ss:$24 sps:$4 sm:$0xff]  }
 0x372   : > { %4784 = vmatprep.subr.bf16.mxu1 %v8245_v38  ;;  %5009 = vmatprep.subr.bf16.mxu0 %v8245_v38  ;;  %v7769_v13 = vld [vmem:[%s9001_s5 + $0x40] ss:$24 sps:$4 sm:$0xff]  }
 0x375   : > { %4785 = vmatpush1.bf16.msra.mxu1 %v7692_v14  ;;  %5010 = vmatpush1.bf16.msra.mxu0 %v7695_v15  ;;  %v7770_v14 = vld [vmem:[%s9001_s5 + $0x6c] ss:$24 sps:$4 sm:$0xff]  }
 0x376   : > { %4786 = vmatprep.subr.bf16.mxu1 %v8245_v38  ;;  %5011 = vmatprep.subr.bf16.mxu0 %v8245_v38  ;;  %v7772_v15 = vld [vmem:[%s9001_s5 + $0x74] ss:$24 sps:$4 sm:$0xff]  }
 0x377   : > { %4606 = vmatmul.mubr.bf16.gmra.mxu0 %v7684_v16  ;;  %4702 = vmatmul.mubr.bf16.gmra.mxu1 %v7685_v17  ;;  %v7774_v16 = vld [vmem:[%s9001_s5 + $0x68] ss:$24 sps:$4 sm:$0xff]  }
 0x378   : > { %4613 = vmatprep.mubr.bf16.mxu0 %v7688_v18  ;;  %4709 = vmatprep.mubr.bf16.mxu1 %v7690_v19  ;;  %v7775_v17 = vld [vmem:[%s9001_s5 + $0x70] ss:$24 sps:$4 sm:$0xff]   ;;  %v7776_v18 = vld [vmem:[%s9001_s5 + $0x9c] ss:$24 sps:$4 sm:$0xff]  }
 0x379   : > { %4787 = vmatpush1.bf16.msra.mxu1 %v7696_v20  ;;  %5012 = vmatpush1.bf16.msra.mxu0 %v7701_v21  ;;  %v7778_v19 = vld [vmem:[%s9001_s5 + $0xa4] ss:$24 sps:$4 sm:$0xff]   ;;  %v7780_v20 = vld [vmem:[%s9001_s5 + $0x98] ss:$24 sps:$4 sm:$0xff]  }
 0x37a   : > { %4788 = vmatprep.subr.bf16.mxu1 %v8245_v38  ;;  %5013 = vmatprep.subr.bf16.mxu0 %v8245_v38  ;;  %v7781_v21 = vld [vmem:[%s9001_s5 + $0xa0] ss:$24 sps:$4 sm:$0xff]  }
 0x37d   : > { %4789 = vmatpush1.bf16.msra.mxu1 %v7704_v22  ;;  %5014 = vmatpush1.bf16.msra.mxu0 %v7705_v23  ;;  %v7782_v22 = vld [vmem:[%s9001_s5 + $0xcc] ss:$24 sps:$4 sm:$0xff]  }
 0x37e   : > { %4790 = vmatprep.subr.bf16.mxu1 %v8245_v38  ;;  %5015 = vmatprep.subr.bf16.mxu0 %v8245_v38  ;;  %v7784_v23 = vld [vmem:[%s9001_s5 + $0xd4] ss:$24 sps:$4 sm:$0xff]  }
 0x37f   : > { %4614 = vmatmul.mubr.bf16.gmra.mxu0 %v7693_v24  ;;  %4710 = vmatmul.mubr.bf16.gmra.mxu1 %v7694_v25  ;;  %v7786_v24 = vld [vmem:[%s9001_s5 + $0xc8] ss:$24 sps:$4 sm:$0xff]  }
 0x380   : > { %4621 = vmatprep.mubr.bf16.mxu0 %v7697_v26  ;;  %4717 = vmatprep.mubr.bf16.mxu1 %v7699_v27  ;;  %v7787_v25 = vld [vmem:[%s9001_s5 + $0xd0] ss:$24 sps:$4 sm:$0xff]   ;;  %v7788_v26 = vld [vmem:[%s9001_s5 + $0xfc] ss:$24 sps:$4 sm:$0xff]  }
 0x381   : > { %4791 = vmatpush2.bf16.msra.mxu1 %v7712_v28  ;;  %5016 = vmatpush2.bf16.msra.mxu0 %v7713_v29  ;;  %v7790_v27 = vld [vmem:[%s9001_s5 + $0x104] ss:$24 sps:$4 sm:$0xff]   ;;  %v7792_v28 = vld [vmem:[%s9001_s5 + $0xf8] ss:$24 sps:$4 sm:$0xff]  }
 0x382   : > { %4792 = vmatprep.subr.bf16.mxu1 %v8245_v38  ;;  %5017 = vmatprep.subr.bf16.mxu0 %v8245_v38  ;;  %v7793_v29 = vld [vmem:[%s9001_s5 + $0x100] ss:$24 sps:$4 sm:$0xff]  }
 0x385   : > { %4793 = vmatpush2.bf16.msra.mxu1 %v7718_v30  ;;  %5018 = vmatpush2.bf16.msra.mxu0 %v7721_v31  ;;  %v7794_v30 = vld [vmem:[%s9001_s5 + $0x12c] ss:$24 sps:$4 sm:$0xff]  }
 0x386   : > { %4794 = vmatprep.subr.bf16.mxu1 %v8245_v38  ;;  %5019 = vmatprep.subr.bf16.mxu0 %v8245_v38  ;;  %v7796_v31 = vld [vmem:[%s9001_s5 + $0x134] ss:$24 sps:$4 sm:$0xff]  }
 0x387   : > { %4622 = vmatmul.mubr.bf16.gmra.mxu0 %v7702_v32  ;;  %4718 = vmatmul.mubr.bf16.gmra.mxu1 %v7703_v33  ;;  %v7798_v32 = vld [vmem:[%s9001_s5 + $0x128] ss:$24 sps:$4 sm:$0xff]  }
 0x388   : > { %4629 = vmatprep.mubr.bf16.mxu0 %v7706_v34  ;;  %4725 = vmatprep.mubr.bf16.mxu1 %v7708_v35  ;;  %v7799_v33 = vld [vmem:[%s9001_s5 + $0x130] ss:$24 sps:$4 sm:$0xff]   ;;  %v7800_v34 = vld [vmem:[%s9001_s5 + $0x15c] ss:$24 sps:$4 sm:$0xff]  }
 0x389   : > { %4795 = vmatpush2.bf16.msra.mxu1 %v7722_v36  ;;  %5020 = vmatpush2.bf16.msra.mxu0 %v7727_v37  ;;  %v7802_v35 = vld [vmem:[%s9001_s5 + $0x164] ss:$24 sps:$4 sm:$0xff]   ;;  %v7804_v36 = vld [vmem:[%s9001_s5 + $0x158] ss:$24 sps:$4 sm:$0xff]  }
 0x38a   : > { %4796 = vmatprep.subr.bf16.mxu1 %v8245_v38  ;;  %5021 = vmatprep.subr.bf16.mxu0 %v8245_v38  ;;  %v7805_v37 = vld [vmem:[%s9001_s5 + $0x160] ss:$24 sps:$4 sm:$0xff]  }
 0x38d   : > { %4797 = vmatpush2.bf16.msra.mxu1 %v7730_v39  ;;  %5022 = vmatpush2.bf16.msra.mxu0 %v7731_v42  ;;  %v7806_v39 = vld [vmem:[%s9001_s5 + $0x18c] ss:$24 sps:$4 sm:$0xff]   ;;  %v7811_v42 = vld [vmem:[%s9001_s5 + $0x190] ss:$24 sps:$4 sm:$0xff]  }
 0x38e   : > { %4798 = vmatprep.subr.bf16.mxu1 %v8245_v38  ;;  %5023 = vmatprep.subr.bf16.mxu0 %v8245_v38 }
 0x38f   : > { %4630 = vmatmul.mubr.bf16.gmra.mxu0 %v7710_v40  ;;  %4726 = vmatmul.mubr.bf16.gmra.mxu1 %v7711_v41  ;;  %v7808_v40 = vld [vmem:[%s9001_s5 + $0x194] ss:$24 sps:$4 sm:$0xff]   ;;  %v7810_v41 = vld [vmem:[%s9001_s5 + $0x188] ss:$24 sps:$4 sm:$0xff]  }
 0x390   : > { %4637 = vmatprep.mubr.bf16.mxu0 %v7714_v43  ;;  %4733 = vmatprep.mubr.bf16.mxu1 %v7716_v44  ;;  %v7812_v43 = vld [vmem:[%s9001_s5 + $0x1bc] ss:$24 sps:$4 sm:$0xff]  }
 0x391   : > { %4799 = vmatpush2.bf16.msra.mxu1 %v7738_v45  ;;  %5024 = vmatpush2.bf16.msra.mxu0 %v7739_v46  ;;  %v7814_v44 = vld [vmem:[%s9001_s5 + $0x1c4] ss:$24 sps:$4 sm:$0xff]   ;;  %v7816_v45 = vld [vmem:[%s9001_s5 + $0x1b8] ss:$24 sps:$4 sm:$0xff]  }
 0x392   : > { %4800 = vmatprep.subr.bf16.mxu1 %v8245_v38  ;;  %5025 = vmatprep.subr.bf16.mxu0 %v8245_v38  ;;  %v7817_v46 = vld [vmem:[%s9001_s5 + $0x1c0] ss:$24 sps:$4 sm:$0xff]  }
 0x395   : > { %4801 = vmatpush2.bf16.msra.mxu1 %v7744_v47  ;;  %5026 = vmatpush2.bf16.msra.mxu0 %v7747_v48  ;;  %v7818_v47 = vld [vmem:[%s9001_s5 + $0x1ec] ss:$24 sps:$4 sm:$0xff]  }
 0x396   : > { %4802 = vmatprep.subr.bf16.mxu1 %v8245_v38  ;;  %5027 = vmatprep.subr.bf16.mxu0 %v8245_v38  ;;  %v7820_v48 = vld [vmem:[%s9001_s5 + $0x1f4] ss:$24 sps:$4 sm:$0xff]  }
 0x397   : > { %4638 = vmatmul.mubr.bf16.gmra.mxu0 %v7719_v49  ;;  %4734 = vmatmul.mubr.bf16.gmra.mxu1 %v7720_v50  ;;  %v7822_v49 = vld [vmem:[%s9001_s5 + $0x1e8] ss:$24 sps:$4 sm:$0xff]  }
 0x398   : > { %4645 = vmatprep.mubr.bf16.mxu0 %v7723_v51  ;;  %4741 = vmatprep.mubr.bf16.mxu1 %v7725_v52  ;;  %v7823_v50 = vld [vmem:[%s9001_s5 + $0x1f0] ss:$24 sps:$4 sm:$0xff]   ;;  %v7824_v51 = vld [vmem:[%s9001_s5 + $0x21c] ss:$24 sps:$4 sm:$0xff]  }
 0x399   : > { %4803 = vmatpush2.bf16.msra.mxu1 %v7748_v53  ;;  %5028 = vmatpush2.bf16.msra.mxu0 %v7753_v54  ;;  %v7826_v52 = vld [vmem:[%s9001_s5 + $0x224] ss:$24 sps:$4 sm:$0xff]   ;;  %v7828_v53 = vld [vmem:[%s9001_s5 + $0x218] ss:$24 sps:$4 sm:$0xff]  }
 0x39a   : > { %4804 = vmatprep.subr.bf16.mxu1 %v8245_v38  ;;  %5029 = vmatprep.subr.bf16.mxu0 %v8245_v38  ;;  %v7745_v38 = vld [vmem:[%s9001_s5 + $0x1e0] ss:$24 sps:$4 sm:$0xff]  }
 0x39b   : > { %v7829_v54 = vld [vmem:[%s9001_s5 + $0x220] ss:$24 sps:$4 sm:$0xff]  }
 0x39d   : > { %4805 = vmatpush2.bf16.msra.mxu1 %v7756_v55  ;;  %5030 = vmatpush2.bf16.msra.mxu0 %v7757_v56  ;;  %v7830_v55 = vld [vmem:[%s9001_s5 + $0x24c] ss:$24 sps:$4 sm:$0xff]  }
 0x39e   : > { %v7832_v56 = vld [vmem:[%s9001_s5 + $0x254] ss:$24 sps:$4 sm:$0xff]  }
 0x39f   : > { %4646 = vmatmul.mubr.bf16.gmra.mxu0 %v7728_v57  ;;  %4742 = vmatmul.mubr.bf16.gmra.mxu1 %v7729_v58  ;;  %v7834_v57 = vld [vmem:[%s9001_s5 + $0x248] ss:$24 sps:$4 sm:$0xff]  }
 0x3a0   : > { %4653 = vmatprep.mubr.bf16.mxu0 %v7732_v59  ;;  %4749 = vmatprep.mubr.bf16.mxu1 %v7734_v60  ;;  %v7835_v58 = vld [vmem:[%s9001_s5 + $0x250] ss:$24 sps:$4 sm:$0xff]   ;;  %v7836_v59 = vld [vmem:[%s9001_s5 + $0x27c] ss:$24 sps:$4 sm:$0xff]  }
 0x3a1   : > { %v7838_v60 = vld [vmem:[%s9001_s5 + $0x284] ss:$24 sps:$4 sm:$0xff]  }
 0x3a7   : > { %4654 = vmatmul.mubr.bf16.gmra.mxu0 %v7736_v61  ;;  %4750 = vmatmul.mubr.bf16.gmra.mxu1 %v7737_v62 }
 0x3a8   : > { %4661 = vmatprep.mubr.bf16.mxu0 %v7740_v63  ;;  %4757 = vmatprep.mubr.bf16.mxu1 %v7742_v0 }
 0x3af   : > { %4662 = vmatmul.mubr.bf16.gmra.mxu0 %v7745_v38  ;;  %4758 = vmatmul.mubr.bf16.gmra.mxu1 %v7746_v1 }
 0x3b0   : > { %4669 = vmatprep.mubr.bf16.mxu0 %v7749_v2  ;;  %4765 = vmatprep.mubr.bf16.mxu1 %v7751_v3  ;;  %v7840_v2 = vld [vmem:[%s9001_s5 + $0x278] ss:$24 sps:$4 sm:$0xff]  }
 0x3b1   : > { %v7841_v3 = vld [vmem:[%s9001_s5 + $0x280] ss:$24 sps:$4 sm:$0xff]  }
 0x3b7   : > { %4670 = vmatmul.mubr.bf16.gmra.mxu0 %v7754_v4  ;;  %4766 = vmatmul.mubr.bf16.gmra.mxu1 %v7755_v5  ;;  %v7842_v4 = vld [vmem:[%s9001_s5 + $0x2ac] ss:$24 sps:$4 sm:$0xff]  }
 0x3b8   : > { %4806 = vmatprep.mubr.bf16.mxu1 %v7760_v6  ;;  %5031 = vmatprep.mubr.bf16.mxu0 %v7763_v7  ;;  %v7844_v5 = vld [vmem:[%s9001_s5 + $0x2b4] ss:$24 sps:$4 sm:$0xff]  }
 0x3bf   : > { %4807 = vmatmul.mubr.bf16.vlgmr.msra.gmra.mxu1 %v7758_v8  ;;  %5032 = vmatmul.mubr.bf16.vlgmr.msra.gmra.mxu0 %v7761_v9 }
 0x3c0   : > { %4814 = vmatprep.mubr.bf16.mxu1 %v7764_v10  ;;  %5039 = vmatprep.mubr.bf16.mxu0 %v7766_v11 }
 0x3c7   : > { %4815 = vmatmul.mubr.bf16.gmra.mxu1 %v7768_v12  ;;  %5040 = vmatmul.mubr.bf16.gmra.mxu0 %v7769_v13 }
 0x3c8   : > { %4822 = vmatprep.mubr.bf16.mxu1 %v7770_v14  ;;  %5047 = vmatprep.mubr.bf16.mxu0 %v7772_v15  ;;  %v7846_v14 = vld [vmem:[%s9001_s5 + $0x2a8] ss:$24 sps:$4 sm:$0xff]  }
 0x3c9   : > { %v7847_v15 = vld [vmem:[%s9001_s5 + $0x2b0] ss:$24 sps:$4 sm:$0xff]  }
 0x3cf   : > { %4823 = vmatmul.mubr.bf16.gmra.mxu1 %v7774_v16  ;;  %5048 = vmatmul.mubr.bf16.gmra.mxu0 %v7775_v17  ;;  %v7848_v16 = vld [vmem:[%s9001_s5 + $0x2dc] ss:$24 sps:$4 sm:$0xff]  }
 0x3d0   : > { %4830 = vmatprep.mubr.bf16.mxu1 %v7776_v18  ;;  %5055 = vmatprep.mubr.bf16.mxu0 %v7778_v19  ;;  %v7850_v17 = vld [vmem:[%s9001_s5 + $0x2e4] ss:$24 sps:$4 sm:$0xff]  }
 0x3d7   : > { %4831 = vmatmul.mubr.bf16.gmra.mxu1 %v7780_v20  ;;  %5056 = vmatmul.mubr.bf16.gmra.mxu0 %v7781_v21 }
 0x3d8   : > { %4838 = vmatprep.mubr.bf16.mxu1 %v7782_v22  ;;  %5063 = vmatprep.mubr.bf16.mxu0 %v7784_v23 }
 0x3df   : > { %4839 = vmatmul.mubr.bf16.gmra.mxu1 %v7786_v24  ;;  %5064 = vmatmul.mubr.bf16.gmra.mxu0 %v7787_v25 }
 0x3e0   : > { %4846 = vmatprep.mubr.bf16.mxu1 %v7788_v26  ;;  %5071 = vmatprep.mubr.bf16.mxu0 %v7790_v27  ;;  %v7852_v26 = vld [vmem:[%s9001_s5 + $0x2d8] ss:$24 sps:$4 sm:$0xff]  }
 0x3e1   : > { %v7853_v27 = vld [vmem:[%s9001_s5 + $0x2e0] ss:$24 sps:$4 sm:$0xff]  }
 0x3e7   : > { %4847 = vmatmul.mubr.bf16.gmra.mxu1 %v7792_v28  ;;  %5072 = vmatmul.mubr.bf16.gmra.mxu0 %v7793_v29  ;;  %v7856_v28 = vld [vmem:[%s9001_s5 + $0x30c] ss:$24 sps:$4 sm:$0xff]  }
 0x3e8   : > { %4854 = vmatprep.mubr.bf16.mxu1 %v7794_v30  ;;  %5079 = vmatprep.mubr.bf16.mxu0 %v7796_v31  ;;  %v7859_v29 = vld [vmem:[%s9001_s5 + $0x314] ss:$24 sps:$4 sm:$0xff]  }
 0x3ef   : > { %4855 = vmatmul.mubr.bf16.gmra.mxu1 %v7798_v32  ;;  %5080 = vmatmul.mubr.bf16.gmra.mxu0 %v7799_v33 }
 0x3f0   : > { %4862 = vmatprep.mubr.bf16.mxu1 %v7800_v34  ;;  %5087 = vmatprep.mubr.bf16.mxu0 %v7802_v35 }
 0x3f7   : > { %4863 = vmatmul.mubr.bf16.gmra.mxu1 %v7804_v36  ;;  %5088 = vmatmul.mubr.bf16.gmra.mxu0 %v7805_v37 }
 0x3f8   : > { %4870 = vmatprep.mubr.bf16.mxu1 %v7806_v39  ;;  %5095 = vmatprep.mubr.bf16.mxu0 %v7808_v40  ;;  %v7854_v39 = vld [vmem:[%s9001_s5 + $0x308] ss:$24 sps:$4 sm:$0xff]  }
 0x3f9   : > { %v7857_v40 = vld [vmem:[%s9001_s5 + $0x310] ss:$24 sps:$4 sm:$0xff]  }
 0x3ff   : > { %4871 = vmatmul.mubr.bf16.gmra.mxu1 %v7810_v41  ;;  %5096 = vmatmul.mubr.bf16.gmra.mxu0 %v7811_v42  ;;  %v7862_v41 = vld [vmem:[%s9001_s5 + $0x33c] ss:$24 sps:$4 sm:$0xff]  }
 0x400   : > { %4878 = vmatprep.mubr.bf16.mxu1 %v7812_v43  ;;  %5103 = vmatprep.mubr.bf16.mxu0 %v7814_v44  ;;  %v7865_v42 = vld [vmem:[%s9001_s5 + $0x344] ss:$24 sps:$4 sm:$0xff]  }
 0x407   : > { %4879 = vmatmul.mubr.bf16.gmra.mxu1 %v7816_v45  ;;  %5104 = vmatmul.mubr.bf16.gmra.mxu0 %v7817_v46 }
 0x408   : > { %4886 = vmatprep.mubr.bf16.mxu1 %v7818_v47  ;;  %5111 = vmatprep.mubr.bf16.mxu0 %v7820_v48 }
 0x40f   : > { %4887 = vmatmul.mubr.bf16.gmra.mxu1 %v7822_v49  ;;  %5112 = vmatmul.mubr.bf16.gmra.mxu0 %v7823_v50 }
 0x410   : > { %4894 = vmatprep.mubr.bf16.mxu1 %v7824_v51  ;;  %5119 = vmatprep.mubr.bf16.mxu0 %v7826_v52  ;;  %v7860_v51 = vld [vmem:[%s9001_s5 + $0x338] ss:$24 sps:$4 sm:$0xff]  }
 0x411   : > { %v7863_v52 = vld [vmem:[%s9001_s5 + $0x340] ss:$24 sps:$4 sm:$0xff]  }
 0x417   : > { %4895 = vmatmul.mubr.bf16.gmra.mxu1 %v7828_v53  ;;  %5120 = vmatmul.mubr.bf16.gmra.mxu0 %v7829_v54  ;;  %v7868_v53 = vld [vmem:[%s9001_s5 + $0x36c] ss:$24 sps:$4 sm:$0xff]  }
 0x418   : > { %4902 = vmatprep.mubr.bf16.mxu1 %v7830_v55  ;;  %5127 = vmatprep.mubr.bf16.mxu0 %v7832_v56  ;;  %v7871_v54 = vld [vmem:[%s9001_s5 + $0x374] ss:$24 sps:$4 sm:$0xff]  }
 0x41f   : > { %v9159_v61 = vpop.f32.mrf.mxu0  ;;  %v9161_v62 = vpop.f32.mrf.mxu1  ;;  %4903 = vmatmul.mubr.bf16.gmra.mxu1 %v7834_v57  ;;  %5128 = vmatmul.mubr.bf16.gmra.mxu0 %v7835_v58 }
 0x420   : > { %4910 = vmatprep.mubr.bf16.mxu1 %v7836_v59  ;;  %5135 = vmatprep.mubr.bf16.mxu0 %v7838_v60 }
 0x421   : > { %v4585_v63 = vpop.f32.mrf.mxu0  ;;  %v4681_v0 = vpop.f32.mrf.mxu1 }
 0x423   : > { %v9163_v38 = vpop.f32.mrf.mxu0  ;;  %v9165_v1 = vpop.f32.mrf.mxu1 }
 0x425   : > { %v4588_v6 = vpop.f32.mrf.mxu0  ;;  %v4684_v7 = vpop.f32.mrf.mxu1 }
 0x427   : > { %v9171_v8 = vpop.f32.mrf.mxu0  ;;  %v9173_v9 = vpop.f32.mrf.mxu1  ;;  %4911 = vmatmul.mubr.bf16.gmra.mxu1 %v7840_v2  ;;  %5136 = vmatmul.mubr.bf16.gmra.mxu0 %v7841_v3  ;;  %v7866_v2 = vld [vmem:[%s9001_s5 + $0x368] ss:$24 sps:$4 sm:$0xff]  }
 0x428   : > { %4918 = vmatprep.mubr.bf16.mxu1 %v7842_v4  ;;  %5143 = vmatprep.mubr.bf16.mxu0 %v7844_v5  ;;  %v7869_v3 = vld [vmem:[%s9001_s5 + $0x370] ss:$24 sps:$4 sm:$0xff]   ;;  %v7874_v4 = vld [vmem:[%s9001_s5 + $0x39c] ss:$24 sps:$4 sm:$0xff]  }
 0x429   : > { %v4593_v10 = vpop.f32.mrf.mxu0  ;;  %v4689_v11 = vpop.f32.mrf.mxu1  ;;  %v7877_v5 = vld [vmem:[%s9001_s5 + $0x3a4] ss:$24 sps:$4 sm:$0xff]  }
 0x42b   : > { %v9175_v12 = vpop.f32.mrf.mxu0  ;;  %v9177_v13 = vpop.f32.mrf.mxu1 }
 0x42d   : > { %v4596_v18 = vpop.f32.mrf.mxu0  ;;  %v4692_v19 = vpop.f32.mrf.mxu1 }
 0x42e   : > { %v7872_v18 = vld [vmem:[%s9001_s5 + $0x398] ss:$24 sps:$4 sm:$0xff]  }
 0x42f   : > { %v9183_v20 = vpop.f32.mrf.mxu0  ;;  %v9185_v21 = vpop.f32.mrf.mxu1  ;;  %4919 = vmatmul.mubr.bf16.gmra.mxu1 %v7846_v14  ;;  %5144 = vmatmul.mubr.bf16.gmra.mxu0 %v7847_v15  ;;  %v7875_v19 = vld [vmem:[%s9001_s5 + $0x3a0] ss:$24 sps:$4 sm:$0xff]  }
 0x430   : > { %4926 = vmatprep.mubr.bf16.mxu1 %v7848_v16  ;;  %5151 = vmatprep.mubr.bf16.mxu0 %v7850_v17 }
 0x431   : > { %v4601_v22 = vpop.f32.mrf.mxu0  ;;  %v4697_v23 = vpop.f32.mrf.mxu1 }
 0x432   : > { %v7880_v22 = vld [vmem:[%s9001_s5 + $0x3cc] ss:$24 sps:$4 sm:$0xff]  }
 0x433   : > { %v9187_v24 = vpop.f32.mrf.mxu0  ;;  %v9189_v25 = vpop.f32.mrf.mxu1  ;;  %v7883_v23 = vld [vmem:[%s9001_s5 + $0x3d4] ss:$24 sps:$4 sm:$0xff]  }
 0x435   : > { %v4604_v30 = vpop.f32.mrf.mxu0  ;;  %v4700_v31 = vpop.f32.mrf.mxu1 }
 0x437   : > { %v9195_v32 = vpop.f32.mrf.mxu0  ;;  %v9197_v33 = vpop.f32.mrf.mxu1  ;;  %4927 = vmatmul.mubr.bf16.gmra.mxu1 %v7852_v26  ;;  %5152 = vmatmul.mubr.bf16.gmra.mxu0 %v7853_v27 }
 0x438   : > { %4934 = vmatprep.mubr.bf16.mxu1 %v7856_v28  ;;  %5159 = vmatprep.mubr.bf16.mxu0 %v7859_v29 }
 0x439   : > { %v4609_v34 = vpop.f32.mrf.mxu0  ;;  %v4705_v35 = vpop.f32.mrf.mxu1 }
 0x43b   : > { %v9199_v36 = vpop.f32.mrf.mxu0  ;;  %v9201_v37 = vpop.f32.mrf.mxu1 }
 0x43d   : > { %v4612_v43 = vpop.f32.mrf.mxu0  ;;  %v4708_v44 = vpop.f32.mrf.mxu1 }
 0x43f   : > { %v9207_v45 = vpop.f32.mrf.mxu0  ;;  %v9209_v46 = vpop.f32.mrf.mxu1  ;;  %4935 = vmatmul.mubr.bf16.gmra.mxu1 %v7854_v39  ;;  %5160 = vmatmul.mubr.bf16.gmra.mxu0 %v7857_v40  ;;  %v7878_v39 = vld [vmem:[%s9001_s5 + $0x3c8] ss:$24 sps:$4 sm:$0xff]  }
 0x440   : > { %4942 = vmatprep.mubr.bf16.mxu1 %v7862_v41  ;;  %5167 = vmatprep.mubr.bf16.mxu0 %v7865_v42  ;;  %v7881_v40 = vld [vmem:[%s9001_s5 + $0x3d0] ss:$24 sps:$4 sm:$0xff]   ;;  %v7886_v41 = vld [vmem:[%s9001_s5 + $0x3fc] ss:$24 sps:$4 sm:$0xff]  }
 0x441   : > { %v4617_v47 = vpop.f32.mrf.mxu0  ;;  %v4713_v48 = vpop.f32.mrf.mxu1  ;;  %v7889_v42 = vld [vmem:[%s9001_s5 + $0x404] ss:$24 sps:$4 sm:$0xff]  }
 0x443   : > { %v9211_v49 = vpop.f32.mrf.mxu0  ;;  %v9213_v50 = vpop.f32.mrf.mxu1 }
 0x445   : > { %v4620_v55 = vpop.f32.mrf.mxu0  ;;  %v4716_v56 = vpop.f32.mrf.mxu1 }
 0x446   : > { %v7884_v55 = vld [vmem:[%s9001_s5 + $0x3f8] ss:$24 sps:$4 sm:$0xff]  }
 0x447   : > { %v9219_v57 = vpop.f32.mrf.mxu0  ;;  %v9221_v58 = vpop.f32.mrf.mxu1  ;;  %4943 = vmatmul.mubr.bf16.gmra.mxu1 %v7860_v51  ;;  %5168 = vmatmul.mubr.bf16.gmra.mxu0 %v7863_v52  ;;  %v7887_v56 = vld [vmem:[%s9001_s5 + $0x400] ss:$24 sps:$4 sm:$0xff]  }
 0x448   : > { %4950 = vmatprep.mubr.bf16.mxu1 %v7868_v53  ;;  %5175 = vmatprep.mubr.bf16.mxu0 %v7871_v54 }
 0x449   : > { %v4625_v59 = vpop.f32.mrf.mxu0  ;;  %v4721_v60 = vpop.f32.mrf.mxu1 }
 0x44a   : > { %v7892_v59 = vld [vmem:[%s9001_s5 + $0x42c] ss:$24 sps:$4 sm:$0xff]  }
 0x44b   : > { %v9223_v63 = vpop.f32.mrf.mxu0  ;;  %v9225_v0 = vpop.f32.mrf.mxu1  ;;  %v7895_v60 = vld [vmem:[%s9001_s5 + $0x434] ss:$24 sps:$4 sm:$0xff]  }
 0x44d   : > { %v4628_v6 = vpop.f32.mrf.mxu0  ;;  %v4724_v7 = vpop.f32.mrf.mxu1 }
 0x44f   : > { %v9231_v10 = vpop.f32.mrf.mxu0  ;;  %v9233_v11 = vpop.f32.mrf.mxu1  ;;  %4951 = vmatmul.mubr.bf16.gmra.mxu1 %v7866_v2  ;;  %5176 = vmatmul.mubr.bf16.gmra.mxu0 %v7869_v3 }
 0x450   : > { %4958 = vmatprep.mubr.bf16.mxu1 %v7874_v4  ;;  %5183 = vmatprep.mubr.bf16.mxu0 %v7877_v5 }
 0x451   : > { %v4633_v14 = vpop.f32.mrf.mxu0  ;;  %v4729_v15 = vpop.f32.mrf.mxu1 }
 0x453   : > { %v9235_v16 = vpop.f32.mrf.mxu0  ;;  %v9237_v17 = vpop.f32.mrf.mxu1 }
 0x455   : > { %v4636_v26 = vpop.f32.mrf.mxu0  ;;  %v4732_v27 = vpop.f32.mrf.mxu1 }
 0x457   : > { %v9243_v28 = vpop.f32.mrf.mxu0  ;;  %v9245_v29 = vpop.f32.mrf.mxu1  ;;  %4959 = vmatmul.mubr.bf16.gmra.mxu1 %v7872_v18  ;;  %5184 = vmatmul.mubr.bf16.gmra.mxu0 %v7875_v19  ;;  %v7890_v18 = vld [vmem:[%s9001_s5 + $0x428] ss:$24 sps:$4 sm:$0xff]  }
 0x458   : > { %4966 = vmatprep.mubr.bf16.mxu1 %v7880_v22  ;;  %5191 = vmatprep.mubr.bf16.mxu0 %v7883_v23  ;;  %v7893_v19 = vld [vmem:[%s9001_s5 + $0x430] ss:$24 sps:$4 sm:$0xff]   ;;  %v7898_v22 = vld [vmem:[%s9001_s5 + $0x45c] ss:$24 sps:$4 sm:$0xff]  }
 0x459   : > { %v4641_v30 = vpop.f32.mrf.mxu0  ;;  %v4737_v31 = vpop.f32.mrf.mxu1  ;;  %v7901_v23 = vld [vmem:[%s9001_s5 + $0x464] ss:$24 sps:$4 sm:$0xff]  }
 0x45b   : > { %v9247_v34 = vpop.f32.mrf.mxu0  ;;  %v9249_v35 = vpop.f32.mrf.mxu1 }
 0x45d   : > { %v4644_v43 = vpop.f32.mrf.mxu0  ;;  %v4740_v44 = vpop.f32.mrf.mxu1 }
 0x45e   : > { %v7896_v43 = vld [vmem:[%s9001_s5 + $0x458] ss:$24 sps:$4 sm:$0xff]  }
 0x45f   : > { %v9255_v47 = vpop.f32.mrf.mxu0  ;;  %v9257_v48 = vpop.f32.mrf.mxu1  ;;  %4967 = vmatmul.mubr.bf16.gmra.mxu1 %v7878_v39  ;;  %5192 = vmatmul.mubr.bf16.gmra.mxu0 %v7881_v40  ;;  %v7899_v44 = vld [vmem:[%s9001_s5 + $0x460] ss:$24 sps:$4 sm:$0xff]  }
 0x460   : > { %4974 = vmatprep.mubr.bf16.mxu1 %v7886_v41  ;;  %5199 = vmatprep.mubr.bf16.mxu0 %v7889_v42 }
 0x461   : > { %v4649_v51 = vpop.f32.mrf.mxu0  ;;  %v4745_v52 = vpop.f32.mrf.mxu1 }
 0x463   : > { %v9259_v53 = vpop.f32.mrf.mxu0  ;;  %v9261_v54 = vpop.f32.mrf.mxu1 }
 0x465   : > { %v4652_v2 = vpop.f32.mrf.mxu0  ;;  %v4748_v3 = vpop.f32.mrf.mxu1 }
 0x467   : > { %v9267_v4 = vpop.f32.mrf.mxu0  ;;  %v9269_v5 = vpop.f32.mrf.mxu1  ;;  %4975 = vmatmul.mubr.bf16.gmra.mxu1 %v7884_v55  ;;  %5200 = vmatmul.mubr.bf16.gmra.mxu0 %v7887_v56 }
 0x468   : > { %4982 = vmatprep.mubr.bf16.mxu1 %v7892_v59  ;;  %5207 = vmatprep.mubr.bf16.mxu0 %v7895_v60 }
 0x469   : > { %v4657_v6 = vpop.f32.mrf.mxu0  ;;  %v4753_v7 = vpop.f32.mrf.mxu1 }
 0x46a   : > { %v9298_v6 = vld [vmem:[%s8534_s17] ss:$0 sm:$0xff]  ;;  %s9311_s17 = scalar_lea.vmem [#allocation2], %s6664_s25 }
 0x46b   : > { %v9271_v14 = vpop.f32.mrf.mxu0  ;;  %v9273_v15 = vpop.f32.mrf.mxu1 }
 0x46d   : > { %v4660_v26 = vpop.f32.mrf.mxu0  ;;  %v4756_v27 = vpop.f32.mrf.mxu1 }
 0x46f   : > { %v9279_v30 = vpop.f32.mrf.mxu0  ;;  %v9281_v31 = vpop.f32.mrf.mxu1  ;;  %4983 = vmatmul.mubr.bf16.gmra.mxu1 %v7890_v18  ;;  %5208 = vmatmul.mubr.bf16.gmra.mxu0 %v7893_v19  ;;  %v4584_v19 = vadd.f32 %v9298_v6, %v9159_v61  ;;  %v4592_v61 = vadd.f32 %v9298_v6, %v9171_v8  ;;  %v4595_v8 = vadd.f32 %v9298_v6, %v9175_v12 }
 0x470   : > { %4990 = vmatprep.mubr.bf16.mxu1 %v7898_v22  ;;  %5215 = vmatprep.mubr.bf16.mxu0 %v7901_v23 }
 0x471   : > { %v4665_v39 = vpop.f32.mrf.mxu0  ;;  %v4761_v40 = vpop.f32.mrf.mxu1 }
 0x472   : > { %v4587_v40 = vadd.f32 %v9298_v6, %v9163_v38 }
 0x473   : > { %v9283_v41 = vpop.f32.mrf.mxu0  ;;  %v9285_v42 = vpop.f32.mrf.mxu1 }
 0x475   : > { %v4668_v51 = vpop.f32.mrf.mxu0  ;;  %v4764_v52 = vpop.f32.mrf.mxu1 }
 0x477   : > { %v9289_v55 = vpop.f32.mrf.mxu0  ;;  %v9291_v56 = vpop.f32.mrf.mxu1  ;;  %4991 = vmatmul.mubr.bf16.gmra.mxu1 %v7896_v43  ;;  %5216 = vmatmul.mubr.bf16.gmra.mxu0 %v7899_v44 }
 0x479   : > { %v4673_v59 = vpop.f32.mrf.mxu0  ;;  %v4769_v60 = vpop.f32.mrf.mxu1 }
 0x47b   : > { %v9293_v2 = vpop.f32.mrf.mxu0  ;;  %v9295_v3 = vpop.f32.mrf.mxu1 }
 0x47d   : > { %v4676_v7 = vpop.f32.mrf.mxu0  ;;  %v4772_v18 = vpop.f32.mrf.mxu1 }
 0x47f   : > { %v4808_v22 = vpop.f32.mrf.mxu1  ;;  %v5033_v23 = vpop.f32.mrf.mxu0 }
 0x480   : > { %v4809_v26 = vadd.f32 %v4808_v22, %v4584_v19 }
 0x481   : > { %v4810_v27 = vpop.f32.mrf.mxu1  ;;  %v5035_v39 = vpop.f32.mrf.mxu0 }
 0x482   : > { %v5034_v43 = vadd.f32 %v5033_v23, %v4809_v26 }
 0x483   : > { %v4811_v44 = vpop.f32.mrf.mxu1  ;;  %v5036_v51 = vpop.f32.mrf.mxu0 }
 0x484   : > { %v9305_v52 = vmax.f32 %v5034_v43, 0.0  ;;  %v4812_v59 = vadd.f32 %v4811_v44, %v4587_v40 }
 0x485   : > { %v4813_v60 = vpop.f32.mrf.mxu1  ;;  %v5038_v7 = vpop.f32.mrf.mxu0 }
 0x486   : > { %v6869_v18 = vpack.c.bf16 %v9305_v52, %v9305_v52  ;;  %v5037_v19 = vadd.f32 %v5036_v51, %v4812_v59 }
 0x487   : > { %v4816_v22 = vpop.f32.mrf.mxu1  ;;  %v5041_v27 = vpop.f32.mrf.mxu0 }
 0x488   : > { %5467 = vst.msk [vmem:[%s9311_s17] sm:$0xf] %vm5466_vm5, %v6869_v18  ;;  %v9315_v38 = vmax.f32 %v5037_v19, 0.0  ;;  %v4817_v23 = vadd.f32 %v4816_v22, %v4592_v61  ;;  %v4600_v61 = vadd.f32 %v9298_v6, %v9183_v20 }
 0x489   : > { %v4818_v26 = vpop.f32.mrf.mxu1  ;;  %v5043_v39 = vpop.f32.mrf.mxu0 }
 0x48a   : > { %v6870_v40 = vpack.c.bf16 %v9315_v38, %v9315_v38  ;;  %v5042_v43 = vadd.f32 %v5041_v27, %v4817_v23 }
 0x48b   : > { %v4819_v44 = vpop.f32.mrf.mxu1  ;;  %v5044_v51 = vpop.f32.mrf.mxu0 }
 0x48c   : > { %5468 = vst.msk [vmem:[%s9311_s17 + $0x4] sm:$0xf] %vm5466_vm5, %v6870_v40  ;;  %v9323_v59 = vmax.f32 %v5042_v43, 0.0  ;;  %v4820_v60 = vadd.f32 %v4819_v44, %v4595_v8  ;;  %v4603_v8 = vadd.f32 %v9298_v6, %v9187_v24 }
 0x48d   : > { %v4821_v7 = vpop.f32.mrf.mxu1  ;;  %v5046_v18 = vpop.f32.mrf.mxu0 }
 0x48e   : > { %v6871_v12 = vpack.c.bf16 %v9323_v59, %v9323_v59  ;;  %v5045_v19 = vadd.f32 %v5044_v51, %v4820_v60 }
 0x48f   : > { %v4824_v22 = vpop.f32.mrf.mxu1  ;;  %v5049_v26 = vpop.f32.mrf.mxu0 }
 0x490   : > { %5469 = vst.msk [vmem:[%s9311_s17 + $0x8] sm:$0xf] %vm5466_vm5, %v6871_v12  ;;  %v9331_v27 = vmax.f32 %v5045_v19, 0.0  ;;  %v4825_v23 = vadd.f32 %v4824_v22, %v4600_v61  ;;  %v4608_v61 = vadd.f32 %v9298_v6, %v9195_v32 }
 0x491   : > { %v4826_v39 = vpop.f32.mrf.mxu1  ;;  %v5051_v40 = vpop.f32.mrf.mxu0 }
 0x492   : > { %v6872_v20 = vpack.c.bf16 %v9331_v27, %v9331_v27  ;;  %v5050_v43 = vadd.f32 %v5049_v26, %v4825_v23 }
 0x493   : > { %v4827_v44 = vpop.f32.mrf.mxu1  ;;  %v5052_v7 = vpop.f32.mrf.mxu0 }
 0x494   : > { %5470 = vst.msk [vmem:[%s9311_s17 + $0xc] sm:$0xf] %vm5466_vm5, %v6872_v20  ;;  %v9339_v51 = vmax.f32 %v5050_v43, 0.0  ;;  %v4828_v60 = vadd.f32 %v4827_v44, %v4603_v8  ;;  %v4611_v8 = vadd.f32 %v9298_v6, %v9199_v36 }
 0x495   : > { %v4829_v18 = vpop.f32.mrf.mxu1  ;;  %v5054_v12 = vpop.f32.mrf.mxu0 }
 0x496   : > { %v6873_v24 = vpack.c.bf16 %v9339_v51, %v9339_v51  ;;  %v5053_v19 = vadd.f32 %v5052_v7, %v4828_v60 }
 0x497   : > { %v4832_v22 = vpop.f32.mrf.mxu1  ;;  %v5057_v39 = vpop.f32.mrf.mxu0 }
 0x498   : > { %5471 = vst.msk [vmem:[%s9311_s17 + $0x10] sm:$0xf] %vm5466_vm5, %v6873_v24  ;;  %v9347_v26 = vmax.f32 %v5053_v19, 0.0  ;;  %v4833_v23 = vadd.f32 %v4832_v22, %v4608_v61  ;;  %v4616_v61 = vadd.f32 %v9298_v6, %v9207_v45 }
 0x499   : > { %v4834_v40 = vpop.f32.mrf.mxu1  ;;  %v5059_v20 = vpop.f32.mrf.mxu0 }
 0x49a   : > { %v6874_v32 = vpack.c.bf16 %v9347_v26, %v9347_v26  ;;  %v5058_v43 = vadd.f32 %v5057_v39, %v4833_v23 }
 0x49b   : > { %v4835_v44 = vpop.f32.mrf.mxu1  ;;  %v5060_v18 = vpop.f32.mrf.mxu0 }
 0x49c   : > { %5472 = vst.msk [vmem:[%s9311_s17 + $0x14] sm:$0xf] %vm5466_vm5, %v6874_v32  ;;  %v9355_v7 = vmax.f32 %v5058_v43, 0.0  ;;  %v4836_v60 = vadd.f32 %v4835_v44, %v4611_v8  ;;  %v4619_v8 = vadd.f32 %v9298_v6, %v9211_v49 }
 0x49d   : > { %v4837_v12 = vpop.f32.mrf.mxu1  ;;  %v5062_v24 = vpop.f32.mrf.mxu0 }
 0x49e   : > { %v6875_v36 = vpack.c.bf16 %v9355_v7, %v9355_v7  ;;  %v5061_v19 = vadd.f32 %v5060_v18, %v4836_v60 }
 0x49f   : > { %v4840_v22 = vpop.f32.mrf.mxu1  ;;  %v5065_v40 = vpop.f32.mrf.mxu0 }
 0x4a0   : > { %5473 = vst.msk [vmem:[%s9311_s17 + $0x18] sm:$0xf] %vm5466_vm5, %v6875_v36  ;;  %v9363_v39 = vmax.f32 %v5061_v19, 0.0  ;;  %v4841_v23 = vadd.f32 %v4840_v22, %v4616_v61  ;;  %v4624_v61 = vadd.f32 %v9298_v6, %v9219_v57 }
 0x4a1   : > { %v4842_v20 = vpop.f32.mrf.mxu1  ;;  %v5067_v32 = vpop.f32.mrf.mxu0 }
 0x4a2   : > { %v6876_v45 = vpack.c.bf16 %v9363_v39, %v9363_v39  ;;  %v5066_v43 = vadd.f32 %v5065_v40, %v4841_v23 }
 0x4a3   : > { %v4843_v44 = vpop.f32.mrf.mxu1  ;;  %v5068_v12 = vpop.f32.mrf.mxu0 }
 0x4a4   : > { %5474 = vst.msk [vmem:[%s9311_s17 + $0x1c] sm:$0xf] %vm5466_vm5, %v6876_v45  ;;  %v9371_v18 = vmax.f32 %v5066_v43, 0.0  ;;  %v4844_v60 = vadd.f32 %v4843_v44, %v4619_v8  ;;  %v4627_v8 = vadd.f32 %v9298_v6, %v9223_v63 }
 0x4a5   : > { %v4845_v24 = vpop.f32.mrf.mxu1  ;;  %v5070_v36 = vpop.f32.mrf.mxu0 }
 0x4a6   : > { %v6877_v49 = vpack.c.bf16 %v9371_v18, %v9371_v18  ;;  %v5069_v19 = vadd.f32 %v5068_v12, %v4844_v60 }
 0x4a7   : > { %v4848_v22 = vpop.f32.mrf.mxu1  ;;  %v5073_v20 = vpop.f32.mrf.mxu0 }
 0x4a8   : > { %5475 = vst.msk [vmem:[%s9311_s17 + $0x20] sm:$0xf] %vm5466_vm5, %v6877_v49  ;;  %v9379_v40 = vmax.f32 %v5069_v19, 0.0  ;;  %v4849_v23 = vadd.f32 %v4848_v22, %v4624_v61  ;;  %v4632_v61 = vadd.f32 %v9298_v6, %v9231_v10 }
 0x4a9   : > { %v4850_v32 = vpop.f32.mrf.mxu1  ;;  %v5075_v45 = vpop.f32.mrf.mxu0 }
 0x4aa   : > { %v6878_v57 = vpack.c.bf16 %v9379_v40, %v9379_v40  ;;  %v5074_v43 = vadd.f32 %v5073_v20, %v4849_v23 }
 0x4ab   : > { %v4851_v44 = vpop.f32.mrf.mxu1  ;;  %v5076_v24 = vpop.f32.mrf.mxu0 }
 0x4ac   : > { %5476 = vst.msk [vmem:[%s9311_s17 + $0x24] sm:$0xf] %vm5466_vm5, %v6878_v57  ;;  %v9387_v12 = vmax.f32 %v5074_v43, 0.0  ;;  %v4852_v60 = vadd.f32 %v4851_v44, %v4627_v8  ;;  %v4635_v8 = vadd.f32 %v9298_v6, %v9235_v16 }
 0x4ad   : > { %v4853_v36 = vpop.f32.mrf.mxu1  ;;  %v5078_v49 = vpop.f32.mrf.mxu0 }
 0x4ae   : > { %v6879_v63 = vpack.c.bf16 %v9387_v12, %v9387_v12  ;;  %v5077_v19 = vadd.f32 %v5076_v24, %v4852_v60 }
 0x4af   : > { %v4856_v22 = vpop.f32.mrf.mxu1  ;;  %v5081_v32 = vpop.f32.mrf.mxu0 }
 0x4b0   : > { %5477 = vst.msk [vmem:[%s9311_s17 + $0x28] sm:$0xf] %vm5466_vm5, %v6879_v63  ;;  %v9395_v20 = vmax.f32 %v5077_v19, 0.0  ;;  %v4857_v23 = vadd.f32 %v4856_v22, %v4632_v61  ;;  %v4640_v61 = vadd.f32 %v9298_v6, %v9243_v28 }
 0x4b1   : > { %v4858_v45 = vpop.f32.mrf.mxu1  ;;  %v5083_v57 = vpop.f32.mrf.mxu0 }
 0x4b2   : > { %v6880_v10 = vpack.c.bf16 %v9395_v20, %v9395_v20  ;;  %v5082_v43 = vadd.f32 %v5081_v32, %v4857_v23 }
 0x4b3   : > { %v4859_v44 = vpop.f32.mrf.mxu1  ;;  %v5084_v36 = vpop.f32.mrf.mxu0 }
 0x4b4   : > { %5478 = vst.msk [vmem:[%s9311_s17 + $0x2c] sm:$0xf] %vm5466_vm5, %v6880_v10  ;;  %v9403_v24 = vmax.f32 %v5082_v43, 0.0  ;;  %v4860_v60 = vadd.f32 %v4859_v44, %v4635_v8  ;;  %v4643_v8 = vadd.f32 %v9298_v6, %v9247_v34 }
 0x4b5   : > { %v4861_v49 = vpop.f32.mrf.mxu1  ;;  %v5086_v63 = vpop.f32.mrf.mxu0 }
 0x4b6   : > { %v6881_v16 = vpack.c.bf16 %v9403_v24, %v9403_v24  ;;  %v5085_v19 = vadd.f32 %v5084_v36, %v4860_v60 }
 0x4b7   : > { %v4864_v22 = vpop.f32.mrf.mxu1  ;;  %v5089_v45 = vpop.f32.mrf.mxu0 }
 0x4b8   : > { %5479 = vst.msk [vmem:[%s9311_s17 + $0x30] sm:$0xf] %vm5466_vm5, %v6881_v16  ;;  %v9411_v32 = vmax.f32 %v5085_v19, 0.0  ;;  %v4865_v23 = vadd.f32 %v4864_v22, %v4640_v61  ;;  %v4648_v61 = vadd.f32 %v9298_v6, %v9255_v47 }
 0x4b9   : > { %v4866_v57 = vpop.f32.mrf.mxu1  ;;  %v5091_v10 = vpop.f32.mrf.mxu0 }
 0x4ba   : > { %v6882_v28 = vpack.c.bf16 %v9411_v32, %v9411_v32  ;;  %v5090_v43 = vadd.f32 %v5089_v45, %v4865_v23 }
 0x4bb   : > { %v4867_v44 = vpop.f32.mrf.mxu1  ;;  %v5092_v49 = vpop.f32.mrf.mxu0 }
 0x4bc   : > { %5480 = vst.msk [vmem:[%s9311_s17 + $0x34] sm:$0xf] %vm5466_vm5, %v6882_v28  ;;  %v9419_v36 = vmax.f32 %v5090_v43, 0.0  ;;  %v4868_v60 = vadd.f32 %v4867_v44, %v4643_v8  ;;  %v4651_v28 = vadd.f32 %v9298_v6, %v9259_v53 }
 0x4bd   : > { %v4869_v63 = vpop.f32.mrf.mxu1  ;;  %v5094_v16 = vpop.f32.mrf.mxu0 }
 0x4be   : > { %v6883_v34 = vpack.c.bf16 %v9419_v36, %v9419_v36  ;;  %v5093_v19 = vadd.f32 %v5092_v49, %v4868_v60 }
 0x4bf   : > { %v4872_v22 = vpop.f32.mrf.mxu1  ;;  %v5097_v45 = vpop.f32.mrf.mxu0 }
 0x4c0   : > { %5481 = vst.msk [vmem:[%s9311_s17 + $0x38] sm:$0xf] %vm5466_vm5, %v6883_v34  ;;  %v9427_v23 = vmax.f32 %v5093_v19, 0.0  ;;  %v4873_v57 = vadd.f32 %v4872_v22, %v4648_v61  ;;  %v4656_v34 = vadd.f32 %v9298_v6, %v9267_v4 }
 0x4c1   : > { %v4874_v10 = vpop.f32.mrf.mxu1  ;;  %v5099_v8 = vpop.f32.mrf.mxu0 }
 0x4c2   : > { %v6884_v47 = vpack.c.bf16 %v9427_v23, %v9427_v23  ;;  %v5098_v43 = vadd.f32 %v5097_v45, %v4873_v57 }
 0x4c3   : > { %v4875_v44 = vpop.f32.mrf.mxu1  ;;  %v5100_v49 = vpop.f32.mrf.mxu0 }
 0x4c4   : > { %5482 = vst.msk [vmem:[%s9311_s17 + $0x3c] sm:$0xf] %vm5466_vm5, %v6884_v47  ;;  %v9435_v60 = vmax.f32 %v5098_v43, 0.0  ;;  %v4876_v63 = vadd.f32 %v4875_v44, %v4651_v28  ;;  %v4659_v47 = vadd.f32 %v9298_v6, %v9271_v14 }
 0x4c5   : > { %v4877_v16 = vpop.f32.mrf.mxu1  ;;  %v5102_v61 = vpop.f32.mrf.mxu0 }
 0x4c6   : > { %v6885_v53 = vpack.c.bf16 %v9435_v60, %v9435_v60  ;;  %v5101_v19 = vadd.f32 %v5100_v49, %v4876_v63 }
 0x4c7   : > { %v4880_v22 = vpop.f32.mrf.mxu1  ;;  %v5105_v45 = vpop.f32.mrf.mxu0 }
 0x4c8   : > { %5483 = vst.msk [vmem:[%s9311_s17 + $0x40] sm:$0xf] %vm5466_vm5, %v6885_v53  ;;  %v9444_v57 = vmax.f32 %v5101_v19, 0.0  ;;  %v4881_v10 = vadd.f32 %v4880_v22, %v4656_v34  ;;  %v4664_v34 = vadd.f32 %v9298_v6, %v9279_v30 }
 0x4c9   : > { %v4882_v8 = vpop.f32.mrf.mxu1  ;;  %v5107_v28 = vpop.f32.mrf.mxu0 }
 0x4ca   : > { %v6886_v4 = vpack.c.bf16 %v9444_v57, %v9444_v57  ;;  %v5106_v43 = vadd.f32 %v5105_v45, %v4881_v10 }
 0x4cb   : > { %v4883_v44 = vpop.f32.mrf.mxu1  ;;  %v5108_v16 = vpop.f32.mrf.mxu0 }
 0x4cc   : > { %5484 = vst.msk [vmem:[%s9311_s17 + $0x44] sm:$0xf] %vm5466_vm5, %v6886_v4  ;;  %v9452_v49 = vmax.f32 %v5106_v43, 0.0  ;;  %v4884_v63 = vadd.f32 %v4883_v44, %v4659_v47  ;;  %v4667_v47 = vadd.f32 %v9298_v6, %v9283_v41 }
 0x4cd   : > { %v4885_v61 = vpop.f32.mrf.mxu1  ;;  %v5110_v53 = vpop.f32.mrf.mxu0 }
 0x4ce   : > { %v6887_v14 = vpack.c.bf16 %v9452_v49, %v9452_v49  ;;  %v5109_v19 = vadd.f32 %v5108_v16, %v4884_v63 }
 0x4cf   : > { %v4888_v22 = vpop.f32.mrf.mxu1  ;;  %v5113_v8 = vpop.f32.mrf.mxu0 }
 0x4d0   : > { %5485 = vst.msk [vmem:[%s9311_s17 + $0x48] sm:$0xf] %vm5466_vm5, %v6887_v14  ;;  %v9460_v45 = vmax.f32 %v5109_v19, 0.0  ;;  %v4889_v10 = vadd.f32 %v4888_v22, %v4664_v34  ;;  %v4672_v34 = vadd.f32 %v9298_v6, %v9289_v55 }
 0x4d1   : > { %v4890_v28 = vpop.f32.mrf.mxu1  ;;  %v5115_v4 = vpop.f32.mrf.mxu0 }
 0x4d2   : > { %v6888_v30 = vpack.c.bf16 %v9460_v45, %v9460_v45  ;;  %v5114_v43 = vadd.f32 %v5113_v8, %v4889_v10 }
 0x4d3   : > { %v4891_v44 = vpop.f32.mrf.mxu1  ;;  %v5116_v61 = vpop.f32.mrf.mxu0 }
 0x4d4   : > { %5486 = vst.msk [vmem:[%s9311_s17 + $0x4c] sm:$0xf] %vm5466_vm5, %v6888_v30  ;;  %v9468_v16 = vmax.f32 %v5114_v43, 0.0  ;;  %v4892_v63 = vadd.f32 %v4891_v44, %v4667_v47  ;;  %v4675_v47 = vadd.f32 %v9298_v6, %v9293_v2 }
 0x4d5   : > { %v4893_v53 = vpop.f32.mrf.mxu1  ;;  %v5118_v14 = vpop.f32.mrf.mxu0 }
 0x4d6   : > { %v6889_v41 = vpack.c.bf16 %v9468_v16, %v9468_v16  ;;  %v5117_v19 = vadd.f32 %v5116_v61, %v4892_v63 }
 0x4d7   : > { %v4896_v22 = vpop.f32.mrf.mxu1  ;;  %v5121_v28 = vpop.f32.mrf.mxu0 }
 0x4d8   : > { %5487 = vst.msk [vmem:[%s9311_s17 + $0x50] sm:$0xf] %vm5466_vm5, %v6889_v41  ;;  %v9476_v8 = vmax.f32 %v5117_v19, 0.0  ;;  %v4897_v10 = vadd.f32 %v4896_v22, %v4672_v34  ;;  %v4680_v34 = vadd.f32 %v9298_v6, %v9161_v62 }
 0x4d9   : > { %v4898_v4 = vpop.f32.mrf.mxu1  ;;  %v5123_v30 = vpop.f32.mrf.mxu0 }
 0x4da   : > { %v6890_v55 = vpack.c.bf16 %v9476_v8, %v9476_v8  ;;  %v5122_v43 = vadd.f32 %v5121_v28, %v4897_v10 }
 0x4db   : > { %v4899_v44 = vpop.f32.mrf.mxu1  ;;  %v5124_v53 = vpop.f32.mrf.mxu0 }
 0x4dc   : > { %5488 = vst.msk [vmem:[%s9311_s17 + $0x54] sm:$0xf] %vm5466_vm5, %v6890_v55  ;;  %v9484_v61 = vmax.f32 %v5122_v43, 0.0  ;;  %v4900_v63 = vadd.f32 %v4899_v44, %v4675_v47  ;;  %v4683_v47 = vadd.f32 %v9298_v6, %v9165_v1 }
 0x4dd   : > { %v4901_v14 = vpop.f32.mrf.mxu1  ;;  %v5126_v41 = vpop.f32.mrf.mxu0 }
 0x4de   : > { %v6891_v2 = vpack.c.bf16 %v9484_v61, %v9484_v61  ;;  %v5125_v19 = vadd.f32 %v5124_v53, %v4900_v63 }
 0x4df   : > { %v4904_v22 = vpop.f32.mrf.mxu1  ;;  %v5129_v4 = vpop.f32.mrf.mxu0 }
 0x4e0   : > { %5489 = vst.msk [vmem:[%s9311_s17 + $0x58] sm:$0xf] %vm5466_vm5, %v6891_v2  ;;  %v9492_v28 = vmax.f32 %v5125_v19, 0.0  ;;  %v4905_v10 = vadd.f32 %v4904_v22, %v4680_v34  ;;  %v4688_v34 = vadd.f32 %v9298_v6, %v9173_v9 }
 0x4e1   : > { %v4906_v30 = vpop.f32.mrf.mxu1  ;;  %v5131_v55 = vpop.f32.mrf.mxu0 }
 0x4e2   : > { %v6892_v62 = vpack.c.bf16 %v9492_v28, %v9492_v28  ;;  %v5130_v43 = vadd.f32 %v5129_v4, %v4905_v10 }
 0x4e3   : > { %v4907_v44 = vpop.f32.mrf.mxu1  ;;  %v5132_v14 = vpop.f32.mrf.mxu0 }
 0x4e4   : > { %5490 = vst.msk [vmem:[%s9311_s17 + $0x5c] sm:$0xf] %vm5466_vm5, %v6892_v62  ;;  %v9500_v53 = vmax.f32 %v5130_v43, 0.0  ;;  %v4908_v63 = vadd.f32 %v4907_v44, %v4683_v47  ;;  %v4691_v47 = vadd.f32 %v9298_v6, %v9177_v13 }
 0x4e5   : > { %v4909_v41 = vpop.f32.mrf.mxu1  ;;  %v5134_v2 = vpop.f32.mrf.mxu0 }
 0x4e6   : > { %v6893_v1 = vpack.c.bf16 %v9500_v53, %v9500_v53  ;;  %v5133_v19 = vadd.f32 %v5132_v14, %v4908_v63 }
 0x4e7   : > { %v4912_v22 = vpop.f32.mrf.mxu1  ;;  %v5137_v30 = vpop.f32.mrf.mxu0 }
 0x4e8   : > { %5491 = vst.msk [vmem:[%s9311_s17 + $0x60] sm:$0xf] %vm5466_vm5, %v6893_v1  ;;  %v9508_v4 = vmax.f32 %v5133_v19, 0.0  ;;  %v4913_v10 = vadd.f32 %v4912_v22, %v4688_v34  ;;  %v4696_v34 = vadd.f32 %v9298_v6, %v9185_v21 }
 0x4e9   : > { %v4914_v55 = vpop.f32.mrf.mxu1  ;;  %v5139_v62 = vpop.f32.mrf.mxu0 }
 0x4ea   : > { %v6894_v9 = vpack.c.bf16 %v9508_v4, %v9508_v4  ;;  %v5138_v43 = vadd.f32 %v5137_v30, %v4913_v10 }
 0x4eb   : > { %v4915_v44 = vpop.f32.mrf.mxu1  ;;  %v5140_v41 = vpop.f32.mrf.mxu0 }
 0x4ec   : > { %5492 = vst.msk [vmem:[%s9311_s17 + $0x64] sm:$0xf] %vm5466_vm5, %v6894_v9  ;;  %v9516_v14 = vmax.f32 %v5138_v43, 0.0  ;;  %v4916_v63 = vadd.f32 %v4915_v44, %v4691_v47  ;;  %v4699_v47 = vadd.f32 %v9298_v6, %v9189_v25 }
 0x4ed   : > { %v4917_v2 = vpop.f32.mrf.mxu1  ;;  %v5142_v1 = vpop.f32.mrf.mxu0 }
 0x4ee   : > { %v6895_v13 = vpack.c.bf16 %v9516_v14, %v9516_v14  ;;  %v5141_v19 = vadd.f32 %v5140_v41, %v4916_v63 }
 0x4ef   : > { %v4920_v22 = vpop.f32.mrf.mxu1  ;;  %v5145_v55 = vpop.f32.mrf.mxu0 }
 0x4f0   : > { %5493 = vst.msk [vmem:[%s9311_s17 + $0x68] sm:$0xf] %vm5466_vm5, %v6895_v13  ;;  %v9524_v30 = vmax.f32 %v5141_v19, 0.0  ;;  %v4921_v10 = vadd.f32 %v4920_v22, %v4696_v34  ;;  %v4704_v34 = vadd.f32 %v9298_v6, %v9197_v33 }
 0x4f1   : > { %v4922_v62 = vpop.f32.mrf.mxu1  ;;  %v5147_v9 = vpop.f32.mrf.mxu0 }
 0x4f2   : > { %v6896_v21 = vpack.c.bf16 %v9524_v30, %v9524_v30  ;;  %v5146_v43 = vadd.f32 %v5145_v55, %v4921_v10 }
 0x4f3   : > { %v4923_v44 = vpop.f32.mrf.mxu1  ;;  %v5148_v2 = vpop.f32.mrf.mxu0 }
 0x4f4   : > { %5494 = vst.msk [vmem:[%s9311_s17 + $0x6c] sm:$0xf] %vm5466_vm5, %v6896_v21  ;;  %v9532_v41 = vmax.f32 %v5146_v43, 0.0  ;;  %v4924_v63 = vadd.f32 %v4923_v44, %v4699_v47  ;;  %v4707_v47 = vadd.f32 %v9298_v6, %v9201_v37 }
 0x4f5   : > { %v4925_v1 = vpop.f32.mrf.mxu1  ;;  %v5150_v13 = vpop.f32.mrf.mxu0 }
 0x4f6   : > { %v6897_v25 = vpack.c.bf16 %v9532_v41, %v9532_v41  ;;  %v5149_v19 = vadd.f32 %v5148_v2, %v4924_v63 }
 0x4f7   : > { %v4928_v22 = vpop.f32.mrf.mxu1  ;;  %v5153_v62 = vpop.f32.mrf.mxu0 }
 0x4f8   : > { %5495 = vst.msk [vmem:[%s9311_s17 + $0x70] sm:$0xf] %vm5466_vm5, %v6897_v25  ;;  %v9540_v55 = vmax.f32 %v5149_v19, 0.0  ;;  %v4929_v10 = vadd.f32 %v4928_v22, %v4704_v34  ;;  %v4712_v34 = vadd.f32 %v9298_v6, %v9209_v46 }
 0x4f9   : > { %v4930_v9 = vpop.f32.mrf.mxu1  ;;  %v5155_v21 = vpop.f32.mrf.mxu0 }
 0x4fa   : > { %v6898_v33 = vpack.c.bf16 %v9540_v55, %v9540_v55  ;;  %v5154_v43 = vadd.f32 %v5153_v62, %v4929_v10 }
 0x4fb   : > { %v4931_v44 = vpop.f32.mrf.mxu1  ;;  %v5156_v1 = vpop.f32.mrf.mxu0 }
 0x4fc   : > { %5496 = vst.msk [vmem:[%s9311_s17 + $0x74] sm:$0xf] %vm5466_vm5, %v6898_v33  ;;  %v9548_v2 = vmax.f32 %v5154_v43, 0.0  ;;  %v4932_v63 = vadd.f32 %v4931_v44, %v4707_v47  ;;  %v4715_v47 = vadd.f32 %v9298_v6, %v9213_v50 }
 0x4fd   : > { %v4933_v13 = vpop.f32.mrf.mxu1  ;;  %v5158_v25 = vpop.f32.mrf.mxu0 }
 0x4fe   : > { %v6899_v37 = vpack.c.bf16 %v9548_v2, %v9548_v2  ;;  %v5157_v19 = vadd.f32 %v5156_v1, %v4932_v63 }
 0x4ff   : > { %v4936_v22 = vpop.f32.mrf.mxu1  ;;  %v5161_v9 = vpop.f32.mrf.mxu0 }
 0x500   : > { %5497 = vst.msk [vmem:[%s9311_s17 + $0x78] sm:$0xf] %vm5466_vm5, %v6899_v37  ;;  %v9556_v62 = vmax.f32 %v5157_v19, 0.0  ;;  %v4937_v10 = vadd.f32 %v4936_v22, %v4712_v34  ;;  %v4720_v34 = vadd.f32 %v9298_v6, %v9221_v58 }
 0x501   : > { %v4938_v21 = vpop.f32.mrf.mxu1  ;;  %v5163_v33 = vpop.f32.mrf.mxu0 }
 0x502   : > { %v6900_v46 = vpack.c.bf16 %v9556_v62, %v9556_v62  ;;  %v5162_v43 = vadd.f32 %v5161_v9, %v4937_v10 }
 0x503   : > { %v4939_v44 = vpop.f32.mrf.mxu1  ;;  %v5164_v13 = vpop.f32.mrf.mxu0 }
 0x504   : > { %5498 = vst.msk [vmem:[%s9311_s17 + $0x7c] sm:$0xf] %vm5466_vm5, %v6900_v46  ;;  %v9564_v1 = vmax.f32 %v5162_v43, 0.0  ;;  %v4940_v63 = vadd.f32 %v4939_v44, %v4715_v47  ;;  %v4723_v47 = vadd.f32 %v9298_v6, %v9225_v0 }
 0x505   : > { %v4941_v25 = vpop.f32.mrf.mxu1  ;;  %v5166_v37 = vpop.f32.mrf.mxu0 }
 0x506   : > { %9857 = vst [vmem:[#allocation30_spill] sm:$0xff] %v9564_v1  ;;  %v6901_v50 = vpack.c.bf16 %v9564_v1, %v9564_v1  ;;  %v5165_v19 = vadd.f32 %v5164_v13, %v4940_v63 }
 0x507   : > { %v4944_v22 = vpop.f32.mrf.mxu1  ;;  %v5169_v21 = vpop.f32.mrf.mxu0 }
 0x508   : > { %5499 = vst.msk [vmem:[%s9311_s17 + $0x80] sm:$0xf] %vm5466_vm5, %v6901_v50  ;;  %v9572_v9 = vmax.f32 %v5165_v19, 0.0  ;;  %v4945_v10 = vadd.f32 %v4944_v22, %v4720_v34  ;;  %v4728_v34 = vadd.f32 %v9298_v6, %v9233_v11 }
 0x509   : > { %v4946_v33 = vpop.f32.mrf.mxu1  ;;  %v5171_v46 = vpop.f32.mrf.mxu0 }
 0x50a   : > { %v6902_v58 = vpack.c.bf16 %v9572_v9, %v9572_v9  ;;  %v5170_v43 = vadd.f32 %v5169_v21, %v4945_v10 }
 0x50b   : > { %v4947_v44 = vpop.f32.mrf.mxu1  ;;  %v5172_v25 = vpop.f32.mrf.mxu0 }
 0x50c   : > { %5500 = vst.msk [vmem:[%s9311_s17 + $0x84] sm:$0xf] %vm5466_vm5, %v6902_v58  ;;  %v9580_v13 = vmax.f32 %v5170_v43, 0.0  ;;  %v4948_v63 = vadd.f32 %v4947_v44, %v4723_v47  ;;  %v4731_v47 = vadd.f32 %v9298_v6, %v9237_v17 }
 0x50d   : > { %v4949_v37 = vpop.f32.mrf.mxu1  ;;  %v5174_v50 = vpop.f32.mrf.mxu0 }
 0x50e   : > { %v6903_v0 = vpack.c.bf16 %v9580_v13, %v9580_v13  ;;  %v5173_v19 = vadd.f32 %v5172_v25, %v4948_v63 }
 0x50f   : > { %v4952_v22 = vpop.f32.mrf.mxu1  ;;  %v5177_v33 = vpop.f32.mrf.mxu0 }
 0x510   : > { %5501 = vst.msk [vmem:[%s9311_s17 + $0x88] sm:$0xf] %vm5466_vm5, %v6903_v0  ;;  %v9588_v21 = vmax.f32 %v5173_v19, 0.0  ;;  %v4953_v10 = vadd.f32 %v4952_v22, %v4728_v34  ;;  %v4736_v34 = vadd.f32 %v9298_v6, %v9245_v29 }
 0x511   : > { %v4954_v46 = vpop.f32.mrf.mxu1  ;;  %v5179_v58 = vpop.f32.mrf.mxu0 }
 0x512   : > { %v6904_v11 = vpack.c.bf16 %v9588_v21, %v9588_v21  ;;  %v5178_v43 = vadd.f32 %v5177_v33, %v4953_v10 }
 0x513   : > { %v4955_v44 = vpop.f32.mrf.mxu1  ;;  %v5180_v37 = vpop.f32.mrf.mxu0 }
 0x514   : > { %5502 = vst.msk [vmem:[%s9311_s17 + $0x8c] sm:$0xf] %vm5466_vm5, %v6904_v11  ;;  %v9596_v25 = vmax.f32 %v5178_v43, 0.0  ;;  %v4956_v63 = vadd.f32 %v4955_v44, %v4731_v47  ;;  %v4739_v47 = vadd.f32 %v9298_v6, %v9249_v35 }
 0x515   : > { %v4957_v50 = vpop.f32.mrf.mxu1  ;;  %v5182_v0 = vpop.f32.mrf.mxu0 }
 0x516   : > { %v6905_v17 = vpack.c.bf16 %v9596_v25, %v9596_v25  ;;  %v5181_v19 = vadd.f32 %v5180_v37, %v4956_v63 }
 0x517   : > { %v4960_v22 = vpop.f32.mrf.mxu1  ;;  %v5185_v46 = vpop.f32.mrf.mxu0 }
 0x518   : > { %5503 = vst.msk [vmem:[%s9311_s17 + $0x90] sm:$0xf] %vm5466_vm5, %v6905_v17  ;;  %v9604_v33 = vmax.f32 %v5181_v19, 0.0  ;;  %v4961_v10 = vadd.f32 %v4960_v22, %v4736_v34  ;;  %v4744_v34 = vadd.f32 %v9298_v6, %v9257_v48 }
 0x519   : > { %v4962_v58 = vpop.f32.mrf.mxu1  ;;  %v5187_v11 = vpop.f32.mrf.mxu0 }
 0x51a   : > { %v6906_v29 = vpack.c.bf16 %v9604_v33, %v9604_v33  ;;  %v5186_v43 = vadd.f32 %v5185_v46, %v4961_v10 }
 0x51b   : > { %v4963_v44 = vpop.f32.mrf.mxu1  ;;  %v5188_v50 = vpop.f32.mrf.mxu0 }
 0x51c   : > { %5504 = vst.msk [vmem:[%s9311_s17 + $0x94] sm:$0xf] %vm5466_vm5, %v6906_v29  ;;  %v9612_v37 = vmax.f32 %v5186_v43, 0.0  ;;  %v4964_v63 = vadd.f32 %v4963_v44, %v4739_v47  ;;  %v4747_v47 = vadd.f32 %v9298_v6, %v9261_v54 }
 0x51d   : > { %v4965_v0 = vpop.f32.mrf.mxu1  ;;  %v5190_v17 = vpop.f32.mrf.mxu0 }
 0x51e   : > { %v6907_v35 = vpack.c.bf16 %v9612_v37, %v9612_v37  ;;  %v5189_v19 = vadd.f32 %v5188_v50, %v4964_v63 }
 0x51f   : > { %v4968_v22 = vpop.f32.mrf.mxu1  ;;  %v5193_v58 = vpop.f32.mrf.mxu0 }
 0x520   : > { %5505 = vst.msk [vmem:[%s9311_s17 + $0x98] sm:$0xf] %vm5466_vm5, %v6907_v35  ;;  %v9620_v46 = vmax.f32 %v5189_v19, 0.0  ;;  %v4969_v10 = vadd.f32 %v4968_v22, %v4744_v34  ;;  %v4752_v34 = vadd.f32 %v9298_v6, %v9269_v5 }
 0x521   : > { %v4970_v11 = vpop.f32.mrf.mxu1  ;;  %v5195_v29 = vpop.f32.mrf.mxu0 }
 0x522   : > { %v6908_v48 = vpack.c.bf16 %v9620_v46, %v9620_v46  ;;  %v5194_v43 = vadd.f32 %v5193_v58, %v4969_v10 }
 0x523   : > { %v4971_v44 = vpop.f32.mrf.mxu1  ;;  %v5196_v0 = vpop.f32.mrf.mxu0 }
 0x524   : > { %5506 = vst.msk [vmem:[%s9311_s17 + $0x9c] sm:$0xf] %vm5466_vm5, %v6908_v48  ;;  %v9628_v50 = vmax.f32 %v5194_v43, 0.0  ;;  %v4972_v63 = vadd.f32 %v4971_v44, %v4747_v47  ;;  %v4755_v47 = vadd.f32 %v9298_v6, %v9273_v15 }
 0x525   : > { %v4973_v17 = vpop.f32.mrf.mxu1  ;;  %v5198_v35 = vpop.f32.mrf.mxu0 }
 0x526   : > { %v6909_v54 = vpack.c.bf16 %v9628_v50, %v9628_v50  ;;  %v5197_v19 = vadd.f32 %v5196_v0, %v4972_v63 }
 0x527   : > { %v4976_v22 = vpop.f32.mrf.mxu1  ;;  %v5201_v11 = vpop.f32.mrf.mxu0 }
 0x528   : > { %5507 = vst.msk [vmem:[%s9311_s17 + $0xa0] sm:$0xf] %vm5466_vm5, %v6909_v54  ;;  %v9636_v58 = vmax.f32 %v5197_v19, 0.0  ;;  %v4977_v10 = vadd.f32 %v4976_v22, %v4752_v34  ;;  %v4760_v34 = vadd.f32 %v9298_v6, %v9281_v31 }
 0x529   : > { %v4978_v29 = vpop.f32.mrf.mxu1  ;;  %v5203_v48 = vpop.f32.mrf.mxu0 }
 0x52a   : > { %v6910_v5 = vpack.c.bf16 %v9636_v58, %v9636_v58  ;;  %v5202_v43 = vadd.f32 %v5201_v11, %v4977_v10 }
 0x52b   : > { %v4979_v44 = vpop.f32.mrf.mxu1  ;;  %v5204_v17 = vpop.f32.mrf.mxu0 }
 0x52c   : > { %5508 = vst.msk [vmem:[%s9311_s17 + $0xa4] sm:$0xf] %vm5466_vm5, %v6910_v5  ;;  %v9644_v0 = vmax.f32 %v5202_v43, 0.0  ;;  %v4980_v63 = vadd.f32 %v4979_v44, %v4755_v47  ;;  %v4763_v47 = vadd.f32 %v9298_v6, %v9285_v42 }
 0x52d   : > { %v4981_v35 = vpop.f32.mrf.mxu1  ;;  %v5206_v54 = vpop.f32.mrf.mxu0 }
 0x52e   : > { %v6911_v15 = vpack.c.bf16 %v9644_v0, %v9644_v0  ;;  %v5205_v19 = vadd.f32 %v5204_v17, %v4980_v63 }
 0x52f   : > { %v4984_v22 = vpop.f32.mrf.mxu1  ;;  %v5209_v29 = vpop.f32.mrf.mxu0 }
 0x530   : > { %5509 = vst.msk [vmem:[%s9311_s17 + $0xa8] sm:$0xf] %vm5466_vm5, %v6911_v15  ;;  %v5267_v11 = vmax.f32 %v5205_v19, 0.0  ;;  %v4985_v10 = vadd.f32 %v4984_v22, %v4760_v34  ;;  %v4768_v34 = vadd.f32 %v9298_v6, %v9291_v56 }
 0x531   : > { %v4986_v48 = vpop.f32.mrf.mxu1  ;;  %v5211_v5 = vpop.f32.mrf.mxu0 }
 0x532   : > { %v6912_v43 = vpack.c.bf16 %v5267_v11, %v5267_v11  ;;  %v5210_v44 = vadd.f32 %v5209_v29, %v4985_v10 }
 0x533   : > { %v4987_v35 = vpop.f32.mrf.mxu1  ;;  %v5212_v31 = vpop.f32.mrf.mxu0 }
 0x534   : > { %5510 = vst.msk [vmem:[%s9311_s17 + $0xac] sm:$0xf] %vm5466_vm5, %v6912_v43  ;;  %v5268_v54 = vmax.f32 %v5210_v44, 0.0  ;;  %v4988_v17 = vadd.f32 %v4987_v35, %v4763_v47  ;;  %v4771_v47 = vadd.f32 %v9298_v6, %v9295_v3 }
 0x535   : > { %v4989_v63 = vpop.f32.mrf.mxu1  ;;  %v5214_v1 = vpop.f32.mrf.mxu0 }
 0x536   : > { %v6913_v15 = vpack.c.bf16 %v5268_v54, %v5268_v54  ;;  %v5213_v19 = vadd.f32 %v5212_v31, %v4988_v17 }
 0x537   : > { %v4992_v22 = vpop.f32.mrf.mxu1  ;;  %v5217_v48 = vpop.f32.mrf.mxu0 }
 0x538   : > { %5511 = vst.msk [vmem:[%s9311_s17 + $0xb0] sm:$0xf] %vm5466_vm5, %v6913_v15  ;;  %v5269_v42 = vmax.f32 %v5213_v19, 0.0  ;;  %v4993_v29 = vadd.f32 %v4992_v22, %v4768_v34 }
 0x539   : > { %v4994_v10 = vpop.f32.mrf.mxu1  ;;  %v5219_v5 = vpop.f32.mrf.mxu0 }
 0x53a   : > { %v6914_v1 = vpack.c.bf16 %v5269_v42, %v5269_v42  ;;  %v5218_v43 = vadd.f32 %v5217_v48, %v4993_v29 }
 0x53b   : > { %v4995_v44 = vpop.f32.mrf.mxu1  ;;  %v5220_v35 = vpop.f32.mrf.mxu0 }
 0x53c   : > { %5512 = vst.msk [vmem:[%s9311_s17 + $0xb4] sm:$0xf] %vm5466_vm5, %v6914_v1  ;;  %v5270_v56 = vmax.f32 %v5218_v43, 0.0  ;;  %v4996_v31 = vadd.f32 %v4995_v44, %v4771_v47 }
 0x53d   : > { %v4997_v17 = vpop.f32.mrf.mxu1  ;;  %v5222_v63 = vpop.f32.mrf.mxu0 }
 0x53e   : > { %v6915_v15 = vpack.c.bf16 %v5270_v56, %v5270_v56  ;;  %v5221_v19 = vadd.f32 %v5220_v35, %v4996_v31 }
 0x540   : > { %5513 = vst.msk [vmem:[%s9311_s17 + $0xb8] sm:$0xf] %vm5466_vm5, %v6915_v15  ;;  %v5271_v34 = vmax.f32 %v5221_v19, 0.0  ;;  %5518 = sbr.rel (%p6665_p7) target bundleno = 1583 (0x62f), region = 100 }
 0x542   : > { %v6916_v22 = vpack.c.bf16 %v5271_v34, %v5271_v34 }
 0x544   : > { %5514 = vst.msk [vmem:[%s9311_s17 + $0xbc] sm:$0xf] %vm5466_vm5, %v6916_v22 }
 0x545   : > { %7017 = vmatprep.subr.mxu0 %v9556_v62  ;;  %v8246_v3 = vmov 0.0   ;;  %v8247_v6 = vmov 1983009808   ;;  %vm8248_vm6 = vmmov 0   ;;  %vm5682_vm7 = vcmask 254976  }
 0x546   : > { %7018 = vmatpush3.msra.mxu0 %v9427_v23  ;;  %7277 = vmatprep.subr.mxu1 %v8246_v3 }
 0x547   : > { %7019 = vmatprep.subr.mxu0 %v9548_v2  ;;  %7278 = vmatpush3.msra.mxu1 %v5271_v34 }
 0x548   : > { %7020 = vmatpush3.msra.mxu0 %v9419_v36  ;;  %7279 = vmatprep.subr.mxu1 %v8246_v3  ;;  %v5526_v36 = vlaneseq }
 0x549   : > { %7021 = vmatprep.subr.mxu0 %v9540_v55  ;;  %7280 = vmatpush3.msra.mxu1 %v5270_v56 }
 0x54a   : > { %7022 = vmatpush3.msra.mxu0 %v9411_v32  ;;  %7281 = vmatprep.subr.mxu1 %v8246_v3  ;;  %v5524_v32 = vunpack.c.l.s4 %v8247_v6 }
 0x54b   : > { %7023 = vmatprep.subr.mxu0 %v9532_v41  ;;  %7282 = vmatpush3.msra.mxu1 %v5269_v42 }
 0x54c   : > { %7024 = vmatpush3.msra.mxu0 %v9403_v24  ;;  %7283 = vmatprep.subr.mxu1 %v8246_v3  ;;  %v5527_v24 = vshrl.u32 %v5526_v36, 7 }
 0x54d   : > { %7025 = vmatprep.subr.mxu0 %v9524_v30  ;;  %7284 = vmatpush3.msra.mxu1 %v5268_v54 }
 0x54e   : > { %7026 = vmatpush3.msra.mxu0 %v9395_v20  ;;  %7285 = vmatprep.subr.mxu1 %v8246_v3  ;;  %v5525_v20 = vunpack.c.0.s8 %v5524_v32 }
 0x54f   : > { %7027 = vmatprep.subr.mxu0 %v9516_v14  ;;  %7286 = vmatpush3.msra.mxu1 %v5267_v11 }
 0x550   : > { %7028 = vmatpush3.msra.mxu0 %v9387_v12  ;;  %7287 = vmatprep.subr.mxu1 %v8246_v3 }
 0x551   : > { %7029 = vmatprep.subr.mxu0 %v9508_v4  ;;  %7288 = vmatpush3.msra.mxu1 %v9644_v0 }
 0x552   : > { %7030 = vmatpush3.msra.mxu0 %v9379_v40  ;;  %7289 = vmatprep.subr.mxu1 %v8246_v3  ;;  %v5528_v40 = vsub.s32 %v5525_v20, %v5527_v24 }
 0x553   : > { %7031 = vmatprep.subr.mxu0 %v9500_v53  ;;  %7290 = vmatpush3.msra.mxu1 %v9636_v58 }
 0x554   : > { %7032 = vmatpush3.msra.mxu0 %v9371_v18  ;;  %7291 = vmatprep.subr.mxu1 %v8246_v3  ;;  %v5520_v18 = vld [vmem:[%s412_s6] sm:$0x3f] }
 0x555   : > { %7033 = vmatprep.subr.mxu0 %v9492_v28  ;;  %7292 = vmatpush3.msra.mxu1 %v9628_v50 }
 0x556   : > { %7034 = vmatpush3.msra.mxu0 %v9363_v39  ;;  %7293 = vmatprep.subr.mxu1 %v8246_v3  ;;  %v5529_v39 = vrot.slane %v5520_v18, %v5528_v40 }
 0x557   : > { %7035 = vmatprep.subr.mxu0 %v9484_v61  ;;  %7294 = vmatpush3.msra.mxu1 %v9620_v46 }
 0x558   : > { %7036 = vmatpush3.msra.mxu0 %v9355_v7  ;;  %7295 = vmatprep.subr.mxu1 %v8246_v3  ;;  %v5537_v7 = vcombine.high %v5529_v39, %v5529_v39 }
 0x559   : > { %7037 = vmatprep.subr.mxu0 %v9476_v8  ;;  %7296 = vmatpush3.msra.mxu1 %v9612_v37 }
 0x55a   : > { %7038 = vmatpush3.msra.mxu0 %v9347_v26  ;;  %7297 = vmatprep.subr.mxu1 %v8246_v3  ;;  %v5522_v26 = vcombine.high %v5520_v18, %v5520_v18 }
 0x55b   : > { %7039 = vmatprep.subr.mxu0 %v9468_v16  ;;  %7298 = vmatpush3.msra.mxu1 %v9604_v33 }
 0x55c   : > { %7040 = vmatpush3.msra.mxu0 %v9339_v51  ;;  %7299 = vmatprep.subr.mxu1 %v8246_v3 }
 0x55d   : > { %7041 = vmatprep.subr.mxu0 %v9460_v45  ;;  %7300 = vmatpush3.msra.mxu1 %v9596_v25 }
 0x55e   : > { %7042 = vmatpush3.msra.mxu0 %v9331_v27  ;;  %7301 = vmatprep.subr.mxu1 %v8246_v3  ;;  %v5536_v27 = vrot.slane %v5522_v26, %v5528_v40 }
 0x55f   : > { %7043 = vmatprep.subr.mxu0 %v9452_v49  ;;  %7302 = vmatpush3.msra.mxu1 %v9588_v21 }
 0x560   : > { %7044 = vmatpush3.msra.mxu0 %v9323_v59  ;;  %7303 = vmatprep.subr.mxu1 %v8246_v3  ;;  %v9858_v59 = vld [vmem:[#allocation30_spill] sm:$0xff] }
 0x561   : > { %7045 = vmatprep.subr.mxu0 %v9444_v57  ;;  %7304 = vmatpush3.msra.mxu1 %v9580_v13 }
 0x562   : > { %7046 = vmatpush3.msra.mxu0 %v9315_v38  ;;  %7305 = vmatprep.subr.mxu1 %v8246_v3 }
 0x563   : > { %7047 = vmatprep.subr.mxu0 %v9435_v60  ;;  %5605 = vmatprep.mubr.f32.mxu0 %v5537_v7  ;;  %v5519_v60 = vld [vmem:[#allocation4] sm:$0x3] }
 0x564   : > { %7048 = vmatpush3.msra.mxu0 %v9305_v52  ;;  %7306 = vmatpush3.msra.mxu1 %v9572_v9 }
 0x565   : > { %5606 = vmatmul.mubr.f32.vlgmr.msra.gmra.mxu0 %v5529_v39  ;;  %7307 = vmatprep.subr.mxu1 %v8246_v3 }
 0x566   : > { %7308 = vmatpush3.msra.mxu1 %v9858_v59  ;;  %7309 = vmatprep.mubr.msk.f32.mxu1 %vm8248_vm6, %v8246_v3 }
 0x567   : > { %7310 = vmatmul.mubr.f32.vlgmr.msra.gmra.mxu1 %v5536_v27 }
 0x625   : > { %v7049_v38 = vpop.f32.mrf.mxu0 }
 0x627   : > { %v7050_v51 = vpop.f32.mrf.mxu0  ;;  %v5677_v12 = vpop.f32.mrf.mxu1 }
 0x628   : > { %v7051_v23 = vadd.f32 %v7050_v51, %v7049_v38 }
 0x629   : > { %v7311_v57 = vpop.f32.mrf.mxu1 }
 0x62a   : > { %v5678_v49 = vadd.f32 %v7051_v23, %v5677_v12 }
 0x62c   : > { %v5681_v52 = vadd.f32 %v5678_v49, %v5519_v60 }
 0x62e   : > { %5683 = vst.msk [vmem:[#allocation4] sm:$0x3] %vm5682_vm7, %v5681_v52 }
 0x62f PF: > { %p5684_p8 = scmp.eq.s32.totalorder %s8213_s15, 1 }
 0x631   : > { %p5685_p5 = pnand %p5684_p8, %p5515_p13 }
 0x632   : > { %s9859_s30 = sld [smem:[#allocation35_spill]] (!%p5685_p5) }
 0x633   : > { %5688 = sbr.rel (%p5685_p5) target bundleno = 1994 (0x7ca), region = 104 }
 0x638   : > { %s9860_s26 = smov %s9859_s30  ;;  %v5693_v45 = vld [vmem:[%s9859_s30 + $0x18] sm:$0xff]  ;;  %v8249_v16 = vmov 0.0   ;;  %vm8250_vm8 = vmmov 0   ;;  %v5689_v53 = vld [vmem:[#allocation4] sm:$0x3]  ;;  %vm5701_vm9 = vcmask 261120  }
 0x639   : > { %7312 = vmatprep.subr.mxu0 %v8249_v16  ;;  %v5692_v8 = vld [vmem:[%s9860_s26 + $0x10] sm:$0xff]  ;;  %7320 = vmatprep.mubr.msk.f32.mxu0 %vm8250_vm8, %v8249_v16  ;;  %v5691_v61 = vld [vmem:[%s9860_s26 + $0x8] sm:$0xff]  ;;  %v5690_v28 = vld [vmem:[%s9860_s26] sm:$0xff]  ;;  %vm5785_vm10 = vcmask 130048  }
 0x63a   : > { %7313 = vmatpush3.msra.mxu0 %v5693_v45  ;;  %7323 = vmatprep.subr.mxu1 %v8249_v16  ;;  %v5777_v4 = vld [vmem:[#allocation14 + $0x8] sm:$0xff]  ;;  %v5776_v14 = vld [vmem:[#allocation14] sm:$0xff]  ;;  %v6666_v30 = vld [vmem:[#allocation13] ss:$0 sm:$0xff] }
 0x63b   : > { %7314 = vmatprep.subr.mxu0 %v8249_v16  ;;  %7327 = vmatprep.mubr.msk.f32.mxu1 %vm8250_vm8, %v8249_v16  ;;  %v6668_v9 = vld [vmem:[#allocation16] ss:$0 sm:$0xff] }
 0x63c   : > { %7315 = vmatpush3.msra.mxu0 %v5692_v8  ;;  %7324 = vmatpush3.msra.mxu1 %v5777_v4 }
 0x63d   : > { %7316 = vmatprep.subr.mxu0 %v8249_v16  ;;  %7325 = vmatprep.subr.mxu1 %v8249_v16 }
 0x63e   : > { %7317 = vmatpush3.msra.mxu0 %v5691_v61  ;;  %7326 = vmatpush3.msra.mxu1 %v5776_v14 }
 0x63f   : > { %7318 = vmatprep.subr.mxu0 %v8249_v16 }
 0x640   : > { %7319 = vmatpush3.msra.mxu0 %v5690_v28 }
 0x641   : > { %7321 = vmatmul.mubr.msk.f32.vlgmr.msra.gmra.mxu0 %vm5701_vm9, %v5689_v53 }
 0x701   : > { %v5771_v41 = vpop.f32.mrf.mxu0 }
 0x702   : > { %v5772_v55 = vadd.f32 %v6666_v30, %v5771_v41 }
 0x703   : > { %v7322_v2 = vpop.f32.mrf.mxu0 }
 0x704   : > { %v5775_v62 = vmax.f32 %v5772_v55, 0.0 }
 0x706   : > { %7328 = vmatmul.mubr.msk.f32.vlgmr.msra.gmra.mxu1 %vm5785_vm10, %v5775_v62 }
 0x7c6   : > { %v5855_v13 = vpop.f32.mrf.mxu1 }
 0x7c7   : > { %v5856_v21 = vadd.f32 %v6668_v9, %v5855_v13 }
 0x7c8   : > { %v7329_v25 = vpop.f32.mrf.mxu1 }
 0x7c9   : > { %5859 = vst [vmem:[#allocation17] sm:$0x3] %v5856_v21 }
 0x7ca PF: > { %p7430_p12 = scmp.eq.s32.totalorder %s8358_s22, 5  ;;  %s8251_s3 = smov [#allocation17]  }
 0x7cb   : > { %s5867_s2 = sshll.u32 %s8251_s3, 4  ;;  %s5868_s2 = int_to_ptr.vmem [resolvable:$true] %s5867_s2 }
 0x7cc   : > { %s8091_s9 = scalar_lea.vmem %s5868_s2, 32  ;;  %p8098_p0 = scmp.lt.s32.totalorder %s5868_s2, %s5868_s2 }
 0x7cd   : > { %p8092_p6 = scmp.ne.s32.totalorder %s5868_s2, %s8091_s9  ;;  %p8099_p4 = scmp.lt.s32.totalorder %s8091_s9, %s8091_s9 }
 0x7cf   : > { %p8093_p1 = pnand %p8092_p6, %p7430_p12  ;;  %p8100_p11 = por %p8099_p4, %p8098_p0 }
 0x7d1   : > { %p8094_p2 = pneg %p8093_p1 }
 0x7d3   : > { %p8101_p3 = pnand %p8100_p11, %p8094_p2 }
 0x7d5   : > { %8104 = shalt.err (!%p8101_p3)
}
 0x7d6   : > { %s9861_s28 = sld [smem:[#allocation39_spill]] }
 0x7dc   : > { %7395 = dma.vmem_to_hbm [thread:$0]  (%p7430_p12), %s5868_s2, 32, %s9861_s28, [#allocation7]  }
 0x7dd   : > { %8184 = dma.done.wait (%p7430_p12), [#allocation7], 32  }
 0x7de   : > { %8186 = vsyncadd (%p7430_p12), [#allocation7], 4294967264 }
 0x7df PF: > { %s28_s19 = sadd.s32 1, %s8229_s19   ;;  %s9862_s24 = sld [smem:[#allocation25_spill]] }
 0x7e0   : > { %p25_p9 = scmp.ge.s32.totalorder %s28_s19, 8   ;;  %s9863_s14 = sld [smem:[#allocation29_spill]] }
 0x7e1   : > { %s9864_s15 = sld [smem:[#allocation26_spill]]  ;;  %s9867_s30 = smov %s8193_s10 }
 0x7e2   : > { %s9865_s17 = sld [smem:[#allocation27_spill]]  ;;  %s9868_s10 = smov %s8197_s11 }
 0x7e3   : > { %s9866_s1 = sld [smem:[#allocation28_spill]]  ;;  %s9869_s11 = smov %s8428_s29 }
 0x7e4   : > { %s9870_s12 = smov %s8205_s13  ;;  %s9872_s16 = smov %s8225_s18 }
 0x7e5   : > { %s9871_s13 = smov %s9862_s24  ;;  %27 = sbr.rel (!%p25_p9) target bundleno = 22 (0x16), region = 156 }
 0x7e9   : > { %s9873_s18 = smov %s9866_s1 }
 0x7ea   :  { %5880 = vsyncpa [#allocation6], 1 }
 0x7eb   :  { %5882 = vsyncpa [#allocation6 + $0x1], 1 }
 0x7ec   :  { %5883 = vsyncpa [#allocation9], 1 }
 0x7ed   :  { %5885 = vsyncpa [#allocation9 + $0x1], 1 }
 0x7ee   :  { %5886 = vsyncpa [#allocation12], 1 }
 0x7ef   :  { %5888 = vsyncpa [#allocation12 + $0x1], 1 }
 0x7f0   :  { %5889 = vsyncpa [#allocation15], 1 }
 0x7f1   :  { %5890 = vsyncpa [#allocation7], 1 }
 0x7f2   :  { %5892 = vsyncpa [#allocation7 + $0x1], 1 }

</bundles_post_ra>
